<compile_context>
chip_gen: v5e
topology: v5e:2x2
jax: 0.10.0
libtpu: 0.0.40
codegen_flags: <defaults>
</compile_context>

<pallas_src>
import math

import jax
import jax.numpy as jnp
from jax.experimental import pallas as pl
from jax.experimental.pallas import tpu as pltpu

NUM_LANDMARKS = 10
HEAD_DIM = 16
NUM_HEAD = 8
N_ITER = 6  # Newton-Schulz iterations in iterative_inv


def _dot(a, b):
    return jnp.dot(a, b, preferred_element_type=jnp.float32)


def _dot_bt(a, b):
    # a @ b.T without materializing the transpose (contract last dims).
    return jax.lax.dot_general(
        a, b, (((1,), (1,)), ((), ())), preferred_element_type=jnp.float32)


def nystrom_kernel(q_ref, k_ref, v_ref, qlbd_ref, klbd_ref, k2bd_ref,
                   v0bd_ref, gsum_ref, mask_ref, o_ref):
    # One batch per grid step; all heads packed together.
    q = q_ref[0]          # (S, H*D)    pre-scaled, lane-dense (head-major cols)
    k = k_ref[0]          # (S, H*D)
    v = v_ref[0]          # (S, H*D)
    qlbd = qlbd_ref[0]    # (H*L, H*D)  block-diagonal landmark Q
    klbd = klbd_ref[0]    # (H*L, H*D)  block-diagonal landmark K
    k2bd = k2bd_ref[0]    # (H*L, H*L)  block-diag softmax(Ql Kl^T)
    v0bd = v0bd_ref[0]    # (H*L, H*L)  init_scale * k2bd^T  (NS init)
    gsum = gsum_ref[...]  # (H*L, H*L)  per-head group-sum matrix (ones blocks)
    mask = mask_ref[...]  # (H*L, H*D)  per-head block mask

    hl = k2bd.shape[0]

    # ---- kernel_1 = per-head softmax(Q Kl^T), packed as (S, H*L) ------------
    # Block-diagonal Kl ensures no cross-head mixing in a single matmul.
    s1 = _dot_bt(q, klbd)                                       # (S, H*L)
    # Subtracting the global row max is a valid stabilizer for each head's
    # group (the same per-row constant cancels inside each group of L columns).
    e1 = jnp.exp(s1 - jnp.max(s1, axis=-1, keepdims=True))
    d1 = _dot(e1, gsum)               # per-head denominators, broadcast back
    k1 = e1 * pl.reciprocal(d1)                                 # (S, H*L)

    # ---- kernel_3 = per-head softmax(Ql K^T), packed as (H*L, S) ------------
    s3 = _dot_bt(qlbd, k)                                       # (H*L, S)
    e3 = jnp.exp(s3 - jnp.max(s3, axis=-1, keepdims=True))
    k3 = e3 * pl.reciprocal(jnp.sum(e3, axis=-1, keepdims=True))

    # ---- Newton-Schulz pseudo-inverse of block-diagonal kernel_2 ------------
    row = jax.lax.broadcasted_iota(jnp.int32, (hl, hl), 0)
    col = jax.lax.broadcasted_iota(jnp.int32, (hl, hl), 1)
    eye = (row == col).astype(jnp.float32)
    c7 = 7.0 * eye        # hoisted loop invariants
    c13 = 13.0 * eye
    c15 = 15.0 * eye

    v_inv = v0bd
    for _ in range(N_ITER):
        kv = _dot(k2bd, v_inv)
        t = c7 - kv
        t = c15 - _dot(kv, t)
        t = c13 - _dot(kv, t)
        v_inv = _dot(0.25 * v_inv, t)

    # ---- X = kernel_1 @ inv(kernel_2) @ (kernel_3 @ V) ----------------------
    # Same association as the torch reference: (k1 @ inv) @ (k3 @ V).
    k3v = _dot(k3, v) * mask          # (H*L, H*D): keep within-head blocks only
    a = _dot(k1, v_inv)               # (S, H*L)
    o_ref[0] = _dot(a, k3v).astype(o_ref.dtype)   # (S, H*D) lane-dense store


def nystrom_attention(Q, K, V, *, num_landmarks=NUM_LANDMARKS,
                      head_dim=HEAD_DIM):
    B, H, S, D = Q.shape
    L = num_landmarks
    assert S % L == 0 and D == head_dim
    HL, HD = H * L, H * D

    inv_root = 1.0 / math.sqrt(math.sqrt(head_dim))
    Qs = (Q * inv_root).astype(jnp.float32)
    Ks = (K * inv_root).astype(jnp.float32)
    Vf = V.astype(jnp.float32)

    # Landmark means (cheap glue, plain JAX).
    Ql = Qs.reshape(B, H, L, S // L, D).mean(axis=-2)   # (B, H, L, D)
    Kl = Ks.reshape(B, H, L, S // L, D).mean(axis=-2)

    # kernel_2 for all (b, h): needed here for the GLOBAL Newton-Schulz init
    # scalar (a max over all batches & heads); reused by the kernel (below) so
    # it is not recomputed per head.
    k2 = jax.nn.softmax(jnp.einsum("bhld,bhmd->bhlm", Ql, Kl), axis=-1)
    init_scale = 1.0 / (jnp.max(jnp.sum(jnp.abs(k2), axis=-2))
                        * jnp.max(jnp.sum(jnp.abs(k2), axis=-1)))

    eyeH = jnp.eye(H, dtype=jnp.float32)

    # Lane-dense packing: last dim is H*D (== 128 for the default config).
    q_flat = jnp.transpose(Qs, (0, 2, 1, 3)).reshape(B, S, HD)
    k_flat = jnp.transpose(Ks, (0, 2, 1, 3)).reshape(B, S, HD)
    v_flat = jnp.transpose(Vf, (0, 2, 1, 3)).reshape(B, S, HD)

    # Block-diagonal packings: head h occupies rows [h*L, (h+1)*L) and columns
    # [h*D, (h+1)*D) (or [h*L, (h+1)*L) for the L x L kernel).
    ql_bd = (Ql[:, :, :, None, :] * eyeH[None, :, None, :, None]).reshape(B, HL, HD)
    kl_bd = (Kl[:, :, :, None, :] * eyeH[None, :, None, :, None]).reshape(B, HL, HD)
    k2_bd = (k2[:, :, :, None, :] * eyeH[None, :, None, :, None]).reshape(B, HL, HL)
    v0_bd = init_scale * jnp.swapaxes(k2_bd, -1, -2)

    # Compile-time constant helper matrices.
    gsum = jnp.kron(eyeH, jnp.ones((L, L), jnp.float32))   # (HL, HL)
    mask = jnp.kron(eyeH, jnp.ones((L, D), jnp.float32))   # (HL, HD)

    out_flat = pl.pallas_call(
        nystrom_kernel,
        out_shape=jax.ShapeDtypeStruct((B, S, HD), jnp.float32),
        grid=(B,),
        in_specs=[
            pl.BlockSpec((1, S, HD), lambda b: (b, 0, 0)),    # Q (scaled, packed)
            pl.BlockSpec((1, S, HD), lambda b: (b, 0, 0)),    # K (scaled, packed)
            pl.BlockSpec((1, S, HD), lambda b: (b, 0, 0)),    # V (packed)
            pl.BlockSpec((1, HL, HD), lambda b: (b, 0, 0)),   # Q landmarks (block-diag)
            pl.BlockSpec((1, HL, HD), lambda b: (b, 0, 0)),   # K landmarks (block-diag)
            pl.BlockSpec((1, HL, HL), lambda b: (b, 0, 0)),   # kernel_2 (block-diag)
            pl.BlockSpec((1, HL, HL), lambda b: (b, 0, 0)),   # NS init (block-diag)
            pl.BlockSpec((HL, HL), lambda b: (0, 0)),         # group-sum matrix
            pl.BlockSpec((HL, HD), lambda b: (0, 0)),         # per-head block mask
        ],
        out_specs=pl.BlockSpec((1, S, HD), lambda b: (b, 0, 0)),
        compiler_params=pltpu.CompilerParams(
            dimension_semantics=("parallel",)),
    )(q_flat, k_flat, v_flat, ql_bd, kl_bd, k2_bd, v0_bd, gsum, mask)

    # (B, S, H*D) -> (B, H, S, D)
    return jnp.transpose(out_flat.reshape(B, S, H, D), (0, 2, 1, 3))


def nystrom_reference(Q, K, V, *, num_landmarks=NUM_LANDMARKS,
                      head_dim=HEAD_DIM):
    """Pure-JAX mirror of the PyTorch forward, for correctness checking."""
    B, H, S, D = Q.shape
    L = num_landmarks
    s = 1.0 / math.sqrt(math.sqrt(head_dim))
    Qs, Ks = Q * s, K * s
    Ql = Qs.reshape(B, H, L, S // L, D).mean(axis=-2)
    Kl = Ks.reshape(B, H, L, S // L, D).mean(axis=-2)
    k1 = jax.nn.softmax(Qs @ jnp.swapaxes(Kl, -1, -2), axis=-1)
    k2 = jax.nn.softmax(Ql @ jnp.swapaxes(Kl, -1, -2), axis=-1)
    k3 = jax.nn.softmax(Ql @ jnp.swapaxes(Ks, -1, -2), axis=-1)
    eye = jnp.eye(L, dtype=jnp.float32)
    Vm = (1.0 / (jnp.max(jnp.sum(jnp.abs(k2), axis=-2))
                 * jnp.max(jnp.sum(jnp.abs(k2), axis=-1)))
          ) * jnp.swapaxes(k2, -1, -2)
    for _ in range(N_ITER):
        KV = k2 @ Vm
        Vm = (0.25 * Vm) @ (13.0 * eye - KV @ (15.0 * eye - KV @ (7.0 * eye - KV)))
    return k1 @ Vm @ (k3 @ V)


if __name__ == "__main__":
    B, H, S, D = 2, NUM_HEAD, 40, HEAD_DIM  # S must be divisible by num_landmarks
    key = jax.random.PRNGKey(0)
    kq, kk, kv = jax.random.split(key, 3)
    Q = jax.random.normal(kq, (B, H, S, D), dtype=jnp.float32)
    K = jax.random.normal(kk, (B, H, S, D), dtype=jnp.float32)
    V = jax.random.normal(kv, (B, H, S, D), dtype=jnp.float32)

    out = nystrom_attention(Q, K, V)
    out = jax.block_until_ready(out)

    ref = nystrom_reference(Q, K, V)
    assert out.shape == (B, H, S, D)
    assert jnp.allclose(out, ref, atol=2e-4, rtol=2e-4), (
        float(jnp.max(jnp.abs(out - ref))))

    print("KERNEL_OK")
</pallas_src>

<mosaic_0001>
module attributes {stable_mosaic.version = 11 : i64} {
  func.func @nystrom_kernel(%arg0: i32, %arg1: memref<1x40x128xf32, #tpu.memory_space<vmem>>, %arg2: memref<1x40x128xf32, #tpu.memory_space<vmem>>, %arg3: memref<1x40x128xf32, #tpu.memory_space<vmem>>, %arg4: memref<1x80x128xf32, #tpu.memory_space<vmem>>, %arg5: memref<1x80x128xf32, #tpu.memory_space<vmem>>, %arg6: memref<1x80x80xf32, #tpu.memory_space<vmem>>, %arg7: memref<1x80x80xf32, #tpu.memory_space<vmem>>, %arg8: memref<80x80xf32, #tpu.memory_space<vmem>>, %arg9: memref<80x128xf32, #tpu.memory_space<vmem>>, %arg10: memref<1x40x128xf32, #tpu.memory_space<vmem>>) attributes {dimension_semantics = [#tpu.dimension_semantics<parallel>], iteration_bounds = array<i64: 2>, scalar_prefetch = 0 : i64, scratch_operands = 0 : i64, tpu.core_type = #tpu.core_type<tc>, window_params = [{transform_indices = @transform_0, window_bounds = array<i64: 1, 40, 128>}, {transform_indices = @transform_1, window_bounds = array<i64: 1, 40, 128>}, {transform_indices = @transform_2, window_bounds = array<i64: 1, 40, 128>}, {transform_indices = @transform_3, window_bounds = array<i64: 1, 80, 128>}, {transform_indices = @transform_4, window_bounds = array<i64: 1, 80, 128>}, {transform_indices = @transform_5, window_bounds = array<i64: 1, 80, 80>}, {transform_indices = @transform_6, window_bounds = array<i64: 1, 80, 80>}, {pipeline_mode = #tpu.pipeline_mode<synchronous>, transform_indices = @transform_7, window_bounds = array<i64: 80, 80>}, {pipeline_mode = #tpu.pipeline_mode<synchronous>, transform_indices = @transform_8, window_bounds = array<i64: 80, 128>}, {transform_indices = @transform_9, window_bounds = array<i64: 1, 40, 128>}]} {
    %c0 = arith.constant 0 : index
    %c0_0 = arith.constant 0 : index
    %c0_1 = arith.constant 0 : index
    %0 = vector.load %arg1[%c0, %c0_0, %c0_1] : memref<1x40x128xf32, #tpu.memory_space<vmem>>, vector<1x40x128xf32>
    %1 = vector.shape_cast %0 : vector<1x40x128xf32> to vector<40x128xf32>
    %c0_2 = arith.constant 0 : index
    %c0_3 = arith.constant 0 : index
    %c0_4 = arith.constant 0 : index
    %2 = vector.load %arg2[%c0_2, %c0_3, %c0_4] : memref<1x40x128xf32, #tpu.memory_space<vmem>>, vector<1x40x128xf32>
    %3 = vector.shape_cast %2 : vector<1x40x128xf32> to vector<40x128xf32>
    %c0_5 = arith.constant 0 : index
    %c0_6 = arith.constant 0 : index
    %c0_7 = arith.constant 0 : index
    %4 = vector.load %arg3[%c0_5, %c0_6, %c0_7] : memref<1x40x128xf32, #tpu.memory_space<vmem>>, vector<1x40x128xf32>
    %5 = vector.shape_cast %4 : vector<1x40x128xf32> to vector<40x128xf32>
    %c0_8 = arith.constant 0 : index
    %c0_9 = arith.constant 0 : index
    %c0_10 = arith.constant 0 : index
    %6 = vector.load %arg4[%c0_8, %c0_9, %c0_10] : memref<1x80x128xf32, #tpu.memory_space<vmem>>, vector<1x80x128xf32>
    %7 = vector.shape_cast %6 : vector<1x80x128xf32> to vector<80x128xf32>
    %c0_11 = arith.constant 0 : index
    %c0_12 = arith.constant 0 : index
    %c0_13 = arith.constant 0 : index
    %8 = vector.load %arg5[%c0_11, %c0_12, %c0_13] : memref<1x80x128xf32, #tpu.memory_space<vmem>>, vector<1x80x128xf32>
    %9 = vector.shape_cast %8 : vector<1x80x128xf32> to vector<80x128xf32>
    %c0_14 = arith.constant 0 : index
    %c0_15 = arith.constant 0 : index
    %c0_16 = arith.constant 0 : index
    %10 = vector.load %arg6[%c0_14, %c0_15, %c0_16] : memref<1x80x80xf32, #tpu.memory_space<vmem>>, vector<1x80x80xf32>
    %11 = vector.shape_cast %10 : vector<1x80x80xf32> to vector<80x80xf32>
    %c0_17 = arith.constant 0 : index
    %c0_18 = arith.constant 0 : index
    %c0_19 = arith.constant 0 : index
    %12 = vector.load %arg7[%c0_17, %c0_18, %c0_19] : memref<1x80x80xf32, #tpu.memory_space<vmem>>, vector<1x80x80xf32>
    %13 = vector.shape_cast %12 : vector<1x80x80xf32> to vector<80x80xf32>
    %c0_20 = arith.constant 0 : index
    %c0_21 = arith.constant 0 : index
    %14 = vector.load %arg8[%c0_20, %c0_21] : memref<80x80xf32, #tpu.memory_space<vmem>>, vector<80x80xf32>
    %c0_22 = arith.constant 0 : index
    %c0_23 = arith.constant 0 : index
    %15 = vector.load %arg9[%c0_22, %c0_23] : memref<80x128xf32, #tpu.memory_space<vmem>>, vector<80x128xf32>
    %cst = arith.constant dense<0.000000e+00> : vector<40x80xf32>
    %16 = tpu.matmul %1, %9, %cst {dimension_numbers = #tpu.dot_dimension_numbers<[1], [1], [0], [0], [0, 0, 1, 0], [], []>} : vector<40x128xf32>, vector<80x128xf32>, vector<40x80xf32> -> vector<40x80xf32>
    %cst_24 = arith.constant dense<0xFF800000> : vector<40xf32>
    %17 = vector.multi_reduction <maximumf>, %16, %cst_24 [1] : vector<40x80xf32> to vector<40xf32>
    %18 = vector.shape_cast %17 : vector<40xf32> to vector<40x1xf32>
    %19 = vector.broadcast %18 : vector<40x1xf32> to vector<40x80xf32>
    %20 = arith.subf %16, %19 : vector<40x80xf32>
    %21 = math.exp %20 : vector<40x80xf32>
    %cst_25 = arith.constant dense<0.000000e+00> : vector<40x80xf32>
    %22 = tpu.matmul %21, %14, %cst_25 {dimension_numbers = #tpu.dot_dimension_numbers<[1], [0], [0], [1], [0, 0, 1, 1], [], []>} : vector<40x80xf32>, vector<80x80xf32>, vector<40x80xf32> -> vector<40x80xf32>
    %23 = tpu.reciprocal %22 : vector<40x80xf32> -> vector<40x80xf32>
    %24 = arith.mulf %21, %23 : vector<40x80xf32>
    %cst_26 = arith.constant dense<0.000000e+00> : vector<80x40xf32>
    %25 = tpu.matmul %7, %3, %cst_26 {dimension_numbers = #tpu.dot_dimension_numbers<[1], [1], [0], [0], [0, 0, 1, 0], [], []>} : vector<80x128xf32>, vector<40x128xf32>, vector<80x40xf32> -> vector<80x40xf32>
    %cst_27 = arith.constant dense<0xFF800000> : vector<80xf32>
    %26 = vector.multi_reduction <maximumf>, %25, %cst_27 [1] : vector<80x40xf32> to vector<80xf32>
    %27 = vector.shape_cast %26 : vector<80xf32> to vector<80x1xf32>
    %28 = vector.broadcast %27 : vector<80x1xf32> to vector<80x40xf32>
    %29 = arith.subf %25, %28 : vector<80x40xf32>
    %30 = math.exp %29 : vector<80x40xf32>
    %cst_28 = arith.constant dense<0.000000e+00> : vector<80xf32>
    %31 = vector.multi_reduction <add>, %30, %cst_28 [1] : vector<80x40xf32> to vector<80xf32>
    %32 = vector.shape_cast %31 : vector<80xf32> to vector<80x1xf32>
    %33 = tpu.reciprocal %32 : vector<80x1xf32> -> vector<80x1xf32>
    %34 = vector.broadcast %33 : vector<80x1xf32> to vector<80x40xf32>
    %35 = arith.mulf %30, %34 : vector<80x40xf32>
    %36 = tpu.iota {dimensions = array<i32: 0>} : vector<80x80xi32>
    %37 = tpu.iota {dimensions = array<i32: 1>} : vector<80x80xi32>
    %38 = arith.cmpi eq, %36, %37 : vector<80x80xi32>
    %39 = arith.extui %38 : vector<80x80xi1> to vector<80x80xi32>
    %40 = arith.sitofp %39 : vector<80x80xi32> to vector<80x80xf32>
    %cst_29 = arith.constant 7.000000e+00 : f32
    %41 = vector.broadcast %cst_29 : f32 to vector<80x80xf32>
    %42 = arith.mulf %41, %40 : vector<80x80xf32>
    %cst_30 = arith.constant 1.300000e+01 : f32
    %43 = vector.broadcast %cst_30 : f32 to vector<80x80xf32>
    %44 = arith.mulf %43, %40 : vector<80x80xf32>
    %cst_31 = arith.constant 1.500000e+01 : f32
    %45 = vector.broadcast %cst_31 : f32 to vector<80x80xf32>
    %46 = arith.mulf %45, %40 : vector<80x80xf32>
    %cst_32 = arith.constant dense<0.000000e+00> : vector<80x80xf32>
    %47 = tpu.matmul %11, %13, %cst_32 {dimension_numbers = #tpu.dot_dimension_numbers<[1], [0], [0], [1], [0, 0, 1, 1], [], []>} : vector<80x80xf32>, vector<80x80xf32>, vector<80x80xf32> -> vector<80x80xf32>
    %48 = arith.subf %42, %47 : vector<80x80xf32>
    %cst_33 = arith.constant dense<0.000000e+00> : vector<80x80xf32>
    %49 = tpu.matmul %47, %48, %cst_33 {dimension_numbers = #tpu.dot_dimension_numbers<[1], [0], [0], [1], [0, 0, 1, 1], [], []>} : vector<80x80xf32>, vector<80x80xf32>, vector<80x80xf32> -> vector<80x80xf32>
    %50 = arith.subf %46, %49 : vector<80x80xf32>
    %cst_34 = arith.constant dense<0.000000e+00> : vector<80x80xf32>
    %51 = tpu.matmul %47, %50, %cst_34 {dimension_numbers = #tpu.dot_dimension_numbers<[1], [0], [0], [1], [0, 0, 1, 1], [], []>} : vector<80x80xf32>, vector<80x80xf32>, vector<80x80xf32> -> vector<80x80xf32>
    %52 = arith.subf %44, %51 : vector<80x80xf32>
    %cst_35 = arith.constant 2.500000e-01 : f32
    %53 = vector.broadcast %cst_35 : f32 to vector<80x80xf32>
    %54 = arith.mulf %53, %13 : vector<80x80xf32>
    %cst_36 = arith.constant dense<0.000000e+00> : vector<80x80xf32>
    %55 = tpu.matmul %54, %52, %cst_36 {dimension_numbers = #tpu.dot_dimension_numbers<[1], [0], [0], [1], [0, 0, 1, 1], [], []>} : vector<80x80xf32>, vector<80x80xf32>, vector<80x80xf32> -> vector<80x80xf32>
    %cst_37 = arith.constant dense<0.000000e+00> : vector<80x80xf32>
    %56 = tpu.matmul %11, %55, %cst_37 {dimension_numbers = #tpu.dot_dimension_numbers<[1], [0], [0], [1], [0, 0, 1, 1], [], []>} : vector<80x80xf32>, vector<80x80xf32>, vector<80x80xf32> -> vector<80x80xf32>
    %57 = arith.subf %42, %56 : vector<80x80xf32>
    %cst_38 = arith.constant dense<0.000000e+00> : vector<80x80xf32>
    %58 = tpu.matmul %56, %57, %cst_38 {dimension_numbers = #tpu.dot_dimension_numbers<[1], [0], [0], [1], [0, 0, 1, 1], [], []>} : vector<80x80xf32>, vector<80x80xf32>, vector<80x80xf32> -> vector<80x80xf32>
    %59 = arith.subf %46, %58 : vector<80x80xf32>
    %cst_39 = arith.constant dense<0.000000e+00> : vector<80x80xf32>
    %60 = tpu.matmul %56, %59, %cst_39 {dimension_numbers = #tpu.dot_dimension_numbers<[1], [0], [0], [1], [0, 0, 1, 1], [], []>} : vector<80x80xf32>, vector<80x80xf32>, vector<80x80xf32> -> vector<80x80xf32>
    %61 = arith.subf %44, %60 : vector<80x80xf32>
    %cst_40 = arith.constant 2.500000e-01 : f32
    %62 = vector.broadcast %cst_40 : f32 to vector<80x80xf32>
    %63 = arith.mulf %62, %55 : vector<80x80xf32>
    %cst_41 = arith.constant dense<0.000000e+00> : vector<80x80xf32>
    %64 = tpu.matmul %63, %61, %cst_41 {dimension_numbers = #tpu.dot_dimension_numbers<[1], [0], [0], [1], [0, 0, 1, 1], [], []>} : vector<80x80xf32>, vector<80x80xf32>, vector<80x80xf32> -> vector<80x80xf32>
    %cst_42 = arith.constant dense<0.000000e+00> : vector<80x80xf32>
    %65 = tpu.matmul %11, %64, %cst_42 {dimension_numbers = #tpu.dot_dimension_numbers<[1], [0], [0], [1], [0, 0, 1, 1], [], []>} : vector<80x80xf32>, vector<80x80xf32>, vector<80x80xf32> -> vector<80x80xf32>
    %66 = arith.subf %42, %65 : vector<80x80xf32>
    %cst_43 = arith.constant dense<0.000000e+00> : vector<80x80xf32>
    %67 = tpu.matmul %65, %66, %cst_43 {dimension_numbers = #tpu.dot_dimension_numbers<[1], [0], [0], [1], [0, 0, 1, 1], [], []>} : vector<80x80xf32>, vector<80x80xf32>, vector<80x80xf32> -> vector<80x80xf32>
    %68 = arith.subf %46, %67 : vector<80x80xf32>
    %cst_44 = arith.constant dense<0.000000e+00> : vector<80x80xf32>
    %69 = tpu.matmul %65, %68, %cst_44 {dimension_numbers = #tpu.dot_dimension_numbers<[1], [0], [0], [1], [0, 0, 1, 1], [], []>} : vector<80x80xf32>, vector<80x80xf32>, vector<80x80xf32> -> vector<80x80xf32>
    %70 = arith.subf %44, %69 : vector<80x80xf32>
    %cst_45 = arith.constant 2.500000e-01 : f32
    %71 = vector.broadcast %cst_45 : f32 to vector<80x80xf32>
    %72 = arith.mulf %71, %64 : vector<80x80xf32>
    %cst_46 = arith.constant dense<0.000000e+00> : vector<80x80xf32>
    %73 = tpu.matmul %72, %70, %cst_46 {dimension_numbers = #tpu.dot_dimension_numbers<[1], [0], [0], [1], [0, 0, 1, 1], [], []>} : vector<80x80xf32>, vector<80x80xf32>, vector<80x80xf32> -> vector<80x80xf32>
    %cst_47 = arith.constant dense<0.000000e+00> : vector<80x80xf32>
    %74 = tpu.matmul %11, %73, %cst_47 {dimension_numbers = #tpu.dot_dimension_numbers<[1], [0], [0], [1], [0, 0, 1, 1], [], []>} : vector<80x80xf32>, vector<80x80xf32>, vector<80x80xf32> -> vector<80x80xf32>
    %75 = arith.subf %42, %74 : vector<80x80xf32>
    %cst_48 = arith.constant dense<0.000000e+00> : vector<80x80xf32>
    %76 = tpu.matmul %74, %75, %cst_48 {dimension_numbers = #tpu.dot_dimension_numbers<[1], [0], [0], [1], [0, 0, 1, 1], [], []>} : vector<80x80xf32>, vector<80x80xf32>, vector<80x80xf32> -> vector<80x80xf32>
    %77 = arith.subf %46, %76 : vector<80x80xf32>
    %cst_49 = arith.constant dense<0.000000e+00> : vector<80x80xf32>
    %78 = tpu.matmul %74, %77, %cst_49 {dimension_numbers = #tpu.dot_dimension_numbers<[1], [0], [0], [1], [0, 0, 1, 1], [], []>} : vector<80x80xf32>, vector<80x80xf32>, vector<80x80xf32> -> vector<80x80xf32>
    %79 = arith.subf %44, %78 : vector<80x80xf32>
    %cst_50 = arith.constant 2.500000e-01 : f32
    %80 = vector.broadcast %cst_50 : f32 to vector<80x80xf32>
    %81 = arith.mulf %80, %73 : vector<80x80xf32>
    %cst_51 = arith.constant dense<0.000000e+00> : vector<80x80xf32>
    %82 = tpu.matmul %81, %79, %cst_51 {dimension_numbers = #tpu.dot_dimension_numbers<[1], [0], [0], [1], [0, 0, 1, 1], [], []>} : vector<80x80xf32>, vector<80x80xf32>, vector<80x80xf32> -> vector<80x80xf32>
    %cst_52 = arith.constant dense<0.000000e+00> : vector<80x80xf32>
    %83 = tpu.matmul %11, %82, %cst_52 {dimension_numbers = #tpu.dot_dimension_numbers<[1], [0], [0], [1], [0, 0, 1, 1], [], []>} : vector<80x80xf32>, vector<80x80xf32>, vector<80x80xf32> -> vector<80x80xf32>
    %84 = arith.subf %42, %83 : vector<80x80xf32>
    %cst_53 = arith.constant dense<0.000000e+00> : vector<80x80xf32>
    %85 = tpu.matmul %83, %84, %cst_53 {dimension_numbers = #tpu.dot_dimension_numbers<[1], [0], [0], [1], [0, 0, 1, 1], [], []>} : vector<80x80xf32>, vector<80x80xf32>, vector<80x80xf32> -> vector<80x80xf32>
    %86 = arith.subf %46, %85 : vector<80x80xf32>
    %cst_54 = arith.constant dense<0.000000e+00> : vector<80x80xf32>
    %87 = tpu.matmul %83, %86, %cst_54 {dimension_numbers = #tpu.dot_dimension_numbers<[1], [0], [0], [1], [0, 0, 1, 1], [], []>} : vector<80x80xf32>, vector<80x80xf32>, vector<80x80xf32> -> vector<80x80xf32>
    %88 = arith.subf %44, %87 : vector<80x80xf32>
    %cst_55 = arith.constant 2.500000e-01 : f32
    %89 = vector.broadcast %cst_55 : f32 to vector<80x80xf32>
    %90 = arith.mulf %89, %82 : vector<80x80xf32>
    %cst_56 = arith.constant dense<0.000000e+00> : vector<80x80xf32>
    %91 = tpu.matmul %90, %88, %cst_56 {dimension_numbers = #tpu.dot_dimension_numbers<[1], [0], [0], [1], [0, 0, 1, 1], [], []>} : vector<80x80xf32>, vector<80x80xf32>, vector<80x80xf32> -> vector<80x80xf32>
    %cst_57 = arith.constant dense<0.000000e+00> : vector<80x80xf32>
    %92 = tpu.matmul %11, %91, %cst_57 {dimension_numbers = #tpu.dot_dimension_numbers<[1], [0], [0], [1], [0, 0, 1, 1], [], []>} : vector<80x80xf32>, vector<80x80xf32>, vector<80x80xf32> -> vector<80x80xf32>
    %93 = arith.subf %42, %92 : vector<80x80xf32>
    %cst_58 = arith.constant dense<0.000000e+00> : vector<80x80xf32>
    %94 = tpu.matmul %92, %93, %cst_58 {dimension_numbers = #tpu.dot_dimension_numbers<[1], [0], [0], [1], [0, 0, 1, 1], [], []>} : vector<80x80xf32>, vector<80x80xf32>, vector<80x80xf32> -> vector<80x80xf32>
    %95 = arith.subf %46, %94 : vector<80x80xf32>
    %cst_59 = arith.constant dense<0.000000e+00> : vector<80x80xf32>
    %96 = tpu.matmul %92, %95, %cst_59 {dimension_numbers = #tpu.dot_dimension_numbers<[1], [0], [0], [1], [0, 0, 1, 1], [], []>} : vector<80x80xf32>, vector<80x80xf32>, vector<80x80xf32> -> vector<80x80xf32>
    %97 = arith.subf %44, %96 : vector<80x80xf32>
    %cst_60 = arith.constant 2.500000e-01 : f32
    %98 = vector.broadcast %cst_60 : f32 to vector<80x80xf32>
    %99 = arith.mulf %98, %91 : vector<80x80xf32>
    %cst_61 = arith.constant dense<0.000000e+00> : vector<80x80xf32>
    %100 = tpu.matmul %99, %97, %cst_61 {dimension_numbers = #tpu.dot_dimension_numbers<[1], [0], [0], [1], [0, 0, 1, 1], [], []>} : vector<80x80xf32>, vector<80x80xf32>, vector<80x80xf32> -> vector<80x80xf32>
    %cst_62 = arith.constant dense<0.000000e+00> : vector<80x128xf32>
    %101 = tpu.matmul %35, %5, %cst_62 {dimension_numbers = #tpu.dot_dimension_numbers<[1], [0], [0], [1], [0, 0, 1, 1], [], []>} : vector<80x40xf32>, vector<40x128xf32>, vector<80x128xf32> -> vector<80x128xf32>
    %102 = arith.mulf %101, %15 : vector<80x128xf32>
    %cst_63 = arith.constant dense<0.000000e+00> : vector<40x80xf32>
    %103 = tpu.matmul %24, %100, %cst_63 {dimension_numbers = #tpu.dot_dimension_numbers<[1], [0], [0], [1], [0, 0, 1, 1], [], []>} : vector<40x80xf32>, vector<80x80xf32>, vector<40x80xf32> -> vector<40x80xf32>
    %cst_64 = arith.constant dense<0.000000e+00> : vector<40x128xf32>
    %104 = tpu.matmul %103, %102, %cst_64 {dimension_numbers = #tpu.dot_dimension_numbers<[1], [0], [0], [1], [0, 0, 1, 1], [], []>} : vector<40x80xf32>, vector<80x128xf32>, vector<40x128xf32> -> vector<40x128xf32>
    %c0_65 = arith.constant 0 : index
    %c0_66 = arith.constant 0 : index
    %c0_67 = arith.constant 0 : index
    %105 = vector.load %arg10[%c0_65, %c0_66, %c0_67] : memref<1x40x128xf32, #tpu.memory_space<vmem>>, vector<1x40x128xf32>
    %106 = vector.shape_cast %105 : vector<1x40x128xf32> to vector<40x128xf32>
    %107 = vector.shape_cast %104 : vector<40x128xf32> to vector<1x40x128xf32>
    tpu.vector_store %arg10[%c0_65, %c0_66, %c0_67], %107 {strides = array<i32>} : memref<1x40x128xf32, #tpu.memory_space<vmem>>, vector<1x40x128xf32>,
    return
  }
  func.func @transform_0(%arg0: i32) -> (i32, i32, i32) {
    %c0_i32 = arith.constant 0 : i32
    %c0_i32_0 = arith.constant 0 : i32
    %c0_i32_1 = arith.constant 0 : i32
    return %arg0, %c0_i32, %c0_i32_0 : i32, i32, i32
  }
  func.func @transform_1(%arg0: i32) -> (i32, i32, i32) {
    %c0_i32 = arith.constant 0 : i32
    %c0_i32_0 = arith.constant 0 : i32
    %c0_i32_1 = arith.constant 0 : i32
    return %arg0, %c0_i32, %c0_i32_0 : i32, i32, i32
  }
  func.func @transform_2(%arg0: i32) -> (i32, i32, i32) {
    %c0_i32 = arith.constant 0 : i32
    %c0_i32_0 = arith.constant 0 : i32
    %c0_i32_1 = arith.constant 0 : i32
    return %arg0, %c0_i32, %c0_i32_0 : i32, i32, i32
  }
  func.func @transform_3(%arg0: i32) -> (i32, i32, i32) {
    %c0_i32 = arith.constant 0 : i32
    %c0_i32_0 = arith.constant 0 : i32
    %c0_i32_1 = arith.constant 0 : i32
    return %arg0, %c0_i32, %c0_i32_0 : i32, i32, i32
  }
  func.func @transform_4(%arg0: i32) -> (i32, i32, i32) {
    %c0_i32 = arith.constant 0 : i32
    %c0_i32_0 = arith.constant 0 : i32
    %c0_i32_1 = arith.constant 0 : i32
    return %arg0, %c0_i32, %c0_i32_0 : i32, i32, i32
  }
  func.func @transform_5(%arg0: i32) -> (i32, i32, i32) {
    %c0_i32 = arith.constant 0 : i32
    %c0_i32_0 = arith.constant 0 : i32
    %c0_i32_1 = arith.constant 0 : i32
    return %arg0, %c0_i32, %c0_i32_0 : i32, i32, i32
  }
  func.func @transform_6(%arg0: i32) -> (i32, i32, i32) {
    %c0_i32 = arith.constant 0 : i32
    %c0_i32_0 = arith.constant 0 : i32
    %c0_i32_1 = arith.constant 0 : i32
    return %arg0, %c0_i32, %c0_i32_0 : i32, i32, i32
  }
  func.func @transform_7(%arg0: i32) -> (i32, i32) {
    %c0_i32 = arith.constant 0 : i32
    %c0_i32_0 = arith.constant 0 : i32
    %c0_i32_1 = arith.constant 0 : i32
    return %c0_i32, %c0_i32_0 : i32, i32
  }
  func.func @transform_8(%arg0: i32) -> (i32, i32) {
    %c0_i32 = arith.constant 0 : i32
    %c0_i32_0 = arith.constant 0 : i32
    %c0_i32_1 = arith.constant 0 : i32
    return %c0_i32, %c0_i32_0 : i32, i32
  }
  func.func @transform_9(%arg0: i32) -> (i32, i32, i32) {
    %c0_i32 = arith.constant 0 : i32
    %c0_i32_0 = arith.constant 0 : i32
    %c0_i32_1 = arith.constant 0 : i32
    return %arg0, %c0_i32, %c0_i32_0 : i32, i32, i32
  }
}

</mosaic_0001>

<bundles_post_ra>
// kernel: tpu_custom_call.1
= control target key start
LH: loop header
LB: loop body
LE: loop exit
PB: predicated region body
PF: predicated region fallthrough
CT: control target
= control target key end

     0   :  { %s6151_s0 = inlined_call_operand.hbm [shape: f32[2,40,128], index: 0, kind: input, shape index: {}]   ;;  %s6152_s1 = inlined_call_operand.hbm [shape: f32[2,40,128], index: 1, kind: input, shape index: {}]   ;;  %s6153_s2 = inlined_call_operand.hbm [shape: f32[2,40,128], index: 2, kind: input, shape index: {}]   ;;  %s6154_s3 = inlined_call_operand.hbm [shape: f32[2,80,128], index: 3, kind: input, shape index: {}]   ;;  %s6155_s4 = inlined_call_operand.hbm [shape: f32[2,80,128], index: 4, kind: input, shape index: {}]   ;;  %s6156_s5 = inlined_call_operand.hbm [shape: f32[2,80,80], index: 5, kind: input, shape index: {}]   ;;  %s6157_s6 = inlined_call_operand.hbm [shape: f32[2,80,80], index: 6, kind: input, shape index: {}]   ;;  %s6158_s7 = inlined_call_operand.hbm [shape: f32[80,80], index: 7, kind: input, shape index: {}]   ;;  %s6159_s8 = inlined_call_operand.hbm [shape: f32[80,128], index: 8, kind: input, shape index: {}]   ;;  %s6160_s9 = inlined_call_operand.hbm [shape: f32[2,40,128], index: 9, kind: output, shape index: {}]  }
   0x1   :  { %6239 = sst [smem:[#allocation71_spill]] %s6152_s1 }
   0x2   :  { %6240 = sst [smem:[#allocation72_spill]] %s6154_s3 }
   0x3   :  { %6241 = sst [smem:[#allocation73_spill]] %s6157_s6 }
   0x4   :  { %6242 = sst [smem:[#allocation74_spill]] %s6158_s7 }
   0x5   :  { %6243 = sst [smem:[#allocation75_spill]] %s6160_s9 }
   0x6   :  { %14 = vsyncpa [#allocation3], 0 }
   0x7   :  { %16 = vsyncpa [#allocation3 + $0x1], 0 }
   0x8   :  { %17 = vsyncpa [#allocation6], 0 }
   0x9   :  { %19 = vsyncpa [#allocation6 + $0x1], 0 }
   0xa   :  { %20 = vsyncpa [#allocation9], 0 }
   0xb   :  { %22 = vsyncpa [#allocation9 + $0x1], 0 }
   0xc   :  { %23 = vsyncpa [#allocation12], 0 }
   0xd   :  { %25 = vsyncpa [#allocation12 + $0x1], 0 }
   0xe   :  { %26 = vsyncpa [#allocation15], 0 }
   0xf   :  { %27 = vsyncpa [#allocation4], 0 }
  0x10   :  { %29 = vsyncpa [#allocation4 + $0x1], 0  ;;  %s4335_s30 = smov 0   ;;  %s4337_s10 = smov 0  }
  0x11   :  { %s4339_s11 = smov 0   ;;  %s4341_s12 = smov 0  }
  0x12 LB: > { %6244 = sst [smem:[#allocation24_spill]] %s4264_s30  ;;  %s4356_s13 = sadd.s32 4294967295, %s4276_s12   ;;  %s4276_s12 = sphi %s4341_s12, %s6393_s12   ;;  %s4272_s11 = sphi %s4339_s11, %s6396_s11   ;;  %s4268_s10 = sphi %s4337_s10, %s6395_s10   ;;  %s4264_s30 = sphi %s4335_s30, %s6394_s30  }
  0x13   : > { %6245 = sst [smem:[#allocation25_spill]] %s4268_s10  ;;  %s3431_s14 = sadd.s32 4294967294, %s4276_s12  }
  0x14   : > { %6246 = sst [smem:[#allocation26_spill]] %s4272_s11  ;;  %p55_p0 = scmp.ne.s32.totalorder %s4268_s10, %s4264_s30 }
  0x15   : > { %6247 = sst [smem:[#allocation27_spill]] %s4276_s12  ;;  %p6171_p1 = scmp.eq.s32.totalorder %s4356_s13, 0 }
  0x16   : > { %6248 = sst [smem:[#allocation28_spill]] %s4356_s13  ;;  %p277_p2 = scmp.eq.s32.totalorder %s4356_s13, 1 }
  0x17   : > { %p283_p3 = scmp.eq.s32.totalorder %s3431_s14, 1  ;;  %p4365_p4 = por %p6171_p1, %p55_p0 }
  0x18   : > { %p3432_p5 = scmp.ge.s32.totalorder %s4276_s12, 1  ;;  %p290_p7 = scmp.lt.s32.totalorder %s4276_s12, 3 }
  0x19   : > { %s6249_s15 = scalar_select %p4365_p4, 1, 0 }
  0x1a   : > { %p4370_p6 = por %p283_p3, %p55_p0  ;;  %s6253_s7 = sld [smem:[#allocation74_spill]] }
  0x1b   : > { %6250 = sst [smem:[#allocation29_spill]] %s6249_s15  ;;  %p4378_p8 = pnand %p3432_p5, %p290_p7 }
  0x1c   : > { %s6251_s16 = scalar_select %p4370_p6, 1, 0 }
  0x1d   : > { %s6254_s20 = scalar_select %p4378_p8, 1, 0 }
  0x1e   : > { %6252 = sst [smem:[#allocation30_spill]] %s6251_s16  ;;  %p3775_p9 = pneg %p4378_p8 }
  0x1f   : > { %6255 = sst [smem:[#allocation31_spill]] %s6254_s20  ;;  %s4278_s21 = smov [#allocation14]  }
  0x20   : > { %s301_s19 = sshll.u32 %s6253_s7, 4  ;;  %s303_s22 = sshll.u32 %s4278_s21, 4  ;;  %s302_s19 = int_to_ptr.hbm [resolvable:$true] %s301_s19  ;;  %s304_s22 = int_to_ptr.vmem [resolvable:$true] %s303_s22 }
  0x21   : > { %p4386_p10 = pnand %p3775_p9, %p6171_p1  ;;  %s4392_s24 = sadd.s32 1, %s4276_s12  }
  0x22   : > { %6257 = sst [smem:[#allocation32_spill]] %s4392_s24  ;;  %s6161_s25 = smov 128  }
  0x23   : > { %s6163_s26 = smov 8   ;;  %s39_s27 = ssub.s32 %s4276_s12, %s4392_s24 }
  0x24   : > { %3778 = dma.hbm_to_vmem [thread:$0]  (!%p4386_p10), %s302_s19, 1280, %s304_s22, [#allocation15], %s6161_s25, %s6161_s25, %s6163_s26  }
  0x25   : > { %s42_s28 = sadd.s32 1, %s4272_s11  ;;  %p40_p12 = scmp.eq.s32.totalorder %s39_s27, 0 }
  0x26   : > { %p49_p13 = scmp.ne.s32.totalorder %s4272_s11, %s4268_s10  ;;  %p50_p0 = scmp.eq.s32.totalorder %s4276_s12, 0 }
  0x27   : > { %p3810_p3 = scmp.lt.s32.totalorder %s4276_s12, 2  ;;  %s4416_s17 = sand.u32 1, %s4272_s11  }
  0x28   : > { %s4407_s29 = scalar_select %p40_p12, %s4272_s11, %s42_s28  }
  0x29   : > { %p51_p5 = por %p50_p0, %p49_p13  ;;  %p4411_p7 = por %p277_p2, %p49_p13 }
  0x2a   : > { %6258 = sst [smem:[#allocation33_spill]] %s4407_s29  ;;  %s4419_s18 = smul.u32 40, %s4276_s12 }
  0x2b   : > { %s6259_s14 = scalar_select %p4411_p7, 1, 0 }
  0x2c   : > { %s4422_s19 = smul.u32 40, %s4416_s17  ;;  %p4424_p9 = pnand %p3810_p3, %p51_p5 }
  0x2d   : > { %6260 = sst [smem:[#allocation34_spill]] %s6259_s14  ;;  %s4429_s22 = sand.u32 1, %s4276_s12  }
  0x2e   : > { %s6262_s1 = sld [smem:[#allocation71_spill]]  ;;  %s357_s7 = scalar_lea.vmem [#allocation5], %s4422_s19 }
  0x2f   : > { %s365_s29 = sshll.u32 %s357_s7, 4  ;;  %p4439_p12 = pneg %p4424_p9  ;;  %s366_s29 = int_to_ptr.vmem [resolvable:$true] %s365_s29 }
  0x34   : > { %s362_s25 = scalar_lea.hbm %s6262_s1, %s4419_s18  ;;  %s3961_s28 = scalar_lea.hbm %s6262_s1, 80 }
  0x35   : > { %s363_s26 = sshll.u32 %s362_s25, 4  ;;  %s364_s26 = int_to_ptr.hbm [resolvable:$true] %s363_s26 }
  0x36   : > { %s3954_s24 = sshra.s32 %s364_s26, 4  ;;  %s3955_s24 = int_to_ptr.hbm [resolvable:$true] %s3954_s24 }
  0x37   : > { %s3956_s16 = scalar_lea.hbm %s3955_s24, 40  ;;  %p3962_p3 = scmp.lt.s32.totalorder %s3955_s24, %s6262_s1 }
  0x38   : > { %p3957_p2 = scmp.ne.s32.totalorder %s3955_s24, %s3956_s16  ;;  %p3963_p5 = scmp.lt.s32.totalorder %s3961_s28, %s3956_s16 }
  0x3a   : > { %p3959_p13 = pnand %p4439_p12, %p3957_p2  ;;  %p3964_p11 = por %p3963_p5, %p3962_p3 }
  0x3c   : > { %p3960_p0 = pneg %p3959_p13 }
  0x3e   : > { %p3965_p1 = pnand %p3964_p11, %p3960_p0 }
  0x40   : > { %3968 = shalt.err (!%p3965_p1)
}
  0x41   : > { %s6264_s11 = smov 8   ;;  %s6265_s14 = smov 128  }
  0x42   : > { %s6266_s13 = scalar_lea.sflag [#allocation6], %s4429_s22  ;;  %s4459_s27 = smul.u32 80, %s4416_s17 }
  0x43   : > { %3788 = dma.hbm_to_vmem [thread:$0]  (!%p4424_p9), %s364_s26, 640, %s366_s29, %s6266_s13, %s6265_s14, %s6265_s14, %s6264_s11  }
  0x44   : > { %s4462_s9 = smul.u32 80, %s4276_s12  ;;  %s6267_s3 = sld [smem:[#allocation72_spill]] }
  0x45   : > { %s401_s15 = scalar_lea.vmem [#allocation8], %s4459_s27  ;;  %s398_s12 = scalar_lea.sflag [#allocation9], %s4429_s22 }
  0x46   : > { %s409_s10 = sshll.u32 %s401_s15, 4  ;;  %s450_s29 = scalar_lea.hbm %s6156_s5, %s4462_s9  ;;  %s410_s10 = int_to_ptr.vmem [resolvable:$true] %s409_s10 }
  0x4a   : > { %s406_s1 = scalar_lea.hbm %s6267_s3, %s4462_s9  ;;  %s3991_s7 = scalar_lea.hbm %s6267_s3, 160 }
  0x4b   : > { %s407_s20 = sshll.u32 %s406_s1, 4  ;;  %s408_s20 = int_to_ptr.hbm [resolvable:$true] %s407_s20 }
  0x4c   : > { %s3984_s6 = sshra.s32 %s408_s20, 4  ;;  %s3985_s6 = int_to_ptr.hbm [resolvable:$true] %s3984_s6 }
  0x4d   : > { %s3986_s16 = scalar_lea.hbm %s3985_s6, 80  ;;  %p3992_p13 = scmp.lt.s32.totalorder %s3985_s6, %s6267_s3 }
  0x4e   : > { %p3987_p1 = scmp.ne.s32.totalorder %s3985_s6, %s3986_s16  ;;  %p3993_p0 = scmp.lt.s32.totalorder %s3991_s7, %s3986_s16 }
  0x50   : > { %p3989_p11 = pnand %p3987_p1, %p4439_p12  ;;  %p3994_p3 = por %p3993_p0, %p3992_p13 }
  0x52   : > { %p3990_p2 = pneg %p3989_p11 }
  0x54   : > { %p3995_p5 = pnand %p3994_p3, %p3990_p2 }
  0x56   : > { %3998 = shalt.err (!%p3995_p5)
}
  0x57   : > { %3794 = dma.hbm_to_vmem [thread:$0]  (!%p4424_p9), %s408_s20, 1280, %s410_s10, %s398_s12, %s6265_s14, %s6265_s14, %s6264_s11  }
  0x58   : > { %s451_s13 = sshll.u32 %s450_s29, 4  ;;  %s445_s26 = scalar_lea.vmem [#allocation11], %s4459_s27  ;;  %s452_s13 = int_to_ptr.hbm [resolvable:$true] %s451_s13 }
  0x59   : > { %s453_s24 = sshll.u32 %s445_s26, 4  ;;  %s442_s6 = scalar_lea.sflag [#allocation12], %s4429_s22  ;;  %s454_s24 = int_to_ptr.vmem [resolvable:$true] %s453_s24 }
  0x5a   : > { %s4014_s16 = sshra.s32 %s452_s13, 4  ;;  %s4021_s1 = scalar_lea.hbm %s6156_s5, 160  ;;  %s4015_s16 = int_to_ptr.hbm [resolvable:$true] %s4014_s16 }
  0x5b   : > { %s4016_s28 = scalar_lea.hbm %s4015_s16, 80  ;;  %p4022_p13 = scmp.lt.s32.totalorder %s4015_s16, %s6156_s5 }
  0x5c   : > { %p4017_p1 = scmp.ne.s32.totalorder %s4015_s16, %s4016_s28  ;;  %p4023_p0 = scmp.lt.s32.totalorder %s4021_s1, %s4016_s28 }
  0x5e   : > { %p4019_p11 = pnand %p4017_p1, %p4439_p12  ;;  %p4024_p3 = por %p4023_p0, %p4022_p13 }
  0x60   : > { %p4020_p2 = pneg %p4019_p11 }
  0x62   : > { %p4025_p5 = pnand %p4024_p3, %p4020_p2 }
  0x64   : > { %4028 = shalt.err (!%p4025_p5)
}
  0x65   : > { %3800 = dma.hbm_to_vmem [thread:$0]  (!%p4424_p9), %s452_s13, 1280, %s454_s24, %s442_s6, %s6265_s14, %s6265_s14, %s6264_s11  }
  0x66   : > { %s6268_s3 = sshll.u32 %s6159_s8, 4  ;;  %s4281_s25 = smov [#allocation16]   ;;  %s316_s3 = int_to_ptr.hbm [resolvable:$true] %s6268_s3 }
  0x67   : > { %s317_s29 = sshll.u32 %s4281_s25, 4  ;;  %s340_s28 = scalar_lea.hbm %s6151_s0, %s4419_s18  ;;  %s318_s29 = int_to_ptr.vmem [resolvable:$true] %s317_s29 }
  0x68   : > { %3781 = dma.hbm_to_vmem [thread:$0]  (!%p4386_p10), %s316_s3, 1280, %s318_s29, [#allocation15], %s6265_s14, %s6265_s14, %s6264_s11  }
  0x69   : > { %s335_s7 = scalar_lea.vmem [#allocation2], %s4422_s19  ;;  %s341_s24 = sshll.u32 %s340_s28, 4  ;;  %s342_s24 = int_to_ptr.hbm [resolvable:$true] %s341_s24 }
  0x6a   : > { %s343_s13 = sshll.u32 %s335_s7, 4  ;;  %s332_s15 = scalar_lea.sflag [#allocation3], %s4416_s17  ;;  %s344_s13 = int_to_ptr.vmem [resolvable:$true] %s343_s13 }
  0x6b   : > { %s4074_s1 = sshra.s32 %s342_s24, 4  ;;  %s4081_s3 = scalar_lea.hbm %s6151_s0, 80  ;;  %s4075_s1 = int_to_ptr.hbm [resolvable:$true] %s4074_s1 }
  0x6c   : > { %s4076_s10 = scalar_lea.hbm %s4075_s1, 40  ;;  %p4082_p10 = scmp.lt.s32.totalorder %s4075_s1, %s6151_s0 }
  0x6d   : > { %p4077_p1 = scmp.ne.s32.totalorder %s4075_s1, %s4076_s10  ;;  %p4083_p13 = scmp.lt.s32.totalorder %s4081_s3, %s4076_s10 }
  0x6f   : > { %p4079_p11 = pnand %p4077_p1, %p4439_p12  ;;  %p4084_p0 = por %p4083_p13, %p4082_p10 }
  0x71   : > { %p4080_p2 = pneg %p4079_p11 }
  0x73   : > { %p4085_p3 = pnand %p4084_p0, %p4080_p2 }
  0x75   : > { %4088 = shalt.err (!%p4085_p3)
}
  0x76   : > { %3785 = dma.hbm_to_vmem [thread:$0]  (!%p4424_p9), %s342_s24, 640, %s344_s13, %s332_s15, %s6265_s14, %s6265_s14, %s6264_s11  }
  0x77   : > { %s384_s16 = scalar_lea.hbm %s6153_s2, %s4419_s18  ;;  %s379_s28 = scalar_lea.vmem [#allocation7], %s4422_s19 }
  0x78   : > { %s387_s7 = sshll.u32 %s379_s28, 4  ;;  %s385_s1 = sshll.u32 %s384_s16, 4  ;;  %s388_s7 = int_to_ptr.vmem [resolvable:$true] %s387_s7  ;;  %s386_s1 = int_to_ptr.hbm [resolvable:$true] %s385_s1 }
  0x79   : > { %s4104_s10 = sshra.s32 %s386_s1, 4  ;;  %s4111_s13 = scalar_lea.hbm %s6153_s2, 80  ;;  %s4105_s10 = int_to_ptr.hbm [resolvable:$true] %s4104_s10 }
  0x7a   : > { %s4106_s23 = scalar_lea.hbm %s4105_s10, 40  ;;  %p4112_p2 = scmp.lt.s32.totalorder %s4105_s10, %s6153_s2 }
  0x7b   : > { %p4107_p5 = scmp.ne.s32.totalorder %s4105_s10, %s4106_s23  ;;  %p4113_p10 = scmp.lt.s32.totalorder %s4111_s13, %s4106_s23 }
  0x7d   : > { %p4109_p1 = pnand %p4107_p5, %p4439_p12  ;;  %p4114_p13 = por %p4113_p10, %p4112_p2 }
  0x7f   : > { %p4110_p11 = pneg %p4109_p1 }
  0x81   : > { %p4115_p0 = pnand %p4114_p13, %p4110_p11 }
  0x83   : > { %4118 = shalt.err (!%p4115_p0)
}
  0x84   : > { %s6269_s18 = scalar_lea.sflag [#allocation6], %s4429_s22  ;;  %s428_s29 = scalar_lea.hbm %s6155_s4, %s4462_s9 }
  0x85   : > { %3791 = dma.hbm_to_vmem [thread:$0]  (!%p4424_p9), %s386_s1, 640, %s388_s7, %s6269_s18, %s6265_s14, %s6265_s14, %s6264_s11  }
  0x86   : > { %s423_s17 = scalar_lea.vmem [#allocation10], %s4459_s27  ;;  %s429_s16 = sshll.u32 %s428_s29, 4  ;;  %s430_s16 = int_to_ptr.hbm [resolvable:$true] %s429_s16 }
  0x87   : > { %s431_s26 = sshll.u32 %s423_s17, 4  ;;  %s4134_s28 = sshra.s32 %s430_s16, 4  ;;  %s432_s26 = int_to_ptr.vmem [resolvable:$true] %s431_s26  ;;  %s4135_s28 = int_to_ptr.hbm [resolvable:$true] %s4134_s28 }
  0x88   : > { %s4136_s10 = scalar_lea.hbm %s4135_s28, 80  ;;  %s4141_s7 = scalar_lea.hbm %s6155_s4, 160 }
  0x89   : > { %p4137_p3 = scmp.ne.s32.totalorder %s4135_s28, %s4136_s10  ;;  %p4142_p11 = scmp.lt.s32.totalorder %s4135_s28, %s6155_s4 }
  0x8a   : > { %p4143_p2 = scmp.lt.s32.totalorder %s4141_s7, %s4136_s10 }
  0x8b   : > { %p4139_p5 = pnand %p4137_p3, %p4439_p12 }
  0x8c   : > { %p4144_p10 = por %p4143_p2, %p4142_p11 }
  0x8d   : > { %p4140_p1 = pneg %p4139_p5 }
  0x8f   : > { %p4145_p13 = pnand %p4144_p10, %p4140_p1 }
  0x91   : > { %4148 = shalt.err (!%p4145_p13)
}
  0x92   : > { %3797 = dma.hbm_to_vmem [thread:$0]  (!%p4424_p9), %s430_s16, 1280, %s432_s26, %s398_s12, %s6265_s14, %s6265_s14, %s6264_s11  }
  0x93   : > { %s6270_s15 = sld [smem:[#allocation73_spill]]  ;;  %s467_s19 = scalar_lea.vmem [#allocation13], %s4459_s27 }
  0x94   : > { %s475_s25 = sshll.u32 %s467_s19, 4  ;;  %s476_s25 = int_to_ptr.vmem [resolvable:$true] %s475_s25 }
  0x99   : > { %s472_s18 = scalar_lea.hbm %s6270_s15, %s4462_s9  ;;  %s4171_s12 = scalar_lea.hbm %s6270_s15, 160 }
  0x9a   : > { %s473_s29 = sshll.u32 %s472_s18, 4  ;;  %s474_s29 = int_to_ptr.hbm [resolvable:$true] %s473_s29 }
  0x9b   : > { %s4164_s17 = sshra.s32 %s474_s29, 4  ;;  %s4165_s17 = int_to_ptr.hbm [resolvable:$true] %s4164_s17 }
  0x9c   : > { %s4166_s28 = scalar_lea.hbm %s4165_s17, 80  ;;  %p4172_p1 = scmp.lt.s32.totalorder %s4165_s17, %s6270_s15 }
  0x9d   : > { %p4167_p0 = scmp.ne.s32.totalorder %s4165_s17, %s4166_s28  ;;  %p4173_p11 = scmp.lt.s32.totalorder %s4171_s12, %s4166_s28 }
  0x9f   : > { %p4169_p3 = pnand %p4167_p0, %p4439_p12  ;;  %p4174_p2 = por %p4173_p11, %p4172_p1 }
  0xa1   : > { %p4170_p5 = pneg %p4169_p3 }
  0xa3   : > { %p4175_p10 = pnand %p4174_p2, %p4170_p5 }
  0xa5   : > { %4178 = shalt.err (!%p4175_p10)
}
  0xa6   : > { %3803 = dma.hbm_to_vmem [thread:$0]  (!%p4424_p9), %s474_s29, 1280, %s476_s25, %s442_s6, %s6265_s14, %s6265_s14, %s6264_s11  }
  0xa7   : > { %487 = sbr.rel (%p4378_p8) target bundleno = 5915 (0x171b), region = 56 }
  0xac   : > { %s6272_s27 = sld [smem:[#allocation25_spill]] }
  0xb2   : > { %s4600_s20 = sand.u32 1, %s6272_s27  }
  0xb3   : > { %s4603_s7 = smul.u32 40, %s4600_s20  ;;  %s490_s1 = scalar_lea.sflag [#allocation3], %s4600_s20 }
  0xb5   : > { %s4607_s21 = scalar_lea.vmem [#allocation2], %s4603_s7 }
  0xb6   : > { %4239 = dma.done.wait (%p4365_p4), %s490_s1, 640  }
  0xb7   : > { %4241 = vsyncadd (%p4365_p4), %s490_s1, 4294966656  ;;  %s6274_s11 = sld [smem:[#allocation28_spill]]  ;;  %s4615_s6 = scalar_lea.vmem [#allocation5], %s4603_s7 }
  0xbd   : > { %s499_s14 = sand.u32 1, %s6274_s11  }
  0xbe   : > { %s500_s22 = scalar_lea.sflag [#allocation6], %s499_s14 }
  0xbf   : > { %4243 = dma.done.wait (%p4365_p4), %s500_s22, 1280  }
  0xc0   : > { %4245 = vsyncadd (%p4365_p4), %s500_s22, 4294966016  ;;  %s3749_s3 = smul.u32 80, %s4600_s20  ;;  %s4623_s13 = scalar_lea.vmem [#allocation7], %s4603_s7 }
  0xc1   : > { %s520_s24 = scalar_lea.sflag [#allocation9], %s499_s14 }
  0xc2   : > { %s4625_s18 = scalar_lea.vmem [#allocation8], %s3749_s3 }
  0xc3   : > { %4247 = dma.done.wait (%p4365_p4), %s520_s24, 2560  }
  0xc4   : > { %4249 = vsyncadd (%p4365_p4), %s520_s24, 4294964736  ;;  %s4631_s19 = scalar_lea.vmem [#allocation10], %s3749_s3  ;;  %s540_s25 = scalar_lea.sflag [#allocation12], %s499_s14 }
  0xc5   : > { %s4633_s29 = scalar_lea.vmem [#allocation11], %s3749_s3 }
  0xc6   : > { %4251 = dma.done.wait (%p4365_p4), %s540_s25, 2560  }
  0xc7   : > { %4253 = vsyncadd (%p4365_p4), %s540_s25, 4294964736  ;;  %s553_s17 = scalar_lea.vmem [#allocation13], %s3749_s3  ;;  %p6275_p8 = scmp.eq.s32.totalorder %s6274_s11, 0 }
  0xc9   : > { %4255 = dma.done.wait (%p6275_p8), [#allocation15], 2560   ;;  %p6276_p9 = pmov %p6275_p8 }
  0xca   : > { %v663_v0 = vld [vmem:[%s4631_s19 + $0x48] sm:$0xff]  ;;  %v4646_v2 = vld [vmem:[%s553_s17 + $0x40] sm:$0xff]  ;;  %v4650_v4 = vld [vmem:[%s553_s17 + $0x38] sm:$0xff]  ;;  %vm736_vm0 = vcmask 654336   ;;  %v1177_v62 = vlaneseq  ;;  %vm936_vm11 = vcmask 326656   ;;  %s628_s28 = scalar_lea.vmem [#allocation17], %s4603_s7 }
  0xcb   : > { %4257 = vsyncadd (%p6276_p9), [#allocation15], 4294964736  ;;  %v4644_v1 = vld [vmem:[%s553_s17 + $0x48] sm:$0xff]  ;;  %710 = vmatpush.xpose.msra.mxu0 %v663_v0  ;;  %v662_v3 = vld [vmem:[%s4631_s19 + $0x40] sm:$0xff]  ;;  %s3750_s23 = smul.u32 40, %s6274_s11  ;;  %s6388_s16 = sld [smem:[#allocation75_spill]] }
  0xcc   : > { %1286 = vmatpush.msra.mxu3 %v4644_v1  ;;  %v4653_v5 = vld [vmem:[%s553_s17 + $0x30] sm:$0xff]  ;;  %v661_v6 = vld [vmem:[%s4631_s19 + $0x38] sm:$0xff]  ;;  %v4657_v7 = vld [vmem:[%s553_s17 + $0x28] sm:$0xff]  ;;  %v1178_v63 = vshrl.u32 %v1177_v62, 7  ;;  %s3207_s27 = sshll.u32 %s628_s28, 4  ;;  %s3195_s7 = scalar_lea.sflag [#allocation4], %s4600_s20  ;;  %s3208_s27 = int_to_ptr.vmem [resolvable:$true] %s3207_s27 }
  0xcd   : > { %v4660_v8 = vld [vmem:[%s553_s17 + $0x20] sm:$0xff]  ;;  %v660_v9 = vld [vmem:[%s4631_s19 + $0x30] sm:$0xff]  ;;  %v4664_v10 = vld [vmem:[%s553_s17 + $0x18] sm:$0xff] }
  0xce   : > { %1287 = vmatpush.msra.mxu3 %v4646_v2  ;;  %v4667_v11 = vld [vmem:[%s553_s17 + $0x10] sm:$0xff]  ;;  %v659_v12 = vld [vmem:[%s4631_s19 + $0x28] sm:$0xff]  ;;  %v4674_v14 = vld [vmem:[%s553_s17] sm:$0xff] }
  0xcf   : > { %711 = vmatpush.xpose.msra.mxu0 %v662_v3  ;;  %v4671_v13 = vld [vmem:[%s553_s17 + $0x8] sm:$0xff]  ;;  %v4678_v15 = vld [vmem:[%s4633_s29] sm:$0xff]  ;;  %v657_v17 = vld [vmem:[%s4631_s19 + $0x18] sm:$0xff]  ;;  %v1187_v3 = vadd.s32 72, %v1178_v63 }
  0xd0   : > { %1288 = vmatpush.msra.mxu3 %v4650_v4  ;;  %v658_v16 = vld [vmem:[%s4631_s19 + $0x20] sm:$0xff]  ;;  %v4686_v18 = vld [vmem:[%s4633_s29 + $0x8] sm:$0xff]  ;;  %v656_v19 = vld [vmem:[%s4631_s19 + $0x10] sm:$0xff] }
  0xd1   : > { %v655_v20 = vld [vmem:[%s4631_s19 + $0x8] sm:$0xff]  ;;  %v4693_v21 = vld [vmem:[%s4633_s29 + $0x10] sm:$0xff]  ;;  %v654_v22 = vld [vmem:[%s4631_s19] sm:$0xff]  ;;  %s3206_s30 = scalar_lea.hbm %s6388_s16, %s3750_s23  ;;  %s4214_s22 = scalar_lea.hbm %s6388_s16, 80 }
  0xd2   : > { %1289 = vmatpush.msra.mxu3 %v4653_v5  ;;  %v629_v23 = vld [vmem:[%s4607_s21] sm:$0xff]  ;;  %v4700_v24 = vld [vmem:[%s4633_s29 + $0x18] sm:$0xff]  ;;  %v4706_v26 = vld [vmem:[%s4633_s29 + $0x20] sm:$0xff]  ;;  %s3209_s9 = sshll.u32 %s3206_s30, 4  ;;  %s3210_s9 = int_to_ptr.hbm [resolvable:$true] %s3209_s9 }
  0xd3   : > { %712 = vmatpush.xpose.msra.mxu0 %v661_v6  ;;  %v630_v25 = vld [vmem:[%s4607_s21 + $0x8] sm:$0xff]  ;;  %v631_v27 = vld [vmem:[%s4607_s21 + $0x10] sm:$0xff]  ;;  %v4712_v28 = vld [vmem:[%s4633_s29 + $0x28] sm:$0xff]  ;;  %v1189_v6 = vand.u32 127, %v1177_v62  ;;  %s4208_s1 = sshra.s32 %s3210_s9, 4  ;;  %s4209_s1 = int_to_ptr.hbm [resolvable:$true] %s4208_s1 }
  0xd4   : > { %1290 = vmatpush.msra.mxu3 %v4657_v7  ;;  %v632_v29 = vld [vmem:[%s4607_s21 + $0x18] sm:$0xff]  ;;  %v4718_v30 = vld [vmem:[%s4633_s29 + $0x30] sm:$0xff]  ;;  %v4724_v32 = vld [vmem:[%s4633_s29 + $0x38] sm:$0xff]  ;;  %p4215_p0 = scmp.lt.s32.totalorder %s4209_s1, %s6388_s16 }
  0xd5   : > { %v633_v31 = vld [vmem:[%s4607_s21 + $0x20] sm:$0xff]  ;;  %v4729_v33 = vld [vmem:[%s4633_s29 + $0x40] sm:$0xff]  ;;  %v693_v40 = vld [vmem:[#allocation14 + $0x48] sm:$0xff]  ;;  %vm1199_vm1 = vcmp.eq.s32.totalorder %v1187_v3, %v1189_v6  ;;  %vm1190_vm10 = vcmp.eq.s32.totalorder %v1178_v63, %v1189_v6  ;;  %s4210_s21 = scalar_lea.hbm %s4209_s1, 40 }
  0xd6   : > { %1291 = vmatpush.msra.mxu3 %v4660_v8  ;;  %v4734_v34 = vld [vmem:[%s4633_s29 + $0x48] sm:$0xff]  ;;  %788 = vmatpush.msra.mxu1 %v693_v40  ;;  %v692_v44 = vld [vmem:[#allocation14 + $0x40] sm:$0xff]  ;;  %v690_v46 = vld [vmem:[#allocation14 + $0x30] sm:$0xff]  ;;  %v1181_v40 = vadd.s32 24, %v1178_v63  ;;  %p4211_p4 = scmp.ne.s32.totalorder %s4209_s1, %s4210_s21  ;;  %p4216_p3 = scmp.lt.s32.totalorder %s4214_s22, %s4210_s21 }
  0xd7   : > { %713 = vmatpush.xpose.msra.mxu0 %v660_v9  ;;  %v691_v45 = vld [vmem:[#allocation14 + $0x38] sm:$0xff]  ;;  %v689_v47 = vld [vmem:[#allocation14 + $0x28] sm:$0xff]  ;;  %v688_v51 = vld [vmem:[#allocation14 + $0x20] sm:$0xff]  ;;  %v1186_v9 = vadd.s32 64, %v1178_v63 }
  0xd8   : > { %1292 = vmatpush.msra.mxu3 %v4664_v10  ;;  %789 = vmatpush.msra.mxu1 %v692_v44  ;;  %v687_v52 = vld [vmem:[#allocation14 + $0x18] sm:$0xff]  ;;  %v686_v53 = vld [vmem:[#allocation14 + $0x10] sm:$0xff]  ;;  %v685_v54 = vld [vmem:[#allocation14 + $0x8] sm:$0xff]  ;;  %v1180_v44 = vadd.s32 16, %v1178_v63  ;;  %vm1193_vm7 = vcmp.eq.s32.totalorder %v1181_v40, %v1189_v6  ;;  %p4212_p12 = pnand %p4211_p4, %p4411_p7  ;;  %p4217_p5 = por %p4216_p3, %p4215_p0 }
  0xd9   : > { %v684_v58 = vld [vmem:[#allocation14] sm:$0xff]  ;;  %vm1198_vm2 = vcmp.eq.s32.totalorder %v1186_v9, %v1189_v6 }
  0xda   : > { %1293 = vmatpush.msra.mxu3 %v4667_v11  ;;  %790 = vmatpush.msra.mxu1 %v691_v45  ;;  %vm1192_vm8 = vcmp.eq.s32.totalorder %v1180_v44, %v1189_v6  ;;  %p4213_p13 = pneg %p4212_p12 }
  0xdb   : > { %714 = vmatpush.xpose.msra.mxu0 %v659_v12  ;;  %v1185_v12 = vadd.s32 56, %v1178_v63 }
  0xdc   : > { %1294 = vmatpush.msra.mxu3 %v4671_v13  ;;  %791 = vmatpush.msra.mxu1 %v690_v46  ;;  %p4218_p1 = pnand %p4217_p5, %p4213_p13 }
  0xdd   : > { %vm1197_vm3 = vcmp.eq.s32.totalorder %v1185_v12, %v1189_v6 }
  0xde   : > { %1295 = vmatpush.msra.mxu3 %v4674_v14  ;;  %792 = vmatpush.msra.mxu1 %v689_v47 }
  0xdf   : > { %3461 = vmatmul.msk.f32.vlgmr.msra.gmra.mxu3 %vm736_vm0, %v4678_v15  ;;  %715 = vmatpush.xpose.msra.mxu0 %v658_v16  ;;  %v1184_v16 = vadd.s32 48, %v1178_v63 }
  0xe0   : > { %793 = vmatpush.msra.mxu1 %v688_v51 }
  0xe1   : > { %vm1196_vm4 = vcmp.eq.s32.totalorder %v1184_v16, %v1189_v6 }
  0xe2   : > { %794 = vmatpush.msra.mxu1 %v687_v52  ;;  %v1179_v52 = vadd.s32 8, %v1178_v63 }
  0xe3   : > { %716 = vmatpush.xpose.msra.mxu0 %v657_v17 }
  0xe4   : > { %795 = vmatpush.msra.mxu1 %v686_v53  ;;  %vm1191_vm9 = vcmp.eq.s32.totalorder %v1179_v52, %v1189_v6 }
  0xe6   : > { %796 = vmatpush.msra.mxu1 %v685_v54 }
  0xe7   : > { %3462 = vmatmul.msk.f32.gmra.mxu3 %vm736_vm0, %v4686_v18  ;;  %717 = vmatpush.xpose.msra.mxu0 %v656_v19  ;;  %v4282_v19 = vmov 0.0  }
  0xe8   : > { %797 = vmatpush.msra.mxu1 %v684_v58  ;;  %v4811_v58 = vsel %vm1193_vm7, 1.0, %v4282_v19  ;;  %v4818_v3 = vsel %vm1192_vm8, 1.0, %v4282_v19  ;;  %v4825_v16 = vsel %vm1191_vm9, 1.0, %v4282_v19  ;;  %v4832_v40 = vsel %vm1190_vm10, 1.0, %v4282_v19 }
  0xe9   : > { %v4823_v12 = vmul.f32 7.0, %v4811_v58 }
  0xeb   : > { %718 = vmatpush.xpose.msra.mxu0 %v655_v20  ;;  %v4776_v20 = vsel %vm1199_vm1, 1.0, %v4282_v19  ;;  %6283 = vst [vmem:[#allocation41_spill] sm:$0xff] %v4823_v12 }
  0xef   : > { %3463 = vmatmul.msk.f32.gmra.mxu3 %vm736_vm0, %v4693_v21  ;;  %719 = vmatpush.xpose.msra.mxu0 %v654_v22  ;;  %v1183_v22 = vadd.s32 40, %v1178_v63 }
  0xf1   : > { %vm1195_vm5 = vcmp.eq.s32.totalorder %v1183_v22, %v1189_v6 }
  0xf2   : > { %720 = vmatmul.f32.vlgmr.msra.gmra.mxu0 %v629_v23  ;;  %v4778_v23 = vsel %vm1198_vm2, 1.0, %v4282_v19  ;;  %v4798_v47 = vsel %vm1195_vm5, 1.0, %v4282_v19 }
  0xf7   : > { %3464 = vmatmul.msk.f32.gmra.mxu3 %vm736_vm0, %v4700_v24 }
  0xfa   : > { %723 = vmatmul.f32.gmra.mxu0 %v630_v25  ;;  %v1182_v25 = vadd.s32 32, %v1178_v63 }
  0xfc   : > { %vm1194_vm6 = vcmp.eq.s32.totalorder %v1182_v25, %v1189_v6  ;;  %v4830_v25 = vmul.f32 7.0, %v4818_v3  ;;  %v4842_v6 = vmul.f32 7.0, %v4832_v40 }
  0xfd   : > { %v4804_v53 = vsel %vm1194_vm6, 1.0, %v4282_v19 }
  0xfe   : > { %v4816_v62 = vmul.f32 7.0, %v4804_v53  ;;  %6284 = vst [vmem:[#allocation42_spill] sm:$0xff] %v4830_v25 }
  0xff   : > { %3465 = vmatmul.msk.f32.gmra.mxu3 %vm736_vm0, %v4706_v26  ;;  %6286 = vst [vmem:[#allocation44_spill] sm:$0xff] %v4842_v6 }
 0x100   : > { %6282 = vst [vmem:[#allocation40_spill] sm:$0xff] %v4816_v62 }
 0x102   : > { %726 = vmatmul.f32.gmra.mxu0 %v631_v27  ;;  %v4781_v27 = vmul.f32 7.0, %v4776_v20 }
 0x104   : > { %6277 = vst [vmem:[#allocation35_spill] sm:$0xff] %v4781_v27 }
 0x107   : > { %3466 = vmatmul.msk.f32.gmra.mxu3 %vm736_vm0, %v4712_v28 }
 0x10a   : > { %729 = vmatmul.f32.gmra.mxu0 %v632_v29  ;;  %v4783_v29 = vsel %vm1197_vm3, 1.0, %v4282_v19 }
 0x10f   : > { %3467 = vmatmul.msk.f32.gmra.mxu3 %vm736_vm0, %v4718_v30 }
 0x112   : > { %732 = vmatmul.f32.gmra.mxu0 %v633_v31  ;;  %v4786_v31 = vmul.f32 7.0, %v4778_v23 }
 0x114   : > { %6278 = vst [vmem:[#allocation36_spill] sm:$0xff] %v4786_v31 }
 0x117   : > { %3468 = vmatmul.msk.f32.gmra.mxu3 %vm736_vm0, %v4724_v32 }
 0x11f   : > { %3469 = vmatmul.msk.f32.gmra.mxu3 %vm736_vm0, %v4729_v33 }
 0x127   : > { %3470 = vmatmul.msk.f32.gmra.mxu3 %vm736_vm0, %v4734_v34 }
 0x162   : > { %v4738_v35 = vpop.f32.mrf.mxu3 }
 0x16a   : > { %v4740_v36 = vpop.f32.mrf.mxu3 }
 0x16f   : > { %v4742_v37 = vpop.f32.mrf.mxu0 }
 0x170   : > { %v737_v38 = vsel %vm736_vm0, %v4742_v37, -inf }
 0x171   : > { %738 = vmax.xlane.f32.xlu0 %v737_v38  ;;  %v4788_v38 = vsel %vm1196_vm4, 1.0, %v4282_v19  ;;  %v1327_v19 = vsub.f32 %v4842_v6, %v4738_v35 }
 0x172   : > { %v4746_v39 = vpop.f32.mrf.mxu3  ;;  %v4796_v46 = vmul.f32 7.0, %v4788_v38 }
 0x173   : > { %v1329_v63 = vsub.f32 %v4830_v25, %v4746_v39 }
 0x174   : > { %6280 = vst [vmem:[#allocation38_spill] sm:$0xff] %v4796_v46 }
 0x177   : > { %v4748_v41 = vpop.f32.mrf.mxu0 }
 0x178   : > { %v740_v42 = vsel %vm736_vm0, %v4748_v41, -inf }
 0x179   : > { %741 = vmax.xlane.f32.xlu0 %v740_v42  ;;  %v4791_v42 = vmul.f32 7.0, %v4783_v29 }
 0x17a   : > { %v4752_v43 = vpop.f32.mrf.mxu3 }
 0x17b   : > { %6279 = vst [vmem:[#allocation37_spill] sm:$0xff] %v4791_v42  ;;  %v1330_v44 = vsub.f32 %v4823_v12, %v4752_v43  ;;  %v4934_v12 = vmul.f32 15.0, %v4783_v29 }
 0x17f   : > { %v4754_v48 = vpop.f32.mrf.mxu0 }
 0x180   : > { %v743_v49 = vsel %vm736_vm0, %v4754_v48, -inf }
 0x181   : > { %744 = vmax.xlane.f32.xlu1 %v743_v49 }
 0x182   : > { %v4758_v50 = vpop.f32.mrf.mxu3 }
 0x183   : > { %v1331_v22 = vsub.f32 %v4816_v62, %v4758_v50 }
 0x187   : > { %v4760_v55 = vpop.f32.mrf.mxu0 }
 0x188   : > { %v746_v56 = vsel %vm736_vm0, %v4760_v55, -inf }
 0x189   : > { %747 = vmax.xlane.f32.xlu1 %v746_v56  ;;  %v4809_v56 = vmul.f32 7.0, %v4798_v47 }
 0x18a   : > { %v4764_v57 = vpop.f32.mrf.mxu3 }
 0x18b   : > { %6281 = vst [vmem:[#allocation39_spill] sm:$0xff] %v4809_v56  ;;  %v1332_v9 = vsub.f32 %v4809_v56, %v4764_v57  ;;  %v4942_v56 = vmul.f32 15.0, %v4798_v47 }
 0x18f   : > { %v4766_v59 = vpop.f32.mrf.mxu0 }
 0x190   : > { %v749_v60 = vsel %vm736_vm0, %v4766_v59, -inf }
 0x191   : > { %750 = vmax.xlane.f32.xlu2 %v749_v60 }
 0x192   : > { %v4770_v61 = vpop.f32.mrf.mxu3 }
 0x193   : > { %v1333_v60 = vsub.f32 %v4796_v46, %v4770_v61 }
 0x19a   : > { %v4772_v0 = vpop.f32.mrf.mxu3 }
 0x19b   : > { %v1334_v54 = vsub.f32 %v4791_v42, %v4772_v0 }
 0x1a2   : > { %v4774_v17 = vpop.f32.mrf.mxu3 }
 0x1a3   : > { %v1335_v51 = vsub.f32 %v4786_v31, %v4774_v17 }
 0x1aa   : > { %v4793_v45 = vpop.f32.mrf.mxu3 }
 0x1ab   : > { %v1336_v49 = vsub.f32 %v4781_v27, %v4793_v45 }
 0x1ad   : > { %1373 = vmatpush.msrb.mxu1 %v1336_v49  ;;  %v4837_v49 = vmul.f32 7.0, %v4825_v16 }
 0x1af   : > { %1374 = vmatpush.msrb.mxu1 %v1335_v51  ;;  %6285 = vst [vmem:[#allocation43_spill] sm:$0xff] %v4837_v49  ;;  %v1328_v51 = vsub.f32 %v4837_v49, %v4740_v36 }
 0x1b1   : > { %1375 = vmatpush.msrb.mxu1 %v1334_v54 }
 0x1b3   : > { %1376 = vmatpush.msrb.mxu1 %v1333_v60 }
 0x1b5   : > { %1377 = vmatpush.msrb.mxu1 %v1332_v9 }
 0x1b7   : > { %1378 = vmatpush.msrb.mxu1 %v1331_v22 }
 0x1b9   : > { %1379 = vmatpush.msrb.mxu1 %v1330_v44 }
 0x1bb   : > { %1380 = vmatpush.msrb.mxu1 %v1329_v63 }
 0x1bd   : > { %1381 = vmatpush.msrb.mxu1 %v1328_v51 }
 0x1bf   : > { %1382 = vmatpush.msrb.mxu1 %v1327_v19 }
 0x1e4   : > { %v739_v52 = vpop.xlane.xlu0 %738 }
 0x1e5   : > { %v752_v54 = vsub.f32 %v4742_v37, %v739_v52 }
 0x1e7   : > { %v757_v60 = vmul.f32 1.442695, %v752_v54 }
 0x1e9   : > { %3853 = vpow2.f32 %v757_v60 }
 0x1ec   : > { %v742_v9 = vpop.xlane.xlu0 %741 }
 0x1ed   : > { %v753_v22 = vsub.f32 %v4748_v41, %v742_v9 }
 0x1ef   : > { %v4850_v25 = vpop.eup %3853  ;;  %v759_v44 = vmul.f32 1.442695, %v753_v22 }
 0x1f0   : > { %6287 = vst [vmem:[#allocation45_spill] sm:$0xff] %v4850_v25  ;;  %3446 = vmatmul.msk.f32.vlgmr.msra.gmra.mxu1 %vm736_vm0, %v4850_v25 }
 0x1f1   : > { %3855 = vpow2.f32 %v759_v44  ;;  %v636_v44 = vld [vmem:[%s4615_s6 + $0x10] sm:$0xff] }
 0x1f4   : > { %v745_v63 = vpop.xlane.xlu1 %744 }
 0x1f5   : > { %v754_v51 = vsub.f32 %v4754_v48, %v745_v63  ;;  %v638_v48 = vld [vmem:[%s4615_s6 + $0x20] sm:$0xff] }
 0x1f6   : > { %900 = vmatpush.xpose.msra.mxu2 %v638_v48  ;;  %v646_v48 = vld [vmem:[%s4625_s18 + $0x10] sm:$0xff] }
 0x1f7   : > { %v4855_v19 = vpop.eup %3855  ;;  %v761_v6 = vmul.f32 1.442695, %v754_v51  ;;  %v635_v51 = vld [vmem:[%s4615_s6 + $0x8] sm:$0xff] }
 0x1f8   : > { %6288 = vst [vmem:[#allocation46_spill] sm:$0xff] %v4855_v19  ;;  %3447 = vmatmul.msk.f32.gmra.mxu1 %vm736_vm0, %v4855_v19 }
 0x1f9   : > { %3857 = vpow2.f32 %v761_v6 }
 0x1fc   : > { %v748_v37 = vpop.xlane.xlu1 %747 }
 0x1fd   : > { %v755_v41 = vsub.f32 %v4760_v55, %v748_v37  ;;  %v637_v55 = vld [vmem:[%s4615_s6 + $0x18] sm:$0xff]  ;;  %v644_v37 = vld [vmem:[%s4625_s18] sm:$0xff] }
 0x1fe   : > { %901 = vmatpush.xpose.msra.mxu2 %v637_v55  ;;  %v648_v55 = vld [vmem:[%s4625_s18 + $0x20] sm:$0xff] }
 0x1ff   : > { %v4860_v52 = vpop.eup %3857  ;;  %v763_v54 = vmul.f32 1.442695, %v755_v41  ;;  %v645_v41 = vld [vmem:[%s4625_s18 + $0x8] sm:$0xff] }
 0x200   : > { %6289 = vst [vmem:[#allocation47_spill] sm:$0xff] %v4860_v52  ;;  %3448 = vmatmul.msk.f32.gmra.mxu1 %vm736_vm0, %v4860_v52 }
 0x201   : > { %3859 = vpow2.f32 %v763_v54 }
 0x202   : > { %902 = vmatpush.xpose.msra.mxu2 %v636_v44 }
 0x204   : > { %v751_v60 = vpop.xlane.xlu2 %750 }
 0x205   : > { %v756_v9 = vsub.f32 %v4766_v59, %v751_v60  ;;  %v634_v59 = vld [vmem:[%s4615_s6] sm:$0xff] }
 0x206   : > { %903 = vmatpush.xpose.msra.mxu2 %v635_v51  ;;  %v649_v51 = vld [vmem:[%s4625_s18 + $0x28] sm:$0xff] }
 0x207   : > { %v4866_v6 = vpop.eup %3859  ;;  %v765_v22 = vmul.f32 1.442695, %v756_v9  ;;  %v647_v9 = vld [vmem:[%s4625_s18 + $0x18] sm:$0xff] }
 0x208   : > { %6290 = vst [vmem:[#allocation48_spill] sm:$0xff] %v4866_v6  ;;  %3449 = vmatmul.msk.f32.gmra.mxu1 %vm736_vm0, %v4866_v6 }
 0x209   : > { %3861 = vpow2.f32 %v765_v22 }
 0x20a   : > { %904 = vmatpush.xpose.msra.mxu2 %v634_v59 }
 0x20d   : > { %905 = vmatmul.f32.vlgmr.msra.gmra.mxu2 %v644_v37  ;;  %v650_v37 = vld [vmem:[%s4625_s18 + $0x30] sm:$0xff] }
 0x20f   : > { %v4872_v63 = vpop.eup %3861 }
 0x210   : > { %6291 = vst [vmem:[#allocation49_spill] sm:$0xff] %v4872_v63  ;;  %3450 = vmatmul.msk.f32.gmra.mxu1 %vm736_vm0, %v4872_v63 }
 0x215   : > { %908 = vmatmul.f32.gmra.mxu2 %v645_v41 }
 0x218   : > { %3471 = vmatmul.msk.f32.vlgmr.msrb.gmra.mxu1 %vm736_vm0, %v4738_v35 }
 0x21d   : > { %911 = vmatmul.f32.gmra.mxu2 %v646_v48  ;;  %v651_v48 = vld [vmem:[%s4625_s18 + $0x38] sm:$0xff] }
 0x220   : > { %3472 = vmatmul.msk.f32.gmra.mxu1 %vm736_vm0, %v4740_v36 }
 0x225   : > { %914 = vmatmul.f32.gmra.mxu2 %v647_v9 }
 0x228   : > { %3473 = vmatmul.msk.f32.gmra.mxu1 %vm736_vm0, %v4746_v39 }
 0x22d   : > { %917 = vmatmul.f32.gmra.mxu2 %v648_v55  ;;  %v652_v55 = vld [vmem:[%s4625_s18 + $0x40] sm:$0xff] }
 0x230   : > { %3474 = vmatmul.msk.f32.gmra.mxu1 %vm736_vm0, %v4752_v43 }
 0x235   : > { %920 = vmatmul.f32.gmra.mxu2 %v649_v51 }
 0x238   : > { %3475 = vmatmul.msk.f32.gmra.mxu1 %vm736_vm0, %v4758_v50 }
 0x23d   : > { %923 = vmatmul.f32.gmra.mxu2 %v650_v37  ;;  %v653_v37 = vld [vmem:[%s4625_s18 + $0x48] sm:$0xff] }
 0x240   : > { %3476 = vmatmul.msk.f32.gmra.mxu1 %vm736_vm0, %v4764_v57 }
 0x245   : > { %926 = vmatmul.f32.gmra.mxu2 %v651_v48 }
 0x248   : > { %3477 = vmatmul.msk.f32.gmra.mxu1 %vm736_vm0, %v4770_v61 }
 0x24d   : > { %929 = vmatmul.f32.gmra.mxu2 %v652_v55 }
 0x250   : > { %3478 = vmatmul.msk.f32.gmra.mxu1 %vm736_vm0, %v4772_v0 }
 0x255   : > { %932 = vmatmul.f32.gmra.mxu2 %v653_v37  ;;  %v4938_v37 = vmul.f32 15.0, %v4788_v38 }
 0x258   : > { %3479 = vmatmul.msk.f32.gmra.mxu1 %vm736_vm0, %v4774_v17 }
 0x260   : > { %3480 = vmatmul.msk.f32.gmra.mxu1 %vm736_vm0, %v4793_v45 }
 0x26d   : > { %v4900_v54 = vpop.f32.mrf.mxu1 }
 0x26e   : > { %6292 = vst [vmem:[#allocation50_spill] sm:$0xff] %v4900_v54  ;;  %v4927_v54 = vmul.f32 15.0, %v4776_v20 }
 0x275   : > { %v4903_v60 = vpop.f32.mrf.mxu1 }
 0x276   : > { %6293 = vst [vmem:[#allocation51_spill] sm:$0xff] %v4903_v60 }
 0x27d   : > { %v4906_v22 = vpop.f32.mrf.mxu1 }
 0x27e   : > { %6294 = vst [vmem:[#allocation52_spill] sm:$0xff] %v4906_v22 }
 0x285   : > { %v4909_v44 = vpop.f32.mrf.mxu1 }
 0x286   : > { %6295 = vst [vmem:[#allocation53_spill] sm:$0xff] %v4909_v44 }
 0x28d   : > { %v4912_v59 = vpop.f32.mrf.mxu1 }
 0x28e   : > { %6296 = vst [vmem:[#allocation54_spill] sm:$0xff] %v4912_v59 }
 0x290   : > { %v4916_v6 = vpop.f32.mrf.mxu2 }
 0x291   : > { %v937_v9 = vsel %vm936_vm11, %v4916_v6, -inf }
 0x292   : > { %938 = vmax.xlane.f32.xlu2 %v937_v9  ;;  %v4930_v9 = vmul.f32 15.0, %v4778_v23 }
 0x295   : > { %v1384_v41 = vpop.f32.mrf.mxu1 }
 0x298   : > { %v4921_v51 = vpop.f32.mrf.mxu2 }
 0x299   : > { %v940_v19 = vsel %vm936_vm11, %v4921_v51, -inf }
 0x29a   : > { %941 = vmax.xlane.f32.xlu0 %v940_v19 }
 0x29d   : > { %v1387_v63 = vpop.f32.mrf.mxu1 }
 0x2a5   : > { %v1390_v52 = vpop.f32.mrf.mxu1 }
 0x2ad   : > { %v1393_v48 = vpop.f32.mrf.mxu1 }
 0x2b5   : > { %v1396_v59 = vpop.f32.mrf.mxu1 }
 0x2bd   : > { %v1399_v25 = vpop.f32.mrf.mxu1 }
 0x2c5   : > { %v1402_v44 = vpop.f32.mrf.mxu1 }
 0x2c6   : > { %v1420_v46 = vsub.f32 %v4938_v37, %v1402_v44  ;;  %v4958_v44 = vmul.f32 15.0, %v4825_v16 }
 0x2cd   : > { %v1405_v22 = vpop.f32.mrf.mxu1 }
 0x2ce   : > { %v1421_v62 = vsub.f32 %v4934_v12, %v1405_v22  ;;  %v4954_v22 = vmul.f32 15.0, %v4818_v3 }
 0x2d5   : > { %v1408_v60 = vpop.f32.mrf.mxu1 }
 0x2d6   : > { %v1422_v19 = vsub.f32 %v4930_v9, %v1408_v60  ;;  %v4950_v60 = vmul.f32 15.0, %v4811_v58 }
 0x2dd   : > { %v1411_v55 = vpop.f32.mrf.mxu1 }
 0x2de   : > { %v1423_v49 = vsub.f32 %v4927_v54, %v1411_v55  ;;  %v4946_v55 = vmul.f32 15.0, %v4804_v53 }
 0x2e0   : > { %1430 = vmatpush.msrb.mxu0 %v1423_v49  ;;  %v1419_v49 = vsub.f32 %v4942_v56, %v1399_v25  ;;  %v4962_v25 = vmul.f32 15.0, %v4832_v40 }
 0x2e2   : > { %1431 = vmatpush.msrb.mxu0 %v1422_v19  ;;  %v1418_v19 = vsub.f32 %v4946_v55, %v1396_v59  ;;  %6297 = vst [vmem:[#allocation55_spill] sm:$0xff] %v4962_v25  ;;  %v1414_v59 = vsub.f32 %v4962_v25, %v1384_v41 }
 0x2e4   : > { %1432 = vmatpush.msrb.mxu0 %v1421_v62  ;;  %v1417_v62 = vsub.f32 %v4950_v60, %v1393_v48  ;;  %v912_v48 = vpop.f32.mrf.mxu2 }
 0x2e6   : > { %1433 = vmatpush.msrb.mxu0 %v1420_v46  ;;  %v1416_v46 = vsub.f32 %v4954_v22, %v1390_v52 }
 0x2e8   : > { %1434 = vmatpush.msrb.mxu0 %v1419_v49  ;;  %v1415_v49 = vsub.f32 %v4958_v44, %v1387_v63 }
 0x2ea   : > { %1435 = vmatpush.msrb.mxu0 %v1418_v19  ;;  %v943_v19 = vsel %vm936_vm11, %v912_v48, -inf }
 0x2eb   : > { %944 = vmax.xlane.f32.xlu1 %v943_v19 }
 0x2ec   : > { %1436 = vmatpush.msrb.mxu0 %v1417_v62  ;;  %v915_v52 = vpop.f32.mrf.mxu2 }
 0x2ed   : > { %v946_v62 = vsel %vm936_vm11, %v915_v52, -inf }
 0x2ee   : > { %1437 = vmatpush.msrb.mxu0 %v1416_v46  ;;  %947 = vmax.xlane.f32.xlu2 %v946_v62 }
 0x2f0   : > { %1438 = vmatpush.msrb.mxu0 %v1415_v49 }
 0x2f2   : > { %1439 = vmatpush.msrb.mxu0 %v1414_v59 }
 0x2f3   : > { %3481 = vmatmul.msk.f32.vlgmr.msrb.gmra.mxu0 %vm736_vm0, %v4738_v35 }
 0x2f4   : > { %v918_v63 = vpop.f32.mrf.mxu2 }
 0x2f5   : > { %v949_v41 = vsel %vm936_vm11, %v918_v63, -inf }
 0x2f6   : > { %950 = vmax.xlane.f32.xlu0 %v949_v41 }
 0x2fb   : > { %3482 = vmatmul.msk.f32.gmra.mxu0 %vm736_vm0, %v4740_v36 }
 0x2fc   : > { %v921_v35 = vpop.f32.mrf.mxu2 }
 0x2fd   : > { %v952_v46 = vsel %vm936_vm11, %v921_v35, -inf }
 0x2fe   : > { %953 = vmax.xlane.f32.xlu1 %v952_v46 }
 0x303   : > { %3483 = vmatmul.msk.f32.gmra.mxu0 %vm736_vm0, %v4746_v39 }
 0x304   : > { %v924_v19 = vpop.f32.mrf.mxu2 }
 0x305   : > { %v939_v36 = vpop.xlane.xlu2 %938  ;;  %v955_v39 = vsel %vm936_vm11, %v924_v19, -inf }
 0x306   : > { %v967_v49 = vsub.f32 %v4916_v6, %v939_v36  ;;  %956 = vmax.xlane.f32.xlu2 %v955_v39 }
 0x308   : > { %v977_v59 = vmul.f32 1.442695, %v967_v49 }
 0x30a   : > { %3863 = vpow2.f32 %v977_v59 }
 0x30b   : > { %3484 = vmatmul.msk.f32.gmra.mxu0 %vm736_vm0, %v4752_v43 }
 0x30c   : > { %v927_v25 = vpop.f32.mrf.mxu2 }
 0x30d   : > { %v942_v62 = vpop.xlane.xlu0 %941 }
 0x30e   : > { %v968_v43 = vsub.f32 %v4921_v51, %v942_v62 }
 0x310   : > { %v979_v41 = vmul.f32 1.442695, %v968_v43  ;;  %v4985_v46 = vpop.eup %3863 }
 0x311   : > { %6298 = vst [vmem:[#allocation56_spill] sm:$0xff] %v4985_v46  ;;  %v997_v6 = vsel %vm936_vm11, %v4985_v46, 0.0 }
 0x312   : > { %3865 = vpow2.f32 %v979_v41  ;;  %998 = vadd.xlane.f32.xlu0 %v997_v6 }
 0x313   : > { %3485 = vmatmul.msk.f32.gmra.mxu0 %vm736_vm0, %v4758_v50  ;;  %v958_v50 = vsel %vm936_vm11, %v927_v25, -inf }
 0x314   : > { %959 = vmax.xlane.f32.xlu1 %v958_v50 }
 0x318   : > { %v4992_v36 = vpop.eup %3865 }
 0x319   : > { %6299 = vst [vmem:[#allocation57_spill] sm:$0xff] %v4992_v36  ;;  %v1000_v51 = vsel %vm936_vm11, %v4992_v36, 0.0 }
 0x31a   : > { %1001 = vadd.xlane.f32.xlu2 %v1000_v51 }
 0x31b   : > { %3486 = vmatmul.msk.f32.gmra.mxu0 %vm736_vm0, %v4764_v57  ;;  %v930_v57 = vpop.f32.mrf.mxu2 }
 0x31c   : > { %v961_v49 = vsel %vm936_vm11, %v930_v57, -inf }
 0x31d   : > { %962 = vmax.xlane.f32.xlu0 %v961_v49 }
 0x323   : > { %3487 = vmatmul.msk.f32.gmra.mxu0 %vm736_vm0, %v4770_v61  ;;  %v4999_v59 = vpop.f32.mrf.mxu2 }
 0x324   : > { %v964_v39 = vsel %vm936_vm11, %v4999_v59, -inf }
 0x325   : > { %965 = vmax.xlane.f32.xlu2 %v964_v39 }
 0x32b   : > { %3488 = vmatmul.msk.f32.gmra.mxu0 %vm736_vm0, %v4772_v0 }
 0x333   : > { %3489 = vmatmul.msk.f32.gmra.mxu0 %vm736_vm0, %v4774_v17 }
 0x33b   : > { %3490 = vmatmul.msk.f32.gmra.mxu0 %vm736_vm0, %v4793_v45 }
 0x35e   : > { %v945_v61 = vpop.xlane.xlu1 %944 }
 0x35f   : > { %v969_v62 = vsub.f32 %v912_v48, %v945_v61 }
 0x361   : > { %v981_v43 = vmul.f32 1.442695, %v969_v62  ;;  %v948_v50 = vpop.xlane.xlu2 %947 }
 0x362   : > { %v970_v0 = vsub.f32 %v915_v52, %v948_v50 }
 0x363   : > { %3867 = vpow2.f32 %v981_v43 }
 0x364   : > { %v983_v51 = vmul.f32 1.442695, %v970_v0 }
 0x366   : > { %3869 = vpow2.f32 %v983_v51 }
 0x369   : > { %v5009_v6 = vpop.eup %3867  ;;  %v951_v17 = vpop.xlane.xlu0 %950 }
 0x36a   : > { %6300 = vst [vmem:[#allocation58_spill] sm:$0xff] %v5009_v6  ;;  %v1003_v49 = vsel %vm936_vm11, %v5009_v6, 0.0  ;;  %v971_v45 = vsub.f32 %v918_v63, %v951_v17 }
 0x36b   : > { %1004 = vadd.xlane.f32.xlu1 %v1003_v49 }
 0x36c   : > { %v5015_v36 = vpop.eup %3869  ;;  %v985_v48 = vmul.f32 1.442695, %v971_v45 }
 0x36d   : > { %6301 = vst [vmem:[#allocation59_spill] sm:$0xff] %v5015_v36  ;;  %v1006_v61 = vsel %vm936_vm11, %v5015_v36, 0.0 }
 0x36e   : > { %3871 = vpow2.f32 %v985_v48  ;;  %1007 = vadd.xlane.f32.xlu0 %v1006_v61 }
 0x370   : > { %v5007_v41 = vpop.f32.mrf.mxu0 }
 0x371   : > { %v954_v52 = vpop.xlane.xlu1 %953 }
 0x372   : > { %v972_v43 = vsub.f32 %v921_v35, %v954_v52 }
 0x374   : > { %v5021_v50 = vpop.eup %3871  ;;  %v987_v0 = vmul.f32 1.442695, %v972_v43 }
 0x375   : > { %6302 = vst [vmem:[#allocation60_spill] sm:$0xff] %v5021_v50  ;;  %v1009_v51 = vsel %vm936_vm11, %v5021_v50, 0.0 }
 0x376   : > { %3873 = vpow2.f32 %v987_v0  ;;  %1010 = vadd.xlane.f32.xlu1 %v1009_v51 }
 0x378   : > { %v5013_v39 = vpop.f32.mrf.mxu0 }
 0x379   : > { %v957_v63 = vpop.xlane.xlu2 %956 }
 0x37a   : > { %v973_v17 = vsub.f32 %v924_v19, %v957_v63 }
 0x37c   : > { %v5027_v45 = vpop.eup %3873  ;;  %v989_v36 = vmul.f32 1.442695, %v973_v17 }
 0x37d   : > { %6303 = vst [vmem:[#allocation61_spill] sm:$0xff] %v5027_v45  ;;  %v1012_v48 = vsel %vm936_vm11, %v5027_v45, 0.0 }
 0x37e   : > { %3875 = vpow2.f32 %v989_v36  ;;  %1013 = vadd.xlane.f32.xlu2 %v1012_v48 }
 0x380   : > { %v5019_v62 = vpop.f32.mrf.mxu0 }
 0x384   : > { %v5033_v50 = vpop.eup %3875 }
 0x385   : > { %v5031_v52 = vpop.xlane.xlu0 %998  ;;  %6305 = vst [vmem:[#allocation63_spill] sm:$0xff] %v5033_v50  ;;  %v1015_v0 = vsel %vm936_vm11, %v5033_v50, 0.0 }
 0x386   : > { %6304 = vst [vmem:[#allocation62_spill] sm:$0xff] %v5031_v52  ;;  %1016 = vadd.xlane.f32.xlu0 %v1015_v0 }
 0x387   : > { %v960_v35 = vpop.xlane.xlu1 %959 }
 0x388   : > { %v5025_v49 = vpop.f32.mrf.mxu0  ;;  %v974_v43 = vsub.f32 %v927_v25, %v960_v35 }
 0x38a   : > { %v991_v6 = vmul.f32 1.442695, %v974_v43 }
 0x38c   : > { %3877 = vpow2.f32 %v991_v6 }
 0x38d   : > { %v5037_v63 = vpop.xlane.xlu2 %1001 }
 0x38e   : > { %6306 = vst [vmem:[#allocation64_spill] sm:$0xff] %v5037_v63 }
 0x390   : > { %v1453_v61 = vpop.f32.mrf.mxu0  ;;  %v963_v51 = vpop.xlane.xlu0 %962 }
 0x391   : > { %v975_v17 = vsub.f32 %v930_v57, %v963_v51 }
 0x392   : > { %v5039_v45 = vpop.eup %3877 }
 0x393   : > { %6307 = vst [vmem:[#allocation65_spill] sm:$0xff] %v5039_v45  ;;  %v993_v36 = vmul.f32 1.442695, %v975_v17  ;;  %v1018_v48 = vsel %vm936_vm11, %v5039_v45, 0.0 }
 0x394   : > { %1019 = vadd.xlane.f32.xlu1 %v1018_v48 }
 0x395   : > { %3879 = vpow2.f32 %v993_v36  ;;  %v5053_v36 = vmul.f32 13.0, %v4776_v20  ;;  %v5068_v20 = vmul.f32 13.0, %v4798_v47 }
 0x398   : > { %v1456_v19 = vpop.f32.mrf.mxu0  ;;  %v966_v35 = vpop.xlane.xlu2 %965 }
 0x399   : > { %v976_v43 = vsub.f32 %v4999_v59, %v966_v35  ;;  %v5056_v59 = vmul.f32 13.0, %v4778_v23 }
 0x39b   : > { %v5044_v50 = vpop.eup %3879  ;;  %v995_v6 = vmul.f32 1.442695, %v976_v43  ;;  %v5060_v43 = vmul.f32 13.0, %v4783_v29  ;;  %v1476_v29 = vsub.f32 %v5068_v20, %v1456_v19 }
 0x39c   : > { %6308 = vst [vmem:[#allocation66_spill] sm:$0xff] %v5044_v50  ;;  %v1021_v0 = vsel %vm936_vm11, %v5044_v50, 0.0 }
 0x39d   : > { %3881 = vpow2.f32 %v995_v6  ;;  %1022 = vadd.xlane.f32.xlu2 %v1021_v0  ;;  %v5064_v0 = vmul.f32 13.0, %v4788_v38 }
 0x3a0   : > { %v1459_v25 = vpop.f32.mrf.mxu0 }
 0x3a1   : > { %v1477_v23 = vsub.f32 %v5064_v0, %v1459_v25  ;;  %v5085_v25 = vmul.f32 13.0, %v4825_v16  ;;  %v1482_v16 = vmul.f32 0.25, %v4671_v13  ;;  %v1487_v13 = vmul.f32 0.25, %v4653_v5 }
 0x3a3   : > { %v5048_v57 = vpop.eup %3881 }
 0x3a4   : > { %6309 = vst [vmem:[#allocation67_spill] sm:$0xff] %v5048_v57  ;;  %v1024_v51 = vsel %vm936_vm11, %v5048_v57, 0.0 }
 0x3a5   : > { %1025 = vadd.xlane.f32.xlu0 %v1024_v51 }
 0x3a8   : > { %v1462_v46 = vpop.f32.mrf.mxu0 }
 0x3a9   : > { %v1478_v51 = vsub.f32 %v5060_v43, %v1462_v46  ;;  %v5080_v46 = vmul.f32 13.0, %v4818_v3  ;;  %v1481_v3 = vmul.f32 0.25, %v4674_v14  ;;  %v1485_v14 = vmul.f32 0.25, %v4660_v8 }
 0x3aa   : > { %v1490_v8 = vmul.f32 0.25, %v4644_v1 }
 0x3b0   : > { %v1465_v17 = vpop.f32.mrf.mxu0 }
 0x3b1   : > { %v1479_v6 = vsub.f32 %v5056_v59, %v1465_v17  ;;  %v5076_v17 = vmul.f32 13.0, %v4811_v58  ;;  %v5090_v58 = vmul.f32 13.0, %v4832_v40  ;;  %v1483_v40 = vmul.f32 0.25, %v4667_v11 }
 0x3b2   : > { %v1488_v11 = vmul.f32 0.25, %v4650_v4 }
 0x3b3   : > { %v1474_v47 = vsub.f32 %v5076_v17, %v5025_v49  ;;  %v1471_v49 = vsub.f32 %v5090_v58, %v5007_v41  ;;  %v1486_v41 = vmul.f32 0.25, %v4657_v7 }
 0x3b8   : > { %v1468_v48 = vpop.f32.mrf.mxu0 }
 0x3b9   : > { %v1480_v35 = vsub.f32 %v5053_v36, %v1468_v48  ;;  %v5072_v48 = vmul.f32 13.0, %v4804_v53  ;;  %v1473_v53 = vsub.f32 %v5080_v46, %v5019_v62  ;;  %v1484_v62 = vmul.f32 0.25, %v4664_v10 }
 0x3ba   : > { %v1489_v10 = vmul.f32 0.25, %v4646_v2 }
 0x3bb   : > { %1527 = vmatpush.msrb.mxu2 %v1480_v35  ;;  %v1475_v38 = vsub.f32 %v5072_v48, %v1453_v61  ;;  %v1472_v61 = vsub.f32 %v5085_v25, %v5013_v39 }
 0x3bd   : > { %1528 = vmatpush.msrb.mxu2 %v1479_v6 }
 0x3bf   : > { %1529 = vmatpush.msrb.mxu2 %v1478_v51 }
 0x3c1   : > { %1530 = vmatpush.msrb.mxu2 %v1477_v23 }
 0x3c3   : > { %1531 = vmatpush.msrb.mxu2 %v1476_v29 }
 0x3c5   : > { %1532 = vmatpush.msrb.mxu2 %v1475_v38 }
 0x3c7   : > { %1533 = vmatpush.msrb.mxu2 %v1474_v47  ;;  %v6310_v47 = vld [vmem:[#allocation38_spill] sm:$0xff] }
 0x3c9   : > { %1534 = vmatpush.msrb.mxu2 %v1473_v53 }
 0x3cb   : > { %1535 = vmatpush.msrb.mxu2 %v1472_v61  ;;  %v6311_v61 = vld [vmem:[#allocation39_spill] sm:$0xff] }
 0x3cd   : > { %1536 = vmatpush.msrb.mxu2 %v1471_v49  ;;  %v6312_v49 = vld [vmem:[#allocation40_spill] sm:$0xff] }
 0x3ce   : > { %3491 = vmatmul.msk.f32.vlgmr.msrb.gmra.mxu2 %vm736_vm0, %v1481_v3 }
 0x3d6   : > { %3492 = vmatmul.msk.f32.gmra.mxu2 %vm736_vm0, %v1482_v16 }
 0x3de   : > { %3493 = vmatmul.msk.f32.gmra.mxu2 %vm736_vm0, %v1483_v40  ;;  %v6313_v40 = vld [vmem:[#allocation41_spill] sm:$0xff] }
 0x3e6   : > { %3494 = vmatmul.msk.f32.gmra.mxu2 %vm736_vm0, %v1484_v62 }
 0x3ee   : > { %3495 = vmatmul.msk.f32.gmra.mxu2 %vm736_vm0, %v1485_v14  ;;  %v6314_v14 = vld [vmem:[#allocation42_spill] sm:$0xff] }
 0x3f6   : > { %3496 = vmatmul.msk.f32.gmra.mxu2 %vm736_vm0, %v1486_v41 }
 0x3fe   : > { %3497 = vmatmul.msk.f32.gmra.mxu2 %vm736_vm0, %v1487_v13  ;;  %v6315_v13 = vld [vmem:[#allocation43_spill] sm:$0xff] }
 0x406   : > { %3498 = vmatmul.msk.f32.gmra.mxu2 %vm736_vm0, %v1488_v11 }
 0x40e   : > { %3499 = vmatmul.msk.f32.gmra.mxu2 %vm736_vm0, %v1489_v10  ;;  %v6316_v10 = vld [vmem:[#allocation44_spill] sm:$0xff] }
 0x416   : > { %3500 = vmatmul.msk.f32.gmra.mxu2 %vm736_vm0, %v1490_v8 }
 0x451   : > { %v5116_v39 = vpop.f32.mrf.mxu2 }
 0x459   : > { %v5118_v7 = vpop.f32.mrf.mxu2 }
 0x461   : > { %v5120_v19 = vpop.f32.mrf.mxu2 }
 0x469   : > { %v5122_v5 = vpop.f32.mrf.mxu2 }
 0x471   : > { %v5124_v35 = vpop.f32.mrf.mxu2 }
 0x479   : > { %v5126_v4 = vpop.f32.mrf.mxu2 }
 0x481   : > { %v5128_v6 = vpop.f32.mrf.mxu2 }
 0x489   : > { %v5130_v2 = vpop.f32.mrf.mxu2 }
 0x491   : > { %v5132_v51 = vpop.f32.mrf.mxu2 }
 0x499   : > { %v5134_v1 = vpop.f32.mrf.mxu2 }
 0x49a   : > { %1574 = vmatpush.msrb.mxu3 %v5134_v1 }
 0x49c   : > { %1575 = vmatpush.msrb.mxu3 %v5132_v51 }
 0x49e   : > { %1576 = vmatpush.msrb.mxu3 %v5130_v2 }
 0x4a0   : > { %1577 = vmatpush.msrb.mxu3 %v5128_v6 }
 0x4a2   : > { %1578 = vmatpush.msrb.mxu3 %v5126_v4 }
 0x4a4   : > { %1579 = vmatpush.msrb.mxu3 %v5124_v35 }
 0x4a6   : > { %1580 = vmatpush.msrb.mxu3 %v5122_v5 }
 0x4a8   : > { %1581 = vmatpush.msrb.mxu3 %v5120_v19 }
 0x4aa   : > { %1582 = vmatpush.msrb.mxu3 %v5118_v7 }
 0x4ac   : > { %1583 = vmatpush.msrb.mxu3 %v5116_v39 }
 0x4ad   : > { %3501 = vmatmul.msk.f32.vlgmr.msrb.gmra.mxu3 %vm736_vm0, %v4678_v15 }
 0x4b5   : > { %3502 = vmatmul.msk.f32.gmra.mxu3 %vm736_vm0, %v4686_v18 }
 0x4bd   : > { %3503 = vmatmul.msk.f32.gmra.mxu3 %vm736_vm0, %v4693_v21 }
 0x4c5   : > { %3504 = vmatmul.msk.f32.gmra.mxu3 %vm736_vm0, %v4700_v24 }
 0x4cd   : > { %3505 = vmatmul.msk.f32.gmra.mxu3 %vm736_vm0, %v4706_v26 }
 0x4d5   : > { %3506 = vmatmul.msk.f32.gmra.mxu3 %vm736_vm0, %v4712_v28 }
 0x4dd   : > { %3507 = vmatmul.msk.f32.gmra.mxu3 %vm736_vm0, %v4718_v30 }
 0x4e5   : > { %3508 = vmatmul.msk.f32.gmra.mxu3 %vm736_vm0, %v4724_v32 }
 0x4ed   : > { %3509 = vmatmul.msk.f32.gmra.mxu3 %vm736_vm0, %v4729_v33 }
 0x4f5   : > { %3510 = vmatmul.msk.f32.gmra.mxu3 %vm736_vm0, %v4734_v34 }
 0x530   : > { %v5166_v15 = vpop.f32.mrf.mxu3 }
 0x531   : > { %v1615_v8 = vsub.f32 %v6316_v10, %v5166_v15 }
 0x538   : > { %v5168_v18 = vpop.f32.mrf.mxu3 }
 0x539   : > { %v1616_v11 = vsub.f32 %v6315_v13, %v5168_v18 }
 0x540   : > { %v5170_v21 = vpop.f32.mrf.mxu3 }
 0x541   : > { %v1617_v41 = vsub.f32 %v6314_v14, %v5170_v21 }
 0x548   : > { %v5172_v24 = vpop.f32.mrf.mxu3 }
 0x549   : > { %v1618_v62 = vsub.f32 %v6313_v40, %v5172_v24 }
 0x550   : > { %v5174_v26 = vpop.f32.mrf.mxu3 }
 0x551   : > { %v1619_v16 = vsub.f32 %v6312_v49, %v5174_v26 }
 0x558   : > { %v5176_v28 = vpop.f32.mrf.mxu3 }
 0x559   : > { %v1620_v3 = vsub.f32 %v6311_v61, %v5176_v28 }
 0x560   : > { %v5178_v30 = vpop.f32.mrf.mxu3 }
 0x561   : > { %v1621_v53 = vsub.f32 %v6310_v47, %v5178_v30 }
 0x568   : > { %v5180_v32 = vpop.f32.mrf.mxu3 }
 0x569   : > { %v1622_v38 = vsub.f32 %v4791_v42, %v5180_v32 }
 0x570   : > { %v5182_v33 = vpop.f32.mrf.mxu3 }
 0x571   : > { %v1623_v29 = vsub.f32 %v4786_v31, %v5182_v33 }
 0x578   : > { %v5184_v23 = vpop.f32.mrf.mxu3 }
 0x579   : > { %v1624_v34 = vsub.f32 %v4781_v27, %v5184_v23 }
 0x57b   : > { %1661 = vmatpush.msra.mxu1 %v1624_v34 }
 0x57d   : > { %1662 = vmatpush.msra.mxu1 %v1623_v29 }
 0x57f   : > { %1663 = vmatpush.msra.mxu1 %v1622_v38 }
 0x581   : > { %1664 = vmatpush.msra.mxu1 %v1621_v53 }
 0x583   : > { %1665 = vmatpush.msra.mxu1 %v1620_v3 }
 0x585   : > { %1666 = vmatpush.msra.mxu1 %v1619_v16 }
 0x587   : > { %1667 = vmatpush.msra.mxu1 %v1618_v62 }
 0x589   : > { %1668 = vmatpush.msra.mxu1 %v1617_v41 }
 0x58b   : > { %1669 = vmatpush.msra.mxu1 %v1616_v11 }
 0x58d   : > { %1670 = vmatpush.msra.mxu1 %v1615_v8 }
 0x58e   : > { %3511 = vmatmul.msk.f32.vlgmr.msra.gmra.mxu1 %vm736_vm0, %v5166_v15 }
 0x596   : > { %3512 = vmatmul.msk.f32.gmra.mxu1 %vm736_vm0, %v5168_v18 }
 0x59e   : > { %3513 = vmatmul.msk.f32.gmra.mxu1 %vm736_vm0, %v5170_v21 }
 0x5a6   : > { %3514 = vmatmul.msk.f32.gmra.mxu1 %vm736_vm0, %v5172_v24 }
 0x5ae   : > { %3515 = vmatmul.msk.f32.gmra.mxu1 %vm736_vm0, %v5174_v26 }
 0x5b6   : > { %3516 = vmatmul.msk.f32.gmra.mxu1 %vm736_vm0, %v5176_v28 }
 0x5be   : > { %3517 = vmatmul.msk.f32.gmra.mxu1 %vm736_vm0, %v5178_v30 }
 0x5c6   : > { %3518 = vmatmul.msk.f32.gmra.mxu1 %vm736_vm0, %v5180_v32 }
 0x5ce   : > { %3519 = vmatmul.msk.f32.gmra.mxu1 %vm736_vm0, %v5182_v33 }
 0x5d6   : > { %3520 = vmatmul.msk.f32.gmra.mxu1 %vm736_vm0, %v5184_v23 }
 0x60b   : > { %v1672_v34 = vpop.f32.mrf.mxu1 }
 0x613   : > { %v1675_v29 = vpop.f32.mrf.mxu1 }
 0x61b   : > { %v1678_v38 = vpop.f32.mrf.mxu1 }
 0x623   : > { %v1681_v53 = vpop.f32.mrf.mxu1 }
 0x624   : > { %v1705_v13 = vsub.f32 %v4950_v60, %v1681_v53 }
 0x62b   : > { %v1684_v3 = vpop.f32.mrf.mxu1 }
 0x62c   : > { %v1706_v10 = vsub.f32 %v4946_v55, %v1684_v3 }
 0x633   : > { %v1687_v16 = vpop.f32.mrf.mxu1 }
 0x634   : > { %v1707_v52 = vsub.f32 %v4942_v56, %v1687_v16  ;;  %v1769_v16 = vmul.f32 0.25, %v5116_v39  ;;  %v1774_v39 = vmul.f32 0.25, %v5126_v4 }
 0x63b   : > { %v1690_v62 = vpop.f32.mrf.mxu1 }
 0x63c   : > { %v1708_v63 = vsub.f32 %v4938_v37, %v1690_v62  ;;  %v1770_v62 = vmul.f32 0.25, %v5118_v7  ;;  %v1775_v7 = vmul.f32 0.25, %v5128_v6 }
 0x643   : > { %v1693_v41 = vpop.f32.mrf.mxu1 }
 0x644   : > { %v1709_v45 = vsub.f32 %v4934_v12, %v1693_v41  ;;  %v6317_v41 = vld [vmem:[#allocation55_spill] sm:$0xff] }
 0x64b   : > { %v1696_v11 = vpop.f32.mrf.mxu1 }
 0x64c   : > { %v1710_v50 = vsub.f32 %v4930_v9, %v1696_v11  ;;  %v1771_v11 = vmul.f32 0.25, %v5120_v19  ;;  %v1776_v19 = vmul.f32 0.25, %v5130_v2 }
 0x653   : > { %v1699_v8 = vpop.f32.mrf.mxu1 }
 0x654   : > { %v1711_v57 = vsub.f32 %v4927_v54, %v1699_v8  ;;  %v1704_v8 = vsub.f32 %v4954_v22, %v1678_v38 }
 0x656   : > { %1718 = vmatpush.msra.mxu0 %v1711_v57  ;;  %v1703_v57 = vsub.f32 %v4958_v44, %v1675_v29 }
 0x658   : > { %1719 = vmatpush.msra.mxu0 %v1710_v50  ;;  %v1702_v50 = vsub.f32 %v6317_v41, %v1672_v34 }
 0x65a   : > { %1720 = vmatpush.msra.mxu0 %v1709_v45 }
 0x65c   : > { %1721 = vmatpush.msra.mxu0 %v1708_v63 }
 0x65e   : > { %1722 = vmatpush.msra.mxu0 %v1707_v52 }
 0x660   : > { %1723 = vmatpush.msra.mxu0 %v1706_v10 }
 0x662   : > { %1724 = vmatpush.msra.mxu0 %v1705_v13 }
 0x664   : > { %1725 = vmatpush.msra.mxu0 %v1704_v8  ;;  %v1772_v8 = vmul.f32 0.25, %v5122_v5  ;;  %v1777_v5 = vmul.f32 0.25, %v5132_v51 }
 0x666   : > { %1726 = vmatpush.msra.mxu0 %v1703_v57  ;;  %v1773_v57 = vmul.f32 0.25, %v5124_v35  ;;  %v1778_v35 = vmul.f32 0.25, %v5134_v1 }
 0x668   : > { %1727 = vmatpush.msra.mxu0 %v1702_v50 }
 0x669   : > { %3521 = vmatmul.msk.f32.vlgmr.msra.gmra.mxu0 %vm736_vm0, %v5166_v15 }
 0x671   : > { %3522 = vmatmul.msk.f32.gmra.mxu0 %vm736_vm0, %v5168_v18 }
 0x679   : > { %3523 = vmatmul.msk.f32.gmra.mxu0 %vm736_vm0, %v5170_v21 }
 0x681   : > { %3524 = vmatmul.msk.f32.gmra.mxu0 %vm736_vm0, %v5172_v24 }
 0x689   : > { %3525 = vmatmul.msk.f32.gmra.mxu0 %vm736_vm0, %v5174_v26 }
 0x691   : > { %3526 = vmatmul.msk.f32.gmra.mxu0 %vm736_vm0, %v5176_v28 }
 0x699   : > { %3527 = vmatmul.msk.f32.gmra.mxu0 %vm736_vm0, %v5178_v30 }
 0x6a1   : > { %3528 = vmatmul.msk.f32.gmra.mxu0 %vm736_vm0, %v5180_v32 }
 0x6a9   : > { %3529 = vmatmul.msk.f32.gmra.mxu0 %vm736_vm0, %v5182_v33 }
 0x6b1   : > { %3530 = vmatmul.msk.f32.gmra.mxu0 %vm736_vm0, %v5184_v23 }
 0x6e6   : > { %v1729_v45 = vpop.f32.mrf.mxu0 }
 0x6e7   : > { %v1759_v3 = vsub.f32 %v5090_v58, %v1729_v45 }
 0x6ee   : > { %v1732_v52 = vpop.f32.mrf.mxu0 }
 0x6ef   : > { %v1760_v53 = vsub.f32 %v5085_v25, %v1732_v52 }
 0x6f6   : > { %v1735_v63 = vpop.f32.mrf.mxu0 }
 0x6f7   : > { %v1761_v38 = vsub.f32 %v5080_v46, %v1735_v63 }
 0x6fe   : > { %v1738_v15 = vpop.f32.mrf.mxu0 }
 0x6ff   : > { %v1762_v29 = vsub.f32 %v5076_v17, %v1738_v15 }
 0x706   : > { %v1741_v18 = vpop.f32.mrf.mxu0 }
 0x707   : > { %v1763_v34 = vsub.f32 %v5072_v48, %v1741_v18  ;;  %v5317_v18 = vld [vmem:[%s4633_s29] sm:$0xff] }
 0x70e   : > { %v1744_v21 = vpop.f32.mrf.mxu0 }
 0x70f   : > { %v1764_v10 = vsub.f32 %v5068_v20, %v1744_v21  ;;  %v5322_v21 = vld [vmem:[%s4633_s29 + $0x8] sm:$0xff] }
 0x716   : > { %v1747_v24 = vpop.f32.mrf.mxu0 }
 0x717   : > { %v1765_v23 = vsub.f32 %v5064_v0, %v1747_v24  ;;  %v5327_v24 = vld [vmem:[%s4633_s29 + $0x10] sm:$0xff] }
 0x71e   : > { %v1750_v26 = vpop.f32.mrf.mxu0 }
 0x71f   : > { %v1766_v33 = vsub.f32 %v5060_v43, %v1750_v26  ;;  %v5332_v26 = vld [vmem:[%s4633_s29 + $0x18] sm:$0xff] }
 0x726   : > { %v1753_v28 = vpop.f32.mrf.mxu0 }
 0x727   : > { %v1767_v32 = vsub.f32 %v5056_v59, %v1753_v28  ;;  %v5337_v28 = vld [vmem:[%s4633_s29 + $0x20] sm:$0xff] }
 0x72e   : > { %v1756_v13 = vpop.f32.mrf.mxu0 }
 0x72f   : > { %v1768_v30 = vsub.f32 %v5053_v36, %v1756_v13  ;;  %v5342_v13 = vld [vmem:[%s4633_s29 + $0x28] sm:$0xff] }
 0x731   : > { %1815 = vmatpush.msra.mxu2 %v1768_v30  ;;  %v5347_v30 = vld [vmem:[%s4633_s29 + $0x30] sm:$0xff] }
 0x733   : > { %1816 = vmatpush.msra.mxu2 %v1767_v32  ;;  %v5352_v32 = vld [vmem:[%s4633_s29 + $0x38] sm:$0xff] }
 0x734   : > { %6318 = vst [vmem:[#allocation55_spill] sm:$0xff] %v5352_v32 }
 0x735   : > { %1817 = vmatpush.msra.mxu2 %v1766_v33  ;;  %v5357_v33 = vld [vmem:[%s4633_s29 + $0x40] sm:$0xff] }
 0x736   : > { %6319 = vst [vmem:[#allocation68_spill] sm:$0xff] %v5357_v33 }
 0x737   : > { %1818 = vmatpush.msra.mxu2 %v1765_v23  ;;  %v5362_v23 = vld [vmem:[%s4633_s29 + $0x48] sm:$0xff] }
 0x738   : > { %6320 = vst [vmem:[#allocation69_spill] sm:$0xff] %v5362_v23 }
 0x739   : > { %1819 = vmatpush.msra.mxu2 %v1764_v10 }
 0x73b   : > { %1820 = vmatpush.msra.mxu2 %v1763_v34 }
 0x73d   : > { %1821 = vmatpush.msra.mxu2 %v1762_v29 }
 0x73f   : > { %1822 = vmatpush.msra.mxu2 %v1761_v38 }
 0x741   : > { %1823 = vmatpush.msra.mxu2 %v1760_v53 }
 0x743   : > { %1824 = vmatpush.msra.mxu2 %v1759_v3 }
 0x744   : > { %3531 = vmatmul.msk.f32.vlgmr.msra.gmra.mxu2 %vm736_vm0, %v1769_v16 }
 0x74c   : > { %3532 = vmatmul.msk.f32.gmra.mxu2 %vm736_vm0, %v1770_v62 }
 0x754   : > { %3533 = vmatmul.msk.f32.gmra.mxu2 %vm736_vm0, %v1771_v11 }
 0x75c   : > { %3534 = vmatmul.msk.f32.gmra.mxu2 %vm736_vm0, %v1772_v8 }
 0x764   : > { %3535 = vmatmul.msk.f32.gmra.mxu2 %vm736_vm0, %v1773_v57 }
 0x76c   : > { %3536 = vmatmul.msk.f32.gmra.mxu2 %vm736_vm0, %v1774_v39 }
 0x774   : > { %3537 = vmatmul.msk.f32.gmra.mxu2 %vm736_vm0, %v1775_v7 }
 0x77c   : > { %3538 = vmatmul.msk.f32.gmra.mxu2 %vm736_vm0, %v1776_v19 }
 0x784   : > { %3539 = vmatmul.msk.f32.gmra.mxu2 %vm736_vm0, %v1777_v5 }
 0x78c   : > { %3540 = vmatmul.msk.f32.gmra.mxu2 %vm736_vm0, %v1778_v35 }
 0x7c7   : > { %v5286_v50 = vpop.f32.mrf.mxu2 }
 0x7cf   : > { %v5288_v4 = vpop.f32.mrf.mxu2 }
 0x7d7   : > { %v5290_v45 = vpop.f32.mrf.mxu2 }
 0x7df   : > { %v5292_v6 = vpop.f32.mrf.mxu2 }
 0x7e7   : > { %v5294_v52 = vpop.f32.mrf.mxu2 }
 0x7ef   : > { %v5296_v2 = vpop.f32.mrf.mxu2 }
 0x7f7   : > { %v5298_v51 = vpop.f32.mrf.mxu2 }
 0x7ff   : > { %v5300_v63 = vpop.f32.mrf.mxu2 }
 0x807   : > { %v5302_v1 = vpop.f32.mrf.mxu2 }
 0x80f   : > { %v5304_v15 = vpop.f32.mrf.mxu2 }
 0x810   : > { %1862 = vmatpush.msra.mxu3 %v5304_v15 }
 0x812   : > { %1863 = vmatpush.msra.mxu3 %v5302_v1 }
 0x814   : > { %1864 = vmatpush.msra.mxu3 %v5300_v63 }
 0x816   : > { %1865 = vmatpush.msra.mxu3 %v5298_v51 }
 0x818   : > { %1866 = vmatpush.msra.mxu3 %v5296_v2 }
 0x81a   : > { %1867 = vmatpush.msra.mxu3 %v5294_v52 }
 0x81c   : > { %1868 = vmatpush.msra.mxu3 %v5292_v6 }
 0x81e   : > { %1869 = vmatpush.msra.mxu3 %v5290_v45 }
 0x820   : > { %1870 = vmatpush.msra.mxu3 %v5288_v4 }
 0x822   : > { %1871 = vmatpush.msra.mxu3 %v5286_v50 }
 0x823   : > { %3541 = vmatmul.msk.f32.vlgmr.msra.gmra.mxu3 %vm736_vm0, %v5317_v18 }
 0x82b   : > { %3542 = vmatmul.msk.f32.gmra.mxu3 %vm736_vm0, %v5322_v21 }
 0x833   : > { %3543 = vmatmul.msk.f32.gmra.mxu3 %vm736_vm0, %v5327_v24 }
 0x83b   : > { %3544 = vmatmul.msk.f32.gmra.mxu3 %vm736_vm0, %v5332_v26 }
 0x843   : > { %3545 = vmatmul.msk.f32.gmra.mxu3 %vm736_vm0, %v5337_v28 }
 0x84b   : > { %3546 = vmatmul.msk.f32.gmra.mxu3 %vm736_vm0, %v5342_v13 }
 0x853   : > { %3547 = vmatmul.msk.f32.gmra.mxu3 %vm736_vm0, %v5347_v30 }
 0x85b   : > { %3548 = vmatmul.msk.f32.gmra.mxu3 %vm736_vm0, %v5352_v32 }
 0x863   : > { %3549 = vmatmul.msk.f32.gmra.mxu3 %vm736_vm0, %v5357_v33 }
 0x86b   : > { %3550 = vmatmul.msk.f32.gmra.mxu3 %vm736_vm0, %v5362_v23 }
 0x8a6   : > { %v5366_v10 = vpop.f32.mrf.mxu3 }
 0x8ae   : > { %v5368_v34 = vpop.f32.mrf.mxu3 }
 0x8b6   : > { %v5370_v29 = vpop.f32.mrf.mxu3 }
 0x8be   : > { %v5372_v38 = vpop.f32.mrf.mxu3 }
 0x8c6   : > { %v5374_v53 = vpop.f32.mrf.mxu3 }
 0x8c7   : > { %v1907_v35 = vsub.f32 %v6312_v49, %v5374_v53 }
 0x8ce   : > { %v5376_v3 = vpop.f32.mrf.mxu3 }
 0x8cf   : > { %v1908_v5 = vsub.f32 %v6311_v61, %v5376_v3 }
 0x8d6   : > { %v5378_v16 = vpop.f32.mrf.mxu3 }
 0x8d7   : > { %v1909_v19 = vsub.f32 %v6310_v47, %v5378_v16 }
 0x8de   : > { %v5380_v62 = vpop.f32.mrf.mxu3 }
 0x8df   : > { %v1910_v7 = vsub.f32 %v4791_v42, %v5380_v62 }
 0x8e6   : > { %v5382_v11 = vpop.f32.mrf.mxu3 }
 0x8e7   : > { %v1911_v39 = vsub.f32 %v4786_v31, %v5382_v11 }
 0x8ee   : > { %v5384_v8 = vpop.f32.mrf.mxu3 }
 0x8ef   : > { %v1912_v57 = vsub.f32 %v4781_v27, %v5384_v8 }
 0x8f1   : > { %1949 = vmatpush.msrb.mxu1 %v1912_v57  ;;  %v1906_v57 = vsub.f32 %v6313_v40, %v5372_v38 }
 0x8f3   : > { %1950 = vmatpush.msrb.mxu1 %v1911_v39  ;;  %v1905_v39 = vsub.f32 %v6314_v14, %v5370_v29 }
 0x8f5   : > { %1951 = vmatpush.msrb.mxu1 %v1910_v7  ;;  %v6321_v7 = vld [vmem:[#allocation43_spill] sm:$0xff] }
 0x8f6   : > { %v1904_v47 = vsub.f32 %v6321_v7, %v5368_v34 }
 0x8f7   : > { %1952 = vmatpush.msrb.mxu1 %v1909_v19  ;;  %v6322_v19 = vld [vmem:[#allocation44_spill] sm:$0xff] }
 0x8f8   : > { %v1903_v61 = vsub.f32 %v6322_v19, %v5366_v10 }
 0x8f9   : > { %1953 = vmatpush.msrb.mxu1 %v1908_v5 }
 0x8fb   : > { %1954 = vmatpush.msrb.mxu1 %v1907_v35 }
 0x8fd   : > { %1955 = vmatpush.msrb.mxu1 %v1906_v57 }
 0x8ff   : > { %1956 = vmatpush.msrb.mxu1 %v1905_v39 }
 0x901   : > { %1957 = vmatpush.msrb.mxu1 %v1904_v47 }
 0x903   : > { %1958 = vmatpush.msrb.mxu1 %v1903_v61 }
 0x904   : > { %3551 = vmatmul.msk.f32.vlgmr.msrb.gmra.mxu1 %vm736_vm0, %v5366_v10 }
 0x90c   : > { %3552 = vmatmul.msk.f32.gmra.mxu1 %vm736_vm0, %v5368_v34 }
 0x914   : > { %3553 = vmatmul.msk.f32.gmra.mxu1 %vm736_vm0, %v5370_v29 }
 0x91c   : > { %3554 = vmatmul.msk.f32.gmra.mxu1 %vm736_vm0, %v5372_v38 }
 0x924   : > { %3555 = vmatmul.msk.f32.gmra.mxu1 %vm736_vm0, %v5374_v53 }
 0x92c   : > { %3556 = vmatmul.msk.f32.gmra.mxu1 %vm736_vm0, %v5376_v3 }
 0x934   : > { %3557 = vmatmul.msk.f32.gmra.mxu1 %vm736_vm0, %v5378_v16 }
 0x93c   : > { %3558 = vmatmul.msk.f32.gmra.mxu1 %vm736_vm0, %v5380_v62 }
 0x944   : > { %3559 = vmatmul.msk.f32.gmra.mxu1 %vm736_vm0, %v5382_v11 }
 0x94c   : > { %3560 = vmatmul.msk.f32.gmra.mxu1 %vm736_vm0, %v5384_v8 }
 0x981   : > { %v1960_v47 = vpop.f32.mrf.mxu1 }
 0x989   : > { %v1963_v61 = vpop.f32.mrf.mxu1 }
 0x991   : > { %v1966_v5 = vpop.f32.mrf.mxu1 }
 0x999   : > { %v1969_v35 = vpop.f32.mrf.mxu1 }
 0x99a   : > { %v1993_v32 = vsub.f32 %v4950_v60, %v1969_v35  ;;  %v2058_v35 = vmul.f32 0.25, %v5288_v4  ;;  %v2063_v4 = vmul.f32 0.25, %v5298_v51 }
 0x9a1   : > { %v1972_v57 = vpop.f32.mrf.mxu1 }
 0x9a2   : > { %v1994_v33 = vsub.f32 %v4946_v55, %v1972_v57  ;;  %v2059_v57 = vmul.f32 0.25, %v5290_v45  ;;  %v2064_v45 = vmul.f32 0.25, %v5300_v63 }
 0x9a9   : > { %v1975_v39 = vpop.f32.mrf.mxu1 }
 0x9aa   : > { %v1995_v23 = vsub.f32 %v4942_v56, %v1975_v39  ;;  %v2060_v39 = vmul.f32 0.25, %v5292_v6  ;;  %v2065_v6 = vmul.f32 0.25, %v5302_v1 }
 0x9b1   : > { %v1978_v19 = vpop.f32.mrf.mxu1 }
 0x9b2   : > { %v1996_v27 = vsub.f32 %v4938_v37, %v1978_v19 }
 0x9b9   : > { %v1981_v7 = vpop.f32.mrf.mxu1 }
 0x9ba   : > { %v1997_v31 = vsub.f32 %v4934_v12, %v1981_v7 }
 0x9c1   : > { %v1984_v14 = vpop.f32.mrf.mxu1 }
 0x9c2   : > { %v1998_v42 = vsub.f32 %v4930_v9, %v1984_v14 }
 0x9c9   : > { %v1987_v40 = vpop.f32.mrf.mxu1 }
 0x9ca   : > { %v1999_v49 = vsub.f32 %v4927_v54, %v1987_v40  ;;  %v1992_v40 = vsub.f32 %v4954_v22, %v1966_v5  ;;  %v2057_v5 = vmul.f32 0.25, %v5286_v50  ;;  %v2062_v50 = vmul.f32 0.25, %v5296_v2 }
 0x9cc   : > { %2006 = vmatpush.msrb.mxu0 %v1999_v49  ;;  %v1991_v49 = vsub.f32 %v4958_v44, %v1963_v61 }
 0x9ce   : > { %2007 = vmatpush.msrb.mxu0 %v1998_v42  ;;  %v1990_v42 = vsub.f32 %v6317_v41, %v1960_v47 }
 0x9d0   : > { %2008 = vmatpush.msrb.mxu0 %v1997_v31 }
 0x9d2   : > { %2009 = vmatpush.msrb.mxu0 %v1996_v27 }
 0x9d4   : > { %2010 = vmatpush.msrb.mxu0 %v1995_v23 }
 0x9d6   : > { %2011 = vmatpush.msrb.mxu0 %v1994_v33 }
 0x9d8   : > { %2012 = vmatpush.msrb.mxu0 %v1993_v32 }
 0x9da   : > { %2013 = vmatpush.msrb.mxu0 %v1992_v40  ;;  %v2061_v40 = vmul.f32 0.25, %v5294_v52  ;;  %v2066_v52 = vmul.f32 0.25, %v5304_v15 }
 0x9dc   : > { %2014 = vmatpush.msrb.mxu0 %v1991_v49 }
 0x9de   : > { %2015 = vmatpush.msrb.mxu0 %v1990_v42 }
 0x9df   : > { %3561 = vmatmul.msk.f32.vlgmr.msrb.gmra.mxu0 %vm736_vm0, %v5366_v10 }
 0x9e7   : > { %3562 = vmatmul.msk.f32.gmra.mxu0 %vm736_vm0, %v5368_v34 }
 0x9ef   : > { %3563 = vmatmul.msk.f32.gmra.mxu0 %vm736_vm0, %v5370_v29 }
 0x9f7   : > { %3564 = vmatmul.msk.f32.gmra.mxu0 %vm736_vm0, %v5372_v38 }
 0x9ff   : > { %3565 = vmatmul.msk.f32.gmra.mxu0 %vm736_vm0, %v5374_v53 }
 0xa07   : > { %3566 = vmatmul.msk.f32.gmra.mxu0 %vm736_vm0, %v5376_v3 }
 0xa0f   : > { %3567 = vmatmul.msk.f32.gmra.mxu0 %vm736_vm0, %v5378_v16 }
 0xa17   : > { %3568 = vmatmul.msk.f32.gmra.mxu0 %vm736_vm0, %v5380_v62 }
 0xa1f   : > { %3569 = vmatmul.msk.f32.gmra.mxu0 %vm736_vm0, %v5382_v11 }
 0xa27   : > { %3570 = vmatmul.msk.f32.gmra.mxu0 %vm736_vm0, %v5384_v8 }
 0xa5c   : > { %v2017_v27 = vpop.f32.mrf.mxu0 }
 0xa5d   : > { %v2047_v61 = vsub.f32 %v5090_v58, %v2017_v27 }
 0xa64   : > { %v2020_v31 = vpop.f32.mrf.mxu0 }
 0xa65   : > { %v2048_v47 = vsub.f32 %v5085_v25, %v2020_v31 }
 0xa6c   : > { %v2023_v14 = vpop.f32.mrf.mxu0 }
 0xa6d   : > { %v2049_v19 = vsub.f32 %v5080_v46, %v2023_v14 }
 0xa74   : > { %v2026_v32 = vpop.f32.mrf.mxu0 }
 0xa75   : > { %v2050_v7 = vsub.f32 %v5076_v17, %v2026_v32  ;;  %v6323_v32 = vld [vmem:[#allocation55_spill] sm:$0xff] }
 0xa7c   : > { %v2029_v33 = vpop.f32.mrf.mxu0 }
 0xa7d   : > { %v2051_v8 = vsub.f32 %v5072_v48, %v2029_v33  ;;  %v6324_v33 = vld [vmem:[#allocation68_spill] sm:$0xff] }
 0xa84   : > { %v2032_v23 = vpop.f32.mrf.mxu0 }
 0xa85   : > { %v2052_v11 = vsub.f32 %v5068_v20, %v2032_v23  ;;  %v6325_v23 = vld [vmem:[#allocation69_spill] sm:$0xff] }
 0xa8c   : > { %v2035_v10 = vpop.f32.mrf.mxu0 }
 0xa8d   : > { %v2053_v62 = vsub.f32 %v5064_v0, %v2035_v10 }
 0xa94   : > { %v2038_v34 = vpop.f32.mrf.mxu0 }
 0xa95   : > { %v2054_v16 = vsub.f32 %v5060_v43, %v2038_v34 }
 0xa9c   : > { %v2041_v29 = vpop.f32.mrf.mxu0 }
 0xa9d   : > { %v2055_v3 = vsub.f32 %v5056_v59, %v2041_v29 }
 0xaa4   : > { %v2044_v38 = vpop.f32.mrf.mxu0 }
 0xaa5   : > { %v2056_v53 = vsub.f32 %v5053_v36, %v2044_v38 }
 0xaa7   : > { %2103 = vmatpush.msrb.mxu2 %v2056_v53 }
 0xaa9   : > { %2104 = vmatpush.msrb.mxu2 %v2055_v3 }
 0xaab   : > { %2105 = vmatpush.msrb.mxu2 %v2054_v16 }
 0xaad   : > { %2106 = vmatpush.msrb.mxu2 %v2053_v62 }
 0xaaf   : > { %2107 = vmatpush.msrb.mxu2 %v2052_v11 }
 0xab1   : > { %2108 = vmatpush.msrb.mxu2 %v2051_v8 }
 0xab3   : > { %2109 = vmatpush.msrb.mxu2 %v2050_v7  ;;  %v6326_v7 = vld [vmem:[#allocation35_spill] sm:$0xff] }
 0xab5   : > { %2110 = vmatpush.msrb.mxu2 %v2049_v19 }
 0xab7   : > { %2111 = vmatpush.msrb.mxu2 %v2048_v47  ;;  %v6327_v47 = vld [vmem:[#allocation36_spill] sm:$0xff] }
 0xab9   : > { %2112 = vmatpush.msrb.mxu2 %v2047_v61 }
 0xaba   : > { %3571 = vmatmul.msk.f32.vlgmr.msrb.gmra.mxu2 %vm736_vm0, %v2057_v5  ;;  %v6328_v5 = vld [vmem:[#allocation37_spill] sm:$0xff] }
 0xac2   : > { %3572 = vmatmul.msk.f32.gmra.mxu2 %vm736_vm0, %v2058_v35 }
 0xaca   : > { %3573 = vmatmul.msk.f32.gmra.mxu2 %vm736_vm0, %v2059_v57  ;;  %v6329_v57 = vld [vmem:[#allocation38_spill] sm:$0xff] }
 0xad2   : > { %3574 = vmatmul.msk.f32.gmra.mxu2 %vm736_vm0, %v2060_v39 }
 0xada   : > { %3575 = vmatmul.msk.f32.gmra.mxu2 %vm736_vm0, %v2061_v40  ;;  %v6330_v40 = vld [vmem:[#allocation39_spill] sm:$0xff] }
 0xae2   : > { %3576 = vmatmul.msk.f32.gmra.mxu2 %vm736_vm0, %v2062_v50 }
 0xaea   : > { %3577 = vmatmul.msk.f32.gmra.mxu2 %vm736_vm0, %v2063_v4  ;;  %v6331_v4 = vld [vmem:[#allocation40_spill] sm:$0xff] }
 0xaf2   : > { %3578 = vmatmul.msk.f32.gmra.mxu2 %vm736_vm0, %v2064_v45 }
 0xafa   : > { %3579 = vmatmul.msk.f32.gmra.mxu2 %vm736_vm0, %v2065_v6  ;;  %v6332_v6 = vld [vmem:[#allocation41_spill] sm:$0xff] }
 0xb02   : > { %3580 = vmatmul.msk.f32.gmra.mxu2 %vm736_vm0, %v2066_v52 }
 0xb3d   : > { %v5486_v49 = vpop.f32.mrf.mxu2 }
 0xb45   : > { %v5488_v2 = vpop.f32.mrf.mxu2 }
 0xb4d   : > { %v5490_v42 = vpop.f32.mrf.mxu2 }
 0xb55   : > { %v5492_v51 = vpop.f32.mrf.mxu2 }
 0xb5d   : > { %v5494_v27 = vpop.f32.mrf.mxu2 }
 0xb65   : > { %v5496_v63 = vpop.f32.mrf.mxu2 }
 0xb6d   : > { %v5498_v31 = vpop.f32.mrf.mxu2 }
 0xb75   : > { %v5500_v1 = vpop.f32.mrf.mxu2 }
 0xb7d   : > { %v5502_v14 = vpop.f32.mrf.mxu2 }
 0xb85   : > { %v5504_v15 = vpop.f32.mrf.mxu2 }
 0xb86   : > { %2150 = vmatpush.msrb.mxu3 %v5504_v15 }
 0xb88   : > { %2151 = vmatpush.msrb.mxu3 %v5502_v14 }
 0xb8a   : > { %2152 = vmatpush.msrb.mxu3 %v5500_v1 }
 0xb8c   : > { %2153 = vmatpush.msrb.mxu3 %v5498_v31 }
 0xb8e   : > { %2154 = vmatpush.msrb.mxu3 %v5496_v63 }
 0xb90   : > { %2155 = vmatpush.msrb.mxu3 %v5494_v27 }
 0xb92   : > { %2156 = vmatpush.msrb.mxu3 %v5492_v51 }
 0xb94   : > { %2157 = vmatpush.msrb.mxu3 %v5490_v42 }
 0xb96   : > { %2158 = vmatpush.msrb.mxu3 %v5488_v2 }
 0xb98   : > { %2159 = vmatpush.msrb.mxu3 %v5486_v49 }
 0xb99   : > { %3581 = vmatmul.msk.f32.vlgmr.msrb.gmra.mxu3 %vm736_vm0, %v5317_v18 }
 0xba1   : > { %3582 = vmatmul.msk.f32.gmra.mxu3 %vm736_vm0, %v5322_v21 }
 0xba9   : > { %3583 = vmatmul.msk.f32.gmra.mxu3 %vm736_vm0, %v5327_v24 }
 0xbb1   : > { %3584 = vmatmul.msk.f32.gmra.mxu3 %vm736_vm0, %v5332_v26 }
 0xbb9   : > { %3585 = vmatmul.msk.f32.gmra.mxu3 %vm736_vm0, %v5337_v28 }
 0xbc1   : > { %3586 = vmatmul.msk.f32.gmra.mxu3 %vm736_vm0, %v5342_v13 }
 0xbc9   : > { %3587 = vmatmul.msk.f32.gmra.mxu3 %vm736_vm0, %v5347_v30 }
 0xbd1   : > { %3588 = vmatmul.msk.f32.gmra.mxu3 %vm736_vm0, %v6323_v32 }
 0xbd9   : > { %3589 = vmatmul.msk.f32.gmra.mxu3 %vm736_vm0, %v6324_v33 }
 0xbe1   : > { %3590 = vmatmul.msk.f32.gmra.mxu3 %vm736_vm0, %v6325_v23 }
 0xc1c   : > { %v5536_v10 = vpop.f32.mrf.mxu3 }
 0xc24   : > { %v5538_v34 = vpop.f32.mrf.mxu3 }
 0xc2c   : > { %v5540_v29 = vpop.f32.mrf.mxu3 }
 0xc34   : > { %v5542_v38 = vpop.f32.mrf.mxu3 }
 0xc35   : > { %v2194_v52 = vsub.f32 %v6332_v6, %v5542_v38 }
 0xc3c   : > { %v5544_v53 = vpop.f32.mrf.mxu3 }
 0xc3d   : > { %v2195_v45 = vsub.f32 %v6331_v4, %v5544_v53 }
 0xc44   : > { %v5546_v3 = vpop.f32.mrf.mxu3 }
 0xc45   : > { %v2196_v50 = vsub.f32 %v6330_v40, %v5546_v3 }
 0xc4c   : > { %v5548_v16 = vpop.f32.mrf.mxu3 }
 0xc4d   : > { %v2197_v39 = vsub.f32 %v6329_v57, %v5548_v16 }
 0xc54   : > { %v5550_v62 = vpop.f32.mrf.mxu3 }
 0xc55   : > { %v2198_v35 = vsub.f32 %v6328_v5, %v5550_v62 }
 0xc5c   : > { %v5552_v11 = vpop.f32.mrf.mxu3 }
 0xc5d   : > { %v2199_v61 = vsub.f32 %v6327_v47, %v5552_v11 }
 0xc64   : > { %v5554_v8 = vpop.f32.mrf.mxu3 }
 0xc65   : > { %v2200_v19 = vsub.f32 %v6326_v7, %v5554_v8 }
 0xc67   : > { %2237 = vmatpush.msra.mxu1 %v2200_v19  ;;  %v6333_v19 = vld [vmem:[#allocation42_spill] sm:$0xff] }
 0xc69   : > { %2238 = vmatpush.msra.mxu1 %v2199_v61  ;;  %v2193_v61 = vsub.f32 %v6333_v19, %v5540_v29 }
 0xc6b   : > { %2239 = vmatpush.msra.mxu1 %v2198_v35  ;;  %v6334_v35 = vld [vmem:[#allocation43_spill] sm:$0xff] }
 0xc6c   : > { %v2192_v57 = vsub.f32 %v6334_v35, %v5538_v34 }
 0xc6d   : > { %2240 = vmatpush.msra.mxu1 %v2197_v39  ;;  %v6335_v39 = vld [vmem:[#allocation44_spill] sm:$0xff] }
 0xc6e   : > { %v2191_v40 = vsub.f32 %v6335_v39, %v5536_v10 }
 0xc6f   : > { %2241 = vmatpush.msra.mxu1 %v2196_v50 }
 0xc71   : > { %2242 = vmatpush.msra.mxu1 %v2195_v45 }
 0xc73   : > { %2243 = vmatpush.msra.mxu1 %v2194_v52 }
 0xc75   : > { %2244 = vmatpush.msra.mxu1 %v2193_v61 }
 0xc77   : > { %2245 = vmatpush.msra.mxu1 %v2192_v57 }
 0xc79   : > { %2246 = vmatpush.msra.mxu1 %v2191_v40 }
 0xc7a   : > { %3591 = vmatmul.msk.f32.vlgmr.msra.gmra.mxu1 %vm736_vm0, %v5536_v10 }
 0xc82   : > { %3592 = vmatmul.msk.f32.gmra.mxu1 %vm736_vm0, %v5538_v34 }
 0xc8a   : > { %3593 = vmatmul.msk.f32.gmra.mxu1 %vm736_vm0, %v5540_v29 }
 0xc92   : > { %3594 = vmatmul.msk.f32.gmra.mxu1 %vm736_vm0, %v5542_v38 }
 0xc9a   : > { %3595 = vmatmul.msk.f32.gmra.mxu1 %vm736_vm0, %v5544_v53 }
 0xca2   : > { %3596 = vmatmul.msk.f32.gmra.mxu1 %vm736_vm0, %v5546_v3 }
 0xcaa   : > { %3597 = vmatmul.msk.f32.gmra.mxu1 %vm736_vm0, %v5548_v16 }
 0xcb2   : > { %3598 = vmatmul.msk.f32.gmra.mxu1 %vm736_vm0, %v5550_v62 }
 0xcba   : > { %3599 = vmatmul.msk.f32.gmra.mxu1 %vm736_vm0, %v5552_v11 }
 0xcc2   : > { %3600 = vmatmul.msk.f32.gmra.mxu1 %vm736_vm0, %v5554_v8 }
 0xcf7   : > { %v2248_v57 = vpop.f32.mrf.mxu1 }
 0xcff   : > { %v2251_v40 = vpop.f32.mrf.mxu1 }
 0xd07   : > { %v2254_v50 = vpop.f32.mrf.mxu1 }
 0xd0f   : > { %v2257_v45 = vpop.f32.mrf.mxu1 }
 0xd10   : > { %v2281_v32 = vsub.f32 %v4950_v60, %v2257_v45  ;;  %v2346_v45 = vmul.f32 0.25, %v5488_v2  ;;  %v2351_v2 = vmul.f32 0.25, %v5498_v31 }
 0xd17   : > { %v2260_v52 = vpop.f32.mrf.mxu1 }
 0xd18   : > { %v2282_v33 = vsub.f32 %v4946_v55, %v2260_v52  ;;  %v2347_v52 = vmul.f32 0.25, %v5490_v42  ;;  %v2352_v42 = vmul.f32 0.25, %v5500_v1 }
 0xd1f   : > { %v2263_v61 = vpop.f32.mrf.mxu1 }
 0xd20   : > { %v2283_v23 = vsub.f32 %v4942_v56, %v2263_v61  ;;  %v2348_v61 = vmul.f32 0.25, %v5492_v51  ;;  %v2353_v51 = vmul.f32 0.25, %v5502_v14 }
 0xd27   : > { %v2266_v39 = vpop.f32.mrf.mxu1 }
 0xd28   : > { %v2284_v7 = vsub.f32 %v4938_v37, %v2266_v39 }
 0xd2f   : > { %v2269_v35 = vpop.f32.mrf.mxu1 }
 0xd30   : > { %v2285_v47 = vsub.f32 %v4934_v12, %v2269_v35 }
 0xd37   : > { %v2272_v19 = vpop.f32.mrf.mxu1 }
 0xd38   : > { %v2286_v5 = vsub.f32 %v4930_v9, %v2272_v19 }
 0xd3f   : > { %v2275_v6 = vpop.f32.mrf.mxu1 }
 0xd40   : > { %v2287_v4 = vsub.f32 %v4927_v54, %v2275_v6  ;;  %v2280_v6 = vsub.f32 %v4954_v22, %v2254_v50  ;;  %v2345_v50 = vmul.f32 0.25, %v5486_v49  ;;  %v2350_v49 = vmul.f32 0.25, %v5496_v63 }
 0xd42   : > { %2294 = vmatpush.msra.mxu0 %v2287_v4  ;;  %v2279_v4 = vsub.f32 %v4958_v44, %v2251_v40 }
 0xd44   : > { %2295 = vmatpush.msra.mxu0 %v2286_v5  ;;  %v2278_v5 = vsub.f32 %v6317_v41, %v2248_v57 }
 0xd46   : > { %2296 = vmatpush.msra.mxu0 %v2285_v47 }
 0xd48   : > { %2297 = vmatpush.msra.mxu0 %v2284_v7 }
 0xd4a   : > { %2298 = vmatpush.msra.mxu0 %v2283_v23 }
 0xd4c   : > { %2299 = vmatpush.msra.mxu0 %v2282_v33 }
 0xd4e   : > { %2300 = vmatpush.msra.mxu0 %v2281_v32 }
 0xd50   : > { %2301 = vmatpush.msra.mxu0 %v2280_v6  ;;  %v2349_v6 = vmul.f32 0.25, %v5494_v27  ;;  %v2354_v27 = vmul.f32 0.25, %v5504_v15 }
 0xd52   : > { %2302 = vmatpush.msra.mxu0 %v2279_v4 }
 0xd54   : > { %2303 = vmatpush.msra.mxu0 %v2278_v5 }
 0xd55   : > { %3601 = vmatmul.msk.f32.vlgmr.msra.gmra.mxu0 %vm736_vm0, %v5536_v10 }
 0xd5d   : > { %3602 = vmatmul.msk.f32.gmra.mxu0 %vm736_vm0, %v5538_v34 }
 0xd65   : > { %3603 = vmatmul.msk.f32.gmra.mxu0 %vm736_vm0, %v5540_v29 }
 0xd6d   : > { %3604 = vmatmul.msk.f32.gmra.mxu0 %vm736_vm0, %v5542_v38 }
 0xd75   : > { %3605 = vmatmul.msk.f32.gmra.mxu0 %vm736_vm0, %v5544_v53 }
 0xd7d   : > { %3606 = vmatmul.msk.f32.gmra.mxu0 %vm736_vm0, %v5546_v3 }
 0xd85   : > { %3607 = vmatmul.msk.f32.gmra.mxu0 %vm736_vm0, %v5548_v16 }
 0xd8d   : > { %3608 = vmatmul.msk.f32.gmra.mxu0 %vm736_vm0, %v5550_v62 }
 0xd95   : > { %3609 = vmatmul.msk.f32.gmra.mxu0 %vm736_vm0, %v5552_v11 }
 0xd9d   : > { %3610 = vmatmul.msk.f32.gmra.mxu0 %vm736_vm0, %v5554_v8 }
 0xdd2   : > { %v2305_v32 = vpop.f32.mrf.mxu0 }
 0xdd3   : > { %v2335_v40 = vsub.f32 %v5090_v58, %v2305_v32 }
 0xdda   : > { %v2308_v33 = vpop.f32.mrf.mxu0 }
 0xddb   : > { %v2336_v57 = vsub.f32 %v5085_v25, %v2308_v33 }
 0xde2   : > { %v2311_v23 = vpop.f32.mrf.mxu0 }
 0xde3   : > { %v2337_v39 = vsub.f32 %v5080_v46, %v2311_v23 }
 0xdea   : > { %v2314_v10 = vpop.f32.mrf.mxu0 }
 0xdeb   : > { %v2338_v35 = vsub.f32 %v5076_v17, %v2314_v10  ;;  %v6336_v10 = vld [vmem:[#allocation55_spill] sm:$0xff] }
 0xdf2   : > { %v2317_v34 = vpop.f32.mrf.mxu0 }
 0xdf3   : > { %v2339_v19 = vsub.f32 %v5072_v48, %v2317_v34  ;;  %v6337_v34 = vld [vmem:[#allocation68_spill] sm:$0xff] }
 0xdfa   : > { %v2320_v29 = vpop.f32.mrf.mxu0 }
 0xdfb   : > { %v2340_v47 = vsub.f32 %v5068_v20, %v2320_v29  ;;  %v6338_v29 = vld [vmem:[#allocation69_spill] sm:$0xff] }
 0xe02   : > { %v2323_v38 = vpop.f32.mrf.mxu0 }
 0xe03   : > { %v2341_v8 = vsub.f32 %v5064_v0, %v2323_v38 }
 0xe0a   : > { %v2326_v53 = vpop.f32.mrf.mxu0 }
 0xe0b   : > { %v2342_v11 = vsub.f32 %v5060_v43, %v2326_v53 }
 0xe12   : > { %v2329_v3 = vpop.f32.mrf.mxu0 }
 0xe13   : > { %v2343_v62 = vsub.f32 %v5056_v59, %v2329_v3 }
 0xe1a   : > { %v2332_v7 = vpop.f32.mrf.mxu0 }
 0xe1b   : > { %v2344_v16 = vsub.f32 %v5053_v36, %v2332_v7 }
 0xe1d   : > { %2391 = vmatpush.msra.mxu2 %v2344_v16 }
 0xe1f   : > { %2392 = vmatpush.msra.mxu2 %v2343_v62 }
 0xe21   : > { %2393 = vmatpush.msra.mxu2 %v2342_v11 }
 0xe23   : > { %2394 = vmatpush.msra.mxu2 %v2341_v8 }
 0xe25   : > { %2395 = vmatpush.msra.mxu2 %v2340_v47 }
 0xe27   : > { %2396 = vmatpush.msra.mxu2 %v2339_v19 }
 0xe29   : > { %2397 = vmatpush.msra.mxu2 %v2338_v35  ;;  %v6339_v35 = vld [vmem:[#allocation35_spill] sm:$0xff] }
 0xe2b   : > { %2398 = vmatpush.msra.mxu2 %v2337_v39 }
 0xe2d   : > { %2399 = vmatpush.msra.mxu2 %v2336_v57  ;;  %v6340_v57 = vld [vmem:[#allocation36_spill] sm:$0xff] }
 0xe2f   : > { %2400 = vmatpush.msra.mxu2 %v2335_v40 }
 0xe30   : > { %3611 = vmatmul.msk.f32.vlgmr.msra.gmra.mxu2 %vm736_vm0, %v2345_v50  ;;  %v6341_v50 = vld [vmem:[#allocation37_spill] sm:$0xff] }
 0xe38   : > { %3612 = vmatmul.msk.f32.gmra.mxu2 %vm736_vm0, %v2346_v45 }
 0xe40   : > { %3613 = vmatmul.msk.f32.gmra.mxu2 %vm736_vm0, %v2347_v52  ;;  %v6342_v52 = vld [vmem:[#allocation38_spill] sm:$0xff] }
 0xe48   : > { %3614 = vmatmul.msk.f32.gmra.mxu2 %vm736_vm0, %v2348_v61 }
 0xe50   : > { %3615 = vmatmul.msk.f32.gmra.mxu2 %vm736_vm0, %v2349_v6  ;;  %v6343_v6 = vld [vmem:[#allocation39_spill] sm:$0xff] }
 0xe58   : > { %3616 = vmatmul.msk.f32.gmra.mxu2 %vm736_vm0, %v2350_v49 }
 0xe60   : > { %3617 = vmatmul.msk.f32.gmra.mxu2 %vm736_vm0, %v2351_v2  ;;  %v6344_v2 = vld [vmem:[#allocation40_spill] sm:$0xff] }
 0xe68   : > { %3618 = vmatmul.msk.f32.gmra.mxu2 %vm736_vm0, %v2352_v42 }
 0xe70   : > { %3619 = vmatmul.msk.f32.gmra.mxu2 %vm736_vm0, %v2353_v51  ;;  %v6345_v51 = vld [vmem:[#allocation41_spill] sm:$0xff] }
 0xe78   : > { %3620 = vmatmul.msk.f32.gmra.mxu2 %vm736_vm0, %v2354_v27 }
 0xeb3   : > { %v5656_v4 = vpop.f32.mrf.mxu2 }
 0xebb   : > { %v5658_v63 = vpop.f32.mrf.mxu2 }
 0xec3   : > { %v5660_v5 = vpop.f32.mrf.mxu2 }
 0xecb   : > { %v5662_v31 = vpop.f32.mrf.mxu2 }
 0xed3   : > { %v5664_v32 = vpop.f32.mrf.mxu2 }
 0xedb   : > { %v5666_v1 = vpop.f32.mrf.mxu2 }
 0xee3   : > { %v5668_v33 = vpop.f32.mrf.mxu2 }
 0xeeb   : > { %v5670_v14 = vpop.f32.mrf.mxu2 }
 0xef3   : > { %v5672_v23 = vpop.f32.mrf.mxu2 }
 0xefb   : > { %v5674_v15 = vpop.f32.mrf.mxu2 }
 0xefc   : > { %2438 = vmatpush.msra.mxu3 %v5674_v15 }
 0xefe   : > { %2439 = vmatpush.msra.mxu3 %v5672_v23 }
 0xf00   : > { %2440 = vmatpush.msra.mxu3 %v5670_v14 }
 0xf02   : > { %2441 = vmatpush.msra.mxu3 %v5668_v33 }
 0xf04   : > { %2442 = vmatpush.msra.mxu3 %v5666_v1 }
 0xf06   : > { %2443 = vmatpush.msra.mxu3 %v5664_v32 }
 0xf08   : > { %2444 = vmatpush.msra.mxu3 %v5662_v31 }
 0xf0a   : > { %2445 = vmatpush.msra.mxu3 %v5660_v5 }
 0xf0c   : > { %2446 = vmatpush.msra.mxu3 %v5658_v63 }
 0xf0e   : > { %2447 = vmatpush.msra.mxu3 %v5656_v4 }
 0xf0f   : > { %3621 = vmatmul.msk.f32.vlgmr.msra.gmra.mxu3 %vm736_vm0, %v5317_v18 }
 0xf17   : > { %3622 = vmatmul.msk.f32.gmra.mxu3 %vm736_vm0, %v5322_v21 }
 0xf1f   : > { %3623 = vmatmul.msk.f32.gmra.mxu3 %vm736_vm0, %v5327_v24 }
 0xf27   : > { %3624 = vmatmul.msk.f32.gmra.mxu3 %vm736_vm0, %v5332_v26 }
 0xf2f   : > { %3625 = vmatmul.msk.f32.gmra.mxu3 %vm736_vm0, %v5337_v28 }
 0xf37   : > { %3626 = vmatmul.msk.f32.gmra.mxu3 %vm736_vm0, %v5342_v13 }
 0xf3f   : > { %3627 = vmatmul.msk.f32.gmra.mxu3 %vm736_vm0, %v5347_v30 }
 0xf47   : > { %3628 = vmatmul.msk.f32.gmra.mxu3 %vm736_vm0, %v6336_v10 }
 0xf4f   : > { %3629 = vmatmul.msk.f32.gmra.mxu3 %vm736_vm0, %v6337_v34 }
 0xf57   : > { %3630 = vmatmul.msk.f32.gmra.mxu3 %vm736_vm0, %v6338_v29  ;;  %v6346_v29 = vld [vmem:[#allocation42_spill] sm:$0xff] }
 0xf92   : > { %v5706_v38 = vpop.f32.mrf.mxu3 }
 0xf9a   : > { %v5708_v53 = vpop.f32.mrf.mxu3 }
 0xfa2   : > { %v5710_v3 = vpop.f32.mrf.mxu3 }
 0xfaa   : > { %v5712_v7 = vpop.f32.mrf.mxu3 }
 0xfab   : > { %v2482_v27 = vsub.f32 %v6345_v51, %v5712_v7 }
 0xfb2   : > { %v5714_v16 = vpop.f32.mrf.mxu3 }
 0xfb3   : > { %v2483_v42 = vsub.f32 %v6344_v2, %v5714_v16 }
 0xfba   : > { %v5716_v62 = vpop.f32.mrf.mxu3 }
 0xfbb   : > { %v2484_v49 = vsub.f32 %v6343_v6, %v5716_v62 }
 0xfc2   : > { %v5718_v11 = vpop.f32.mrf.mxu3 }
 0xfc3   : > { %v2485_v61 = vsub.f32 %v6342_v52, %v5718_v11 }
 0xfca   : > { %v5720_v8 = vpop.f32.mrf.mxu3 }
 0xfcb   : > { %v2486_v45 = vsub.f32 %v6341_v50, %v5720_v8 }
 0xfd2   : > { %v5722_v47 = vpop.f32.mrf.mxu3 }
 0xfd3   : > { %v2487_v40 = vsub.f32 %v6340_v57, %v5722_v47 }
 0xfda   : > { %v5724_v19 = vpop.f32.mrf.mxu3 }
 0xfdb   : > { %v2488_v39 = vsub.f32 %v6339_v35, %v5724_v19 }
 0xfdd   : > { %2525 = vmatpush.msrb.mxu1 %v2488_v39  ;;  %v2481_v39 = vsub.f32 %v6346_v29, %v5710_v3 }
 0xfdf   : > { %2526 = vmatpush.msrb.mxu1 %v2487_v40  ;;  %v6347_v40 = vld [vmem:[#allocation43_spill] sm:$0xff] }
 0xfe1   : > { %2527 = vmatpush.msrb.mxu1 %v2486_v45  ;;  %v2480_v45 = vsub.f32 %v6347_v40, %v5708_v53 }
 0xfe3   : > { %2528 = vmatpush.msrb.mxu1 %v2485_v61  ;;  %v6348_v61 = vld [vmem:[#allocation44_spill] sm:$0xff] }
 0xfe4   : > { %v2479_v6 = vsub.f32 %v6348_v61, %v5706_v38 }
 0xfe5   : > { %2529 = vmatpush.msrb.mxu1 %v2484_v49 }
 0xfe7   : > { %2530 = vmatpush.msrb.mxu1 %v2483_v42 }
 0xfe9   : > { %2531 = vmatpush.msrb.mxu1 %v2482_v27 }
 0xfeb   : > { %2532 = vmatpush.msrb.mxu1 %v2481_v39 }
 0xfed   : > { %2533 = vmatpush.msrb.mxu1 %v2480_v45 }
 0xfef   : > { %2534 = vmatpush.msrb.mxu1 %v2479_v6 }
 0xff0   : > { %3631 = vmatmul.msk.f32.vlgmr.msrb.gmra.mxu1 %vm736_vm0, %v5706_v38 }
 0xff8   : > { %3632 = vmatmul.msk.f32.gmra.mxu1 %vm736_vm0, %v5708_v53 }
0x1000   : > { %3633 = vmatmul.msk.f32.gmra.mxu1 %vm736_vm0, %v5710_v3 }
0x1008   : > { %3634 = vmatmul.msk.f32.gmra.mxu1 %vm736_vm0, %v5712_v7 }
0x1010   : > { %3635 = vmatmul.msk.f32.gmra.mxu1 %vm736_vm0, %v5714_v16 }
0x1018   : > { %3636 = vmatmul.msk.f32.gmra.mxu1 %vm736_vm0, %v5716_v62 }
0x1020   : > { %3637 = vmatmul.msk.f32.gmra.mxu1 %vm736_vm0, %v5718_v11 }
0x1028   : > { %3638 = vmatmul.msk.f32.gmra.mxu1 %vm736_vm0, %v5720_v8 }
0x1030   : > { %3639 = vmatmul.msk.f32.gmra.mxu1 %vm736_vm0, %v5722_v47 }
0x1038   : > { %3640 = vmatmul.msk.f32.gmra.mxu1 %vm736_vm0, %v5724_v19 }
0x106d   : > { %v2536_v6 = vpop.f32.mrf.mxu1 }
0x1075   : > { %v2539_v49 = vpop.f32.mrf.mxu1 }
0x107d   : > { %v2542_v42 = vpop.f32.mrf.mxu1 }
0x1085   : > { %v2545_v27 = vpop.f32.mrf.mxu1 }
0x1086   : > { %v2569_v10 = vsub.f32 %v4950_v60, %v2545_v27  ;;  %v2634_v27 = vmul.f32 0.25, %v5658_v63  ;;  %v2639_v63 = vmul.f32 0.25, %v5668_v33 }
0x108d   : > { %v2548_v39 = vpop.f32.mrf.mxu1 }
0x108e   : > { %v2570_v34 = vsub.f32 %v4946_v55, %v2548_v39  ;;  %v2635_v39 = vmul.f32 0.25, %v5660_v5  ;;  %v2640_v5 = vmul.f32 0.25, %v5670_v14 }
0x1095   : > { %v2551_v45 = vpop.f32.mrf.mxu1 }
0x1096   : > { %v2571_v35 = vsub.f32 %v4942_v56, %v2551_v45  ;;  %v2636_v45 = vmul.f32 0.25, %v5662_v31  ;;  %v2641_v31 = vmul.f32 0.25, %v5672_v23 }
0x109d   : > { %v2554_v61 = vpop.f32.mrf.mxu1 }
0x109e   : > { %v2572_v57 = vsub.f32 %v4938_v37, %v2554_v61 }
0x10a5   : > { %v2557_v40 = vpop.f32.mrf.mxu1 }
0x10a6   : > { %v2573_v50 = vsub.f32 %v4934_v12, %v2557_v40 }
0x10ad   : > { %v2560_v29 = vpop.f32.mrf.mxu1 }
0x10ae   : > { %v2574_v52 = vsub.f32 %v4930_v9, %v2560_v29 }
0x10b5   : > { %v2563_v51 = vpop.f32.mrf.mxu1 }
0x10b6   : > { %v2575_v2 = vsub.f32 %v4927_v54, %v2563_v51  ;;  %v2568_v51 = vsub.f32 %v4954_v22, %v2542_v42  ;;  %v2633_v42 = vmul.f32 0.25, %v5656_v4  ;;  %v2638_v4 = vmul.f32 0.25, %v5666_v1 }
0x10b8   : > { %2582 = vmatpush.msrb.mxu0 %v2575_v2  ;;  %v2567_v2 = vsub.f32 %v4958_v44, %v2539_v49 }
0x10ba   : > { %2583 = vmatpush.msrb.mxu0 %v2574_v52  ;;  %v2566_v52 = vsub.f32 %v6317_v41, %v2536_v6 }
0x10bc   : > { %2584 = vmatpush.msrb.mxu0 %v2573_v50 }
0x10be   : > { %2585 = vmatpush.msrb.mxu0 %v2572_v57 }
0x10c0   : > { %2586 = vmatpush.msrb.mxu0 %v2571_v35 }
0x10c2   : > { %2587 = vmatpush.msrb.mxu0 %v2570_v34 }
0x10c4   : > { %2588 = vmatpush.msrb.mxu0 %v2569_v10 }
0x10c6   : > { %2589 = vmatpush.msrb.mxu0 %v2568_v51  ;;  %v2637_v51 = vmul.f32 0.25, %v5664_v32  ;;  %v2642_v32 = vmul.f32 0.25, %v5674_v15 }
0x10c8   : > { %2590 = vmatpush.msrb.mxu0 %v2567_v2 }
0x10ca   : > { %2591 = vmatpush.msrb.mxu0 %v2566_v52 }
0x10cb   : > { %3641 = vmatmul.msk.f32.vlgmr.msrb.gmra.mxu0 %vm736_vm0, %v5706_v38 }
0x10d3   : > { %3642 = vmatmul.msk.f32.gmra.mxu0 %vm736_vm0, %v5708_v53 }
0x10db   : > { %3643 = vmatmul.msk.f32.gmra.mxu0 %vm736_vm0, %v5710_v3 }
0x10e3   : > { %3644 = vmatmul.msk.f32.gmra.mxu0 %vm736_vm0, %v5712_v7 }
0x10eb   : > { %3645 = vmatmul.msk.f32.gmra.mxu0 %vm736_vm0, %v5714_v16 }
0x10f3   : > { %3646 = vmatmul.msk.f32.gmra.mxu0 %vm736_vm0, %v5716_v62 }
0x10fb   : > { %3647 = vmatmul.msk.f32.gmra.mxu0 %vm736_vm0, %v5718_v11 }
0x1103   : > { %3648 = vmatmul.msk.f32.gmra.mxu0 %vm736_vm0, %v5720_v8 }
0x110b   : > { %3649 = vmatmul.msk.f32.gmra.mxu0 %vm736_vm0, %v5722_v47 }
0x1113   : > { %3650 = vmatmul.msk.f32.gmra.mxu0 %vm736_vm0, %v5724_v19 }
0x1148   : > { %v2593_v10 = vpop.f32.mrf.mxu0 }
0x1149   : > { %v2623_v49 = vsub.f32 %v5090_v58, %v2593_v10 }
0x1150   : > { %v2596_v34 = vpop.f32.mrf.mxu0 }
0x1151   : > { %v2624_v6 = vsub.f32 %v5085_v25, %v2596_v34 }
0x1158   : > { %v2599_v38 = vpop.f32.mrf.mxu0 }
0x1159   : > { %v2625_v61 = vsub.f32 %v5080_v46, %v2599_v38 }
0x1160   : > { %v2602_v53 = vpop.f32.mrf.mxu0 }
0x1161   : > { %v2626_v40 = vsub.f32 %v5076_v17, %v2602_v53  ;;  %v643_v53 = vld [vmem:[%s4623_s13 + $0x20] sm:$0xff] }
0x1168   : > { %v2605_v3 = vpop.f32.mrf.mxu0 }
0x1169   : > { %v2627_v29 = vsub.f32 %v5072_v48, %v2605_v3  ;;  %v642_v3 = vld [vmem:[%s4623_s13 + $0x18] sm:$0xff] }
0x1170   : > { %v2608_v7 = vpop.f32.mrf.mxu0 }
0x1171   : > { %v2628_v50 = vsub.f32 %v5068_v20, %v2608_v7  ;;  %v641_v7 = vld [vmem:[%s4623_s13 + $0x10] sm:$0xff] }
0x1178   : > { %v2611_v16 = vpop.f32.mrf.mxu0 }
0x1179   : > { %v2629_v19 = vsub.f32 %v5064_v0, %v2611_v16  ;;  %v6351_v16 = vld [vmem:[#allocation62_spill] sm:$0xff] }
0x117a   : > { %3883 = vrcp.f32 %v6351_v16  ;;  %vm1032_vm12 = vweird.f32 %v6351_v16 }
0x1180   : > { %v2614_v62 = vpop.f32.mrf.mxu0 }
0x1181   : > { %v2630_v47 = vsub.f32 %v5060_v43, %v2614_v62  ;;  %v6353_v62 = vld [vmem:[#allocation55_spill] sm:$0xff] }
0x1188   : > { %v2617_v35 = vpop.f32.mrf.mxu0 }
0x1189   : > { %v2631_v8 = vsub.f32 %v5056_v59, %v2617_v35  ;;  %v1005_v35 = vpop.xlane.xlu1 %1004 }
0x118a   : > { %vm1060_vm5 = vweird.f32 %v1005_v35 }
0x1190   : > { %v2620_v57 = vpop.f32.mrf.mxu0 }
0x1191   : > { %v2632_v11 = vsub.f32 %v5053_v36, %v2620_v57 }
0x1193   : > { %2679 = vmatpush.msrb.mxu2 %v2632_v11 }
0x1195   : > { %2680 = vmatpush.msrb.mxu2 %v2631_v8 }
0x1197   : > { %2681 = vmatpush.msrb.mxu2 %v2630_v47  ;;  %v6354_v47 = vld [vmem:[#allocation68_spill] sm:$0xff] }
0x1199   : > { %2682 = vmatpush.msrb.mxu2 %v2629_v19 }
0x119b   : > { %2683 = vmatpush.msrb.mxu2 %v2628_v50  ;;  %v1036_v50 = vand.u32 2147483647, %v6351_v16 }
0x119d   : > { %2684 = vmatpush.msrb.mxu2 %v2627_v29  ;;  %vm1037_vm15 = vcmp.eq.f32.partialorder %v1036_v50, 8.507059e+37 }
0x119f   : > { %2685 = vmatpush.msrb.mxu2 %v2626_v40  ;;  %v1008_v40 = vpop.xlane.xlu0 %1007 }
0x11a0   : > { %vm1074_vm9 = vweird.f32 %v1008_v40 }
0x11a1   : > { %2686 = vmatpush.msrb.mxu2 %v2625_v61 }
0x11a3   : > { %2687 = vmatpush.msrb.mxu2 %v2624_v6 }
0x11a5   : > { %2688 = vmatpush.msrb.mxu2 %v2623_v49 }
0x11a6   : > { %3651 = vmatmul.msk.f32.vlgmr.msrb.gmra.mxu2 %vm736_vm0, %v2633_v42 }
0x11ae   : > { %3652 = vmatmul.msk.f32.gmra.mxu2 %vm736_vm0, %v2634_v27 }
0x11b6   : > { %3653 = vmatmul.msk.f32.gmra.mxu2 %vm736_vm0, %v2635_v39  ;;  %v3923_v39 = vld [vmem:[%s4633_s29 + $0x48] sm:$0xff] }
0x11be   : > { %3654 = vmatmul.msk.f32.gmra.mxu2 %vm736_vm0, %v2636_v45 }
0x11c6   : > { %3655 = vmatmul.msk.f32.gmra.mxu2 %vm736_vm0, %v2637_v51 }
0x11ce   : > { %3656 = vmatmul.msk.f32.gmra.mxu2 %vm736_vm0, %v2638_v4 }
0x11d6   : > { %3657 = vmatmul.msk.f32.gmra.mxu2 %vm736_vm0, %v2639_v63 }
0x11de   : > { %3658 = vmatmul.msk.f32.gmra.mxu2 %vm736_vm0, %v2640_v5 }
0x11e6   : > { %3659 = vmatmul.msk.f32.gmra.mxu2 %vm736_vm0, %v2641_v31  ;;  %v1011_v31 = vpop.xlane.xlu1 %1010 }
0x11ee   : > { %3660 = vmatmul.msk.f32.gmra.mxu2 %vm736_vm0, %v2642_v32 }
0x1229   : > { %v5826_v2 = vpop.f32.mrf.mxu2 }
0x1231   : > { %v5828_v1 = vpop.f32.mrf.mxu2 }
0x1239   : > { %v5830_v52 = vpop.f32.mrf.mxu2 }
0x1241   : > { %v5832_v33 = vpop.f32.mrf.mxu2 }
0x1249   : > { %v5834_v10 = vpop.f32.mrf.mxu2 }
0x1251   : > { %v5836_v14 = vpop.f32.mrf.mxu2 }
0x1259   : > { %v5838_v34 = vpop.f32.mrf.mxu2 }
0x1261   : > { %v5840_v23 = vpop.f32.mrf.mxu2 }
0x1269   : > { %v5842_v38 = vpop.f32.mrf.mxu2 }
0x126a   : > { %6349 = vst [vmem:[#allocation69_spill] sm:$0xff] %v5842_v38 }
0x1271   : > { %v5844_v15 = vpop.f32.mrf.mxu2 }
0x1272   : > { %6350 = vst [vmem:[#allocation70_spill] sm:$0xff] %v5844_v15  ;;  %2726 = vmatpush.msrb.mxu3 %v5844_v15 }
0x1274   : > { %2727 = vmatpush.msrb.mxu3 %v5842_v38 }
0x1276   : > { %2728 = vmatpush.msrb.mxu3 %v5840_v23 }
0x1278   : > { %2729 = vmatpush.msrb.mxu3 %v5838_v34 }
0x127a   : > { %2730 = vmatpush.msrb.mxu3 %v5836_v14 }
0x127c   : > { %2731 = vmatpush.msrb.mxu3 %v5834_v10 }
0x127e   : > { %2732 = vmatpush.msrb.mxu3 %v5832_v33 }
0x1280   : > { %2733 = vmatpush.msrb.mxu3 %v5830_v52 }
0x1282   : > { %2734 = vmatpush.msrb.mxu3 %v5828_v1 }
0x1284   : > { %2735 = vmatpush.msrb.mxu3 %v5826_v2 }
0x1285   : > { %3661 = vmatmul.msk.f32.vlgmr.msrb.gmra.mxu3 %vm736_vm0, %v5317_v18  ;;  %v640_v18 = vld [vmem:[%s4623_s13 + $0x8] sm:$0xff] }
0x1286   : > { %3049 = vmatpush.msra.mxu3 %v643_v53  ;;  %v6355_v53 = vld [vmem:[#allocation56_spill] sm:$0xff] }
0x1288   : > { %3050 = vmatpush.msra.mxu3 %v642_v3 }
0x128a   : > { %3051 = vmatpush.msra.mxu3 %v641_v7 }
0x128c   : > { %3052 = vmatpush.msra.mxu3 %v640_v18 }
0x128d   : > { %3662 = vmatmul.msk.f32.gmra.mxu3 %vm736_vm0, %v5322_v21  ;;  %v639_v21 = vld [vmem:[%s4623_s13] sm:$0xff] }
0x128e   : > { %3053 = vmatpush.msra.mxu3 %v639_v21 }
0x1295   : > { %3663 = vmatmul.msk.f32.gmra.mxu3 %vm736_vm0, %v5327_v24  ;;  %v3884_v24 = vpop.eup %3883 }
0x1296   : > { %vm1033_vm13 = vweird.f32 %v3884_v24 }
0x1297   : > { %vm1034_vm14 = vmor %vm1032_vm12, %vm1033_vm13 }
0x129d   : > { %3664 = vmatmul.msk.f32.gmra.mxu3 %vm736_vm0, %v5332_v26  ;;  %v6352_v26 = vld [vmem:[#allocation64_spill] sm:$0xff] }
0x129e   : > { %3885 = vrcp.f32 %v6352_v26  ;;  %vm1046_vm1 = vweird.f32 %v6352_v26  ;;  %v1052_v51 = vand.u32 2147483648, %v6352_v26  ;;  %v1050_v63 = vand.u32 2147483647, %v6352_v26 }
0x129f   : > { %3887 = vrcp.f32 %v1005_v35 }
0x12a0   : > { %3889 = vrcp.f32 %v1008_v40  ;;  %v1053_v7 = vor.u32 1.1754944e-38, %v1052_v51  ;;  %vm1051_vm4 = vcmp.eq.f32.partialorder %v1050_v63, 8.507059e+37  ;;  %v6357_v51 = vld [vmem:[#allocation58_spill] sm:$0xff] }
0x12a1   : > { %3891 = vrcp.f32 %v1011_v31 }
0x12a4   : > { %v3886_v57 = vpop.eup %3885 }
0x12a5   : > { %3665 = vmatmul.msk.f32.gmra.mxu3 %vm736_vm0, %v5337_v28  ;;  %v1028_v28 = vmul.f32 %v3884_v24, %v6351_v16  ;;  %v1042_v8 = vmul.f32 %v3886_v57, %v6352_v26  ;;  %v3888_v61 = vpop.eup %3887  ;;  %vm1047_vm2 = vweird.f32 %v3886_v57  ;;  %v1064_v26 = vand.u32 2147483647, %v1005_v35 }
0x12a6   : > { %v1056_v27 = vmul.f32 %v3888_v61, %v1005_v35  ;;  %v3890_v32 = vpop.eup %3889  ;;  %vm1048_vm3 = vmor %vm1046_vm1, %vm1047_vm2  ;;  %vm1061_vm6 = vweird.f32 %v3888_v61 }
0x12a7   : > { %v1043_v29 = vsub.f32 1.0, %v1042_v8  ;;  %v1070_v21 = vmul.f32 %v3890_v32, %v1008_v40  ;;  %v3892_v8 = vpop.eup %3891  ;;  %vm1062_vm7 = vmor %vm1060_vm5, %vm1061_vm6  ;;  %vm1065_vm8 = vcmp.eq.f32.partialorder %v1064_v26, 8.507059e+37  ;;  %vm1075_vm10 = vweird.f32 %v3890_v32 }
0x12a8   : > { %v1057_v5 = vsub.f32 1.0, %v1056_v27  ;;  %vm1076_vm12 = vmor %vm1074_vm9, %vm1075_vm10 }
0x12a9   : > { %v1044_v42 = vmul.f32 %v3886_v57, %v1043_v29  ;;  %v1084_v29 = vmul.f32 %v3892_v8, %v1011_v31 }
0x12aa   : > { %v1058_v18 = vmul.f32 %v3888_v61, %v1057_v5 }
0x12ab   : > { %v1045_v4 = vadd.f32 %v3886_v57, %v1044_v42  ;;  %v1085_v27 = vsub.f32 1.0, %v1084_v29 }
0x12ad   : > { %3666 = vmatmul.msk.f32.gmra.mxu3 %vm736_vm0, %v5342_v13  ;;  %v1029_v13 = vsub.f32 1.0, %v1028_v28  ;;  %v1086_v5 = vmul.f32 %v3892_v8, %v1085_v27 }
0x12af   : > { %v1030_v11 = vmul.f32 %v3884_v24, %v1029_v13  ;;  %v1071_v13 = vsub.f32 1.0, %v1070_v21 }
0x12b1   : > { %v1031_v19 = vadd.f32 %v3884_v24, %v1030_v11  ;;  %v1014_v11 = vpop.xlane.xlu2 %1013  ;;  %v1072_v50 = vmul.f32 %v3890_v32, %v1071_v13 }
0x12b2   : > { %3893 = vrcp.f32 %v1014_v11 }
0x12b3   : > { %v1035_v49 = vsel %vm1034_vm14, %v3884_v24, %v1031_v19  ;;  %v1066_v24 = vand.u32 2147483648, %v1005_v35  ;;  %v1073_v42 = vadd.f32 %v3890_v32, %v1072_v50  ;;  %v1078_v35 = vand.u32 2147483647, %v1008_v40 }
0x12b4   : > { %vm1088_vm14 = vweird.f32 %v1011_v31 }
0x12b5   : > { %3667 = vmatmul.msk.f32.gmra.mxu3 %vm736_vm0, %v5347_v30  ;;  %v1038_v30 = vand.u32 2147483648, %v6351_v16  ;;  %v1049_v16 = vsel %vm1048_vm3, %v3886_v57, %v1045_v4  ;;  %v1067_v19 = vor.u32 1.1754944e-38, %v1066_v24  ;;  %vm1079_vm13 = vcmp.eq.f32.partialorder %v1078_v35, 8.507059e+37 }
0x12b6   : > { %v1054_v28 = vsel %vm1051_vm4, %v1053_v7, %v1049_v16  ;;  %v1020_v16 = vpop.xlane.xlu1 %1019  ;;  %vm1102_vm3 = vweird.f32 %v1014_v11 }
0x12b7   : > { %v1039_v6 = vor.u32 1.1754944e-38, %v1038_v30 }
0x12b9   : > { %v1040_v45 = vsel %vm1037_vm15, %v1039_v6, %v1035_v49  ;;  %v1080_v6 = vand.u32 2147483648, %v1008_v40  ;;  %vm1089_vm15 = vweird.f32 %v3892_v8  ;;  %v1092_v40 = vand.u32 2147483647, %v1011_v31 }
0x12ba   : > { %v1167_v3 = vmul.f32 %v6355_v53, %v1040_v45  ;;  %v3894_v45 = vpop.eup %3893  ;;  %vm1090_vm1 = vmor %vm1088_vm14, %vm1089_vm15 }
0x12bb   : > { %v1081_v63 = vor.u32 1.1754944e-38, %v1080_v6  ;;  %v1098_v53 = vmul.f32 %v3894_v45, %v1014_v11  ;;  %vm1093_vm2 = vcmp.eq.f32.partialorder %v1092_v40, 8.507059e+37  ;;  %vm1103_vm4 = vweird.f32 %v3894_v45 }
0x12bc   : > { %vm1104_vm5 = vmor %vm1102_vm3, %vm1103_vm4 }
0x12bd   : > { %3668 = vmatmul.msk.f32.gmra.mxu3 %vm736_vm0, %v6353_v62  ;;  %v1059_v62 = vadd.f32 %v3888_v61, %v1058_v18  ;;  %v1087_v18 = vadd.f32 %v3892_v8, %v1086_v5  ;;  %v1099_v21 = vsub.f32 1.0, %v1098_v53 }
0x12bf   : > { %v1063_v57 = vsel %vm1062_vm7, %v3888_v61, %v1059_v62  ;;  %v1077_v61 = vsel %vm1076_vm12, %v3890_v32, %v1073_v42  ;;  %v1100_v13 = vmul.f32 %v3894_v45, %v1099_v21  ;;  %v1091_v32 = vsel %vm1090_vm1, %v3892_v8, %v1087_v18 }
0x12c0   : > { %v1068_v49 = vsel %vm1065_vm8, %v1067_v19, %v1063_v57  ;;  %v1082_v7 = vsel %vm1079_vm13, %v1081_v63, %v1077_v61  ;;  %v1023_v57 = vpop.xlane.xlu2 %1022  ;;  %vm1130_vm12 = vweird.f32 %v1020_v16 }
0x12c1   : > { %v1169_v4 = vmul.f32 %v6357_v51, %v1068_v49  ;;  %v1101_v50 = vadd.f32 %v3894_v45, %v1100_v13  ;;  %v6359_v49 = vld [vmem:[#allocation60_spill] sm:$0xff]  ;;  %vm1144_vm1 = vweird.f32 %v1023_v57 }
0x12c3   : > { %v1105_v8 = vsel %vm1104_vm5, %v3894_v45, %v1101_v50 }
0x12c5   : > { %3669 = vmatmul.msk.f32.gmra.mxu3 %vm736_vm0, %v6354_v47  ;;  %v6356_v47 = vld [vmem:[#allocation57_spill] sm:$0xff] }
0x12c6   : > { %v1168_v30 = vmul.f32 %v6356_v47, %v1054_v28  ;;  %v6358_v28 = vld [vmem:[#allocation59_spill] sm:$0xff] }
0x12c7   : > { %v1170_v62 = vmul.f32 %v6358_v28, %v1082_v7  ;;  %v6360_v7 = vld [vmem:[#allocation61_spill] sm:$0xff] }
0x12cd   : > { %3670 = vmatmul.msk.f32.gmra.mxu3 %vm736_vm0, %v3923_v39  ;;  %v1017_v39 = vpop.xlane.xlu0 %1016 }
0x12ce   : > { %3895 = vrcp.f32 %v1017_v39  ;;  %vm1116_vm7 = vweird.f32 %v1017_v39 }
0x12cf   : > { %3897 = vrcp.f32 %v1020_v16 }
0x12d0   : > { %3899 = vrcp.f32 %v1023_v57 }
0x12d4   : > { %v3896_v24 = vpop.eup %3895 }
0x12d5   : > { %3701 = vmatmul.msk.f32.vlgmr.msra.gmra.mxu3 %vm936_vm11, %v1167_v3  ;;  %v1094_v3 = vand.u32 2147483648, %v1011_v31  ;;  %v1112_v47 = vmul.f32 %v3896_v24, %v1017_v39  ;;  %v1106_v31 = vand.u32 2147483647, %v1014_v11  ;;  %v3898_v6 = vpop.eup %3897  ;;  %vm1117_vm8 = vweird.f32 %v3896_v24  ;;  %v1026_v61 = vpop.xlane.xlu0 %1025 }
0x12d6   : > { %v1126_v51 = vmul.f32 %v3898_v6, %v1020_v16  ;;  %vm1118_vm9 = vmor %vm1116_vm7, %vm1117_vm8  ;;  %3901 = vrcp.f32 %v1026_v61  ;;  %vm1131_vm13 = vweird.f32 %v3898_v6  ;;  %vm1158_vm5 = vweird.f32 %v1026_v61 }
0x12d7   : > { %v1095_v26 = vor.u32 1.1754944e-38, %v1094_v3  ;;  %v1113_v29 = vsub.f32 1.0, %v1112_v47  ;;  %vm1107_vm6 = vcmp.eq.f32.partialorder %v1106_v31, 8.507059e+37  ;;  %v3900_v3 = vpop.eup %3899  ;;  %vm1132_vm14 = vmor %vm1130_vm12, %vm1131_vm13 }
0x12d8   : > { %v1127_v53 = vsub.f32 1.0, %v1126_v51  ;;  %v1140_v28 = vmul.f32 %v3900_v3, %v1023_v57 }
0x12d9   : > { %v1096_v19 = vsel %vm1093_vm2, %v1095_v26, %v1091_v32  ;;  %v1114_v27 = vmul.f32 %v3896_v24, %v1113_v29  ;;  %vm1145_vm2 = vweird.f32 %v3900_v3 }
0x12da   : > { %v1171_v42 = vmul.f32 %v6359_v49, %v1096_v19  ;;  %v1128_v21 = vmul.f32 %v3898_v6, %v1127_v53  ;;  %v1141_v47 = vsub.f32 1.0, %v1140_v28  ;;  %vm1146_vm3 = vmor %vm1144_vm1, %vm1145_vm2 }
0x12db   : > { %v1115_v5 = vadd.f32 %v3896_v24, %v1114_v27 }
0x12dc   : > { %v1129_v13 = vadd.f32 %v3898_v6, %v1128_v21  ;;  %v3902_v32 = vpop.eup %3901  ;;  %v1142_v29 = vmul.f32 %v3900_v3, %v1141_v47 }
0x12dd   : > { %3702 = vmatmul.msk.f32.gmra.mxu3 %vm936_vm11, %v1168_v30  ;;  %v1108_v30 = vand.u32 2147483648, %v1014_v11  ;;  %v1120_v11 = vand.u32 2147483647, %v1017_v39  ;;  %v1119_v45 = vsel %vm1118_vm9, %v3896_v24, %v1115_v5  ;;  %v1154_v49 = vmul.f32 %v3902_v32, %v1026_v61 }
0x12de   : > { %v1133_v31 = vsel %vm1132_vm14, %v3898_v6, %v1129_v13  ;;  %v1150_v24 = vand.u32 2147483648, %v1023_v57  ;;  %v1143_v27 = vadd.f32 %v3900_v3, %v1142_v29 }
0x12df   : > { %v1109_v35 = vor.u32 1.1754944e-38, %v1108_v30  ;;  %vm1121_vm10 = vcmp.eq.f32.partialorder %v1120_v11, 8.507059e+37  ;;  %v6361_v30 = vld [vmem:[#allocation63_spill] sm:$0xff]  ;;  %v1155_v51 = vsub.f32 1.0, %v1154_v49  ;;  %v1164_v11 = vand.u32 2147483648, %v1026_v61  ;;  %v6366_v49 = vld [vmem:[#allocation36_spill] sm:$0xff] }
0x12e0   : > { %v1147_v5 = vsel %vm1146_vm3, %v3900_v3, %v1143_v27 }
0x12e1   : > { %v1110_v63 = vsel %vm1107_vm6, %v1109_v35, %v1105_v8  ;;  %v6362_v8 = vld [vmem:[#allocation65_spill] sm:$0xff]  ;;  %v1156_v6 = vmul.f32 %v3902_v32, %v1155_v51  ;;  %vm1159_vm6 = vweird.f32 %v3902_v32  ;;  %v1165_v28 = vor.u32 1.1754944e-38, %v1164_v11 }
0x12e2   : > { %v1172_v18 = vmul.f32 %v6360_v7, %v1110_v63  ;;  %v1151_v63 = vor.u32 1.1754944e-38, %v1150_v24  ;;  %vm1160_vm7 = vmor %vm1158_vm5, %vm1159_vm6 }
0x12e5   : > { %3703 = vmatmul.msk.f32.gmra.mxu3 %vm936_vm11, %v1169_v4  ;;  %v1122_v4 = vand.u32 2147483648, %v1017_v39  ;;  %v1134_v39 = vand.u32 2147483647, %v1020_v16 }
0x12e7   : > { %v1123_v40 = vor.u32 1.1754944e-38, %v1122_v4  ;;  %vm1135_vm15 = vcmp.eq.f32.partialorder %v1134_v39, 8.507059e+37 }
0x12e9   : > { %v1124_v26 = vsel %vm1121_vm10, %v1123_v40, %v1119_v45  ;;  %v1162_v40 = vand.u32 2147483647, %v1026_v61 }
0x12ea   : > { %v1173_v19 = vmul.f32 %v6361_v30, %v1124_v26  ;;  %v6364_v26 = vld [vmem:[#allocation67_spill] sm:$0xff] }
0x12eb   : > { %vm1163_vm8 = vcmp.eq.f32.partialorder %v1162_v40, 8.507059e+37  ;;  %v6373_v40 = vld [vmem:[#allocation43_spill] sm:$0xff] }
0x12ed   : > { %3704 = vmatmul.msk.f32.gmra.mxu3 %vm936_vm11, %v1170_v62  ;;  %v1136_v62 = vand.u32 2147483648, %v1020_v16  ;;  %v1148_v16 = vand.u32 2147483647, %v1023_v57  ;;  %v6363_v57 = vld [vmem:[#allocation66_spill] sm:$0xff] }
0x12ef   : > { %v1137_v50 = vor.u32 1.1754944e-38, %v1136_v62  ;;  %vm1149_vm4 = vcmp.eq.f32.partialorder %v1148_v16, 8.507059e+37  ;;  %v6368_v16 = vld [vmem:[#allocation38_spill] sm:$0xff] }
0x12f0   : > { %v1152_v7 = vsel %vm1149_vm4, %v1151_v63, %v1147_v5  ;;  %v6370_v63 = vld [vmem:[#allocation40_spill] sm:$0xff] }
0x12f1   : > { %v1138_v35 = vsel %vm1135_vm15, %v1137_v50, %v1133_v31  ;;  %v1175_v21 = vmul.f32 %v6363_v57, %v1152_v7  ;;  %v6365_v31 = vld [vmem:[#allocation35_spill] sm:$0xff]  ;;  %v6372_v7 = vld [vmem:[#allocation42_spill] sm:$0xff] }
0x12f2   : > { %v1174_v4 = vmul.f32 %v6362_v8, %v1138_v35  ;;  %v6367_v35 = vld [vmem:[#allocation37_spill] sm:$0xff]  ;;  %v6369_v8 = vld [vmem:[#allocation39_spill] sm:$0xff] }
0x12f5   : > { %3705 = vmatmul.msk.f32.gmra.mxu3 %vm936_vm11, %v1171_v42 }
0x12fd   : > { %3706 = vmatmul.msk.f32.gmra.mxu3 %vm936_vm11, %v1172_v18  ;;  %v1157_v18 = vadd.f32 %v3902_v32, %v1156_v6  ;;  %v6371_v6 = vld [vmem:[#allocation41_spill] sm:$0xff] }
0x12ff   : > { %v1161_v45 = vsel %vm1160_vm7, %v3902_v32, %v1157_v18 }
0x1300   : > { %v1166_v62 = vsel %vm1163_vm8, %v1165_v28, %v1161_v45 }
0x1301   : > { %v1176_v13 = vmul.f32 %v6364_v26, %v1166_v62 }
0x1305   : > { %3707 = vmatmul.msk.f32.gmra.mxu3 %vm936_vm11, %v1173_v19 }
0x1308   : > { %v5905_v42 = vpop.f32.mrf.mxu3 }
0x130d   : > { %3708 = vmatmul.msk.f32.gmra.mxu3 %vm936_vm11, %v1174_v4 }
0x1310   : > { %v5909_v53 = vpop.f32.mrf.mxu3 }
0x1311   : > { %v2768_v57 = vsub.f32 %v6373_v40, %v5909_v53 }
0x1315   : > { %3709 = vmatmul.msk.f32.gmra.mxu3 %vm936_vm11, %v1175_v21  ;;  %v6374_v21 = vld [vmem:[#allocation44_spill] sm:$0xff] }
0x1316   : > { %v2767_v28 = vsub.f32 %v6374_v21, %v5905_v42 }
0x1318   : > { %v5913_v3 = vpop.f32.mrf.mxu3 }
0x1319   : > { %v2769_v18 = vsub.f32 %v6372_v7, %v5913_v3 }
0x131d   : > { %3710 = vmatmul.msk.f32.gmra.mxu3 %vm936_vm11, %v1176_v13 }
0x1320   : > { %v5917_v39 = vpop.f32.mrf.mxu3 }
0x1321   : > { %v2770_v11 = vsub.f32 %v6371_v6, %v5917_v39 }
0x1328   : > { %v5919_v47 = vpop.f32.mrf.mxu3 }
0x1329   : > { %v2771_v5 = vsub.f32 %v6370_v63, %v5919_v47 }
0x1330   : > { %v5921_v61 = vpop.f32.mrf.mxu3 }
0x1331   : > { %v2772_v4 = vsub.f32 %v6369_v8, %v5921_v61 }
0x1338   : > { %v5923_v30 = vpop.f32.mrf.mxu3 }
0x1339   : > { %v2773_v51 = vsub.f32 %v6368_v16, %v5923_v30 }
0x1340   : > { %v5925_v19 = vpop.f32.mrf.mxu3 }
0x1341   : > { %v2774_v27 = vsub.f32 %v6367_v35, %v5925_v19 }
0x1348   : > { %v5927_v32 = vpop.f32.mrf.mxu3 }
0x1349   : > { %v2775_v24 = vsub.f32 %v6366_v49, %v5927_v32 }
0x1350   : > { %v5929_v50 = vpop.f32.mrf.mxu3 }
0x1351   : > { %v2776_v29 = vsub.f32 %v6365_v31, %v5929_v50 }
0x1353   : > { %2813 = vmatpush.msra.mxu1 %v2776_v29 }
0x1355   : > { %2814 = vmatpush.msra.mxu1 %v2775_v24 }
0x1357   : > { %2815 = vmatpush.msra.mxu1 %v2774_v27 }
0x1358   : > { %v5971_v45 = vpop.f32.mrf.mxu3 }
0x1359   : > { %2816 = vmatpush.msra.mxu1 %v2773_v51 }
0x135b   : > { %2817 = vmatpush.msra.mxu1 %v2772_v4 }
0x135d   : > { %2818 = vmatpush.msra.mxu1 %v2771_v5 }
0x135f   : > { %2819 = vmatpush.msra.mxu1 %v2770_v11 }
0x1360   : > { %v5973_v13 = vpop.f32.mrf.mxu3 }
0x1361   : > { %2820 = vmatpush.msra.mxu1 %v2769_v18 }
0x1363   : > { %2821 = vmatpush.msra.mxu1 %v2768_v57 }
0x1365   : > { %2822 = vmatpush.msra.mxu1 %v2767_v28 }
0x1366   : > { %3671 = vmatmul.msk.f32.vlgmr.msra.gmra.mxu1 %vm736_vm0, %v5905_v42 }
0x1368   : > { %v3061_v29 = vpop.f32.mrf.mxu3 }
0x136e   : > { %3672 = vmatmul.msk.f32.gmra.mxu1 %vm736_vm0, %v5909_v53 }
0x1370   : > { %v3064_v24 = vpop.f32.mrf.mxu3 }
0x1376   : > { %3673 = vmatmul.msk.f32.gmra.mxu1 %vm736_vm0, %v5913_v3 }
0x1378   : > { %v3067_v27 = vpop.f32.mrf.mxu3 }
0x137e   : > { %3674 = vmatmul.msk.f32.gmra.mxu1 %vm736_vm0, %v5917_v39 }
0x1380   : > { %v3070_v8 = vpop.f32.mrf.mxu3 }
0x1386   : > { %3675 = vmatmul.msk.f32.gmra.mxu1 %vm736_vm0, %v5919_v47 }
0x1388   : > { %v3073_v63 = vpop.f32.mrf.mxu3 }
0x138e   : > { %3676 = vmatmul.msk.f32.gmra.mxu1 %vm736_vm0, %v5921_v61 }
0x1390   : > { %v3076_v6 = vpop.f32.mrf.mxu3 }
0x1396   : > { %3677 = vmatmul.msk.f32.gmra.mxu1 %vm736_vm0, %v5923_v30 }
0x1398   : > { %v3079_v21 = vpop.f32.mrf.mxu3 }
0x139e   : > { %3678 = vmatmul.msk.f32.gmra.mxu1 %vm736_vm0, %v5925_v19 }
0x13a6   : > { %3679 = vmatmul.msk.f32.gmra.mxu1 %vm736_vm0, %v5927_v32 }
0x13ae   : > { %3680 = vmatmul.msk.f32.gmra.mxu1 %vm736_vm0, %v5929_v50 }
0x13e3   : > { %v2824_v62 = vpop.f32.mrf.mxu1 }
0x13eb   : > { %v2827_v26 = vpop.f32.mrf.mxu1 }
0x13f3   : > { %v2830_v31 = vpop.f32.mrf.mxu1 }
0x13fb   : > { %v2833_v49 = vpop.f32.mrf.mxu1 }
0x13fc   : > { %v2857_v38 = vsub.f32 %v4950_v60, %v2833_v49 }
0x1403   : > { %v2836_v35 = vpop.f32.mrf.mxu1 }
0x1404   : > { %v2858_v15 = vsub.f32 %v4946_v55, %v2836_v35  ;;  %v701_v55 = vld [vmem:[#allocation16 + $0x38] sm:$0xff]  ;;  %v695_v35 = vld [vmem:[#allocation16 + $0x8] sm:$0xff] }
0x140b   : > { %v2839_v16 = vpop.f32.mrf.mxu1 }
0x140c   : > { %v2859_v28 = vsub.f32 %v4942_v56, %v2839_v16 }
0x1413   : > { %v2842_v51 = vpop.f32.mrf.mxu1 }
0x1414   : > { %v2860_v57 = vsub.f32 %v4938_v37, %v2842_v51  ;;  %v2854_v37 = vsub.f32 %v6317_v41, %v2824_v62  ;;  %v702_v51 = vld [vmem:[#allocation16 + $0x40] sm:$0xff] }
0x1415   : > { %v5989_v60 = vmul.f32 %v3079_v21, %v702_v51 }
0x141b   : > { %v2845_v4 = vpop.f32.mrf.mxu1 }
0x141c   : > { %v2861_v40 = vsub.f32 %v4934_v12, %v2845_v4  ;;  %v703_v12 = vld [vmem:[#allocation16 + $0x48] sm:$0xff]  ;;  %v3082_v4 = vpop.f32.mrf.mxu3 }
0x141d   : > { %v5985_v56 = vmul.f32 %v3082_v4, %v703_v12  ;;  %v6378_v4 = vld [vmem:[#allocation51_spill] sm:$0xff] }
0x141e   : > { %vm833_vm14 = vweird.f32 %v6378_v4 }
0x1423   : > { %v2848_v5 = vpop.f32.mrf.mxu1 }
0x1424   : > { %v2862_v18 = vsub.f32 %v4930_v9, %v2848_v5  ;;  %v2855_v9 = vsub.f32 %v4958_v44, %v2827_v26  ;;  %v5992_v44 = vmul.f32 %v3076_v6, %v701_v55 }
0x142b   : > { %v2851_v11 = vpop.f32.mrf.mxu1 }
0x142c   : > { %v2863_v7 = vsub.f32 %v4927_v54, %v2851_v11  ;;  %v2856_v54 = vsub.f32 %v4954_v22, %v2830_v31  ;;  %v700_v22 = vld [vmem:[#allocation16 + $0x30] sm:$0xff] }
0x142d   : > { %v5995_v41 = vmul.f32 %v3073_v63, %v700_v22  ;;  %v696_v31 = vld [vmem:[#allocation16 + $0x10] sm:$0xff]  ;;  %v6013_v63 = vmul.f32 %v5973_v13, %v695_v35 }
0x142e   : > { %2870 = vmatpush.msra.mxu0 %v2863_v7  ;;  %v6009_v16 = vmul.f32 %v3061_v29, %v696_v31 }
0x1430   : > { %2871 = vmatpush.msra.mxu0 %v2862_v18 }
0x1432   : > { %2872 = vmatpush.msra.mxu0 %v2861_v40 }
0x1434   : > { %2873 = vmatpush.msra.mxu0 %v2860_v57 }
0x1436   : > { %2874 = vmatpush.msra.mxu0 %v2859_v28 }
0x1438   : > { %2875 = vmatpush.msra.mxu0 %v2858_v15  ;;  %v698_v15 = vld [vmem:[#allocation16 + $0x20] sm:$0xff] }
0x1439   : > { %v6003_v26 = vmul.f32 %v3067_v27, %v698_v15 }
0x143a   : > { %2876 = vmatpush.msra.mxu0 %v2857_v38  ;;  %v699_v38 = vld [vmem:[#allocation16 + $0x28] sm:$0xff] }
0x143b   : > { %v5998_v62 = vmul.f32 %v3070_v8, %v699_v38  ;;  %v694_v8 = vld [vmem:[#allocation16] sm:$0xff]  ;;  %v6379_v38 = vld [vmem:[#allocation52_spill] sm:$0xff] }
0x143c   : > { %2877 = vmatpush.msra.mxu0 %v2856_v54  ;;  %vm847_vm3 = vweird.f32 %v6379_v38 }
0x143e   : > { %2878 = vmatpush.msra.mxu0 %v2855_v9  ;;  %v6377_v9 = vld [vmem:[#allocation50_spill] sm:$0xff] }
0x143f   : > { %3903 = vrcp.f32 %v6377_v9  ;;  %vm819_vm9 = vweird.f32 %v6377_v9 }
0x1440   : > { %2879 = vmatpush.msra.mxu0 %v2854_v37  ;;  %3905 = vrcp.f32 %v6378_v4 }
0x1441   : > { %3681 = vmatmul.msk.f32.vlgmr.msra.gmra.mxu0 %vm736_vm0, %v5905_v42  ;;  %v697_v42 = vld [vmem:[#allocation16 + $0x18] sm:$0xff]  ;;  %3907 = vrcp.f32 %v6379_v38 }
0x1442   : > { %3163 = vmatpush.msrb.mxu0 %v5985_v56  ;;  %v6006_v49 = vmul.f32 %v3064_v24, %v697_v42 }
0x1444   : > { %3164 = vmatpush.msrb.mxu0 %v5989_v60 }
0x1445   : > { %v3904_v12 = vpop.eup %3903 }
0x1446   : > { %3165 = vmatpush.msrb.mxu0 %v5992_v44  ;;  %v815_v37 = vmul.f32 %v3904_v12, %v6377_v9  ;;  %v3906_v22 = vpop.eup %3905  ;;  %vm820_vm11 = vweird.f32 %v3904_v12 }
0x1447   : > { %v829_v42 = vmul.f32 %v3906_v22, %v6378_v4  ;;  %vm821_vm10 = vmor %vm819_vm9, %vm820_vm11  ;;  %vm834_vm13 = vweird.f32 %v3906_v22 }
0x1448   : > { %3166 = vmatpush.msrb.mxu0 %v5995_v41  ;;  %v816_v51 = vsub.f32 1.0, %v815_v37  ;;  %vm835_vm15 = vmor %vm833_vm14, %vm834_vm13 }
0x1449   : > { %3682 = vmatmul.msk.f32.gmra.mxu0 %vm736_vm0, %v5909_v53  ;;  %v6019_v53 = vmul.f32 %v5971_v45, %v694_v8  ;;  %v830_v35 = vsub.f32 1.0, %v829_v42  ;;  %v3908_v8 = vpop.eup %3907 }
0x144a   : > { %3167 = vmatpush.msrb.mxu0 %v5998_v62  ;;  %v817_v15 = vmul.f32 %v3904_v12, %v816_v51  ;;  %vm848_vm2 = vweird.f32 %v3908_v8 }
0x144b   : > { %vm849_vm4 = vmor %vm847_vm3, %vm848_vm2 }
0x144c   : > { %3168 = vmatpush.msrb.mxu0 %v6003_v26  ;;  %v818_v31 = vadd.f32 %v3904_v12, %v817_v15 }
0x144e   : > { %3169 = vmatpush.msrb.mxu0 %v6006_v49 }
0x1450   : > { %3170 = vmatpush.msrb.mxu0 %v6009_v16 }
0x1451   : > { %3683 = vmatmul.msk.f32.gmra.mxu0 %vm736_vm0, %v5913_v3 }
0x1452   : > { %3171 = vmatpush.msrb.mxu0 %v6013_v63 }
0x1454   : > { %3172 = vmatpush.msrb.mxu0 %v6019_v53 }
0x1459   : > { %3684 = vmatmul.msk.f32.gmra.mxu0 %vm736_vm0, %v5917_v39 }
0x1461   : > { %3685 = vmatmul.msk.f32.gmra.mxu0 %vm736_vm0, %v5919_v47 }
0x1469   : > { %3686 = vmatmul.msk.f32.gmra.mxu0 %vm736_vm0, %v5921_v61 }
0x1471   : > { %3687 = vmatmul.msk.f32.gmra.mxu0 %vm736_vm0, %v5923_v30 }
0x1479   : > { %3688 = vmatmul.msk.f32.gmra.mxu0 %vm736_vm0, %v5925_v19 }
0x1481   : > { %3689 = vmatmul.msk.f32.gmra.mxu0 %vm736_vm0, %v5927_v32 }
0x1489   : > { %3690 = vmatmul.msk.f32.gmra.mxu0 %vm736_vm0, %v5929_v50 }
0x14be   : > { %v2881_v3 = vpop.f32.mrf.mxu0 }
0x14c6   : > { %v2884_v39 = vpop.f32.mrf.mxu0 }
0x14ce   : > { %v2887_v45 = vpop.f32.mrf.mxu0 }
0x14d6   : > { %v2890_v13 = vpop.f32.mrf.mxu0 }
0x14d7   : > { %v2914_v7 = vsub.f32 %v5076_v17, %v2890_v13  ;;  %v2924_v17 = vmul.f32 0.25, %v5832_v33  ;;  %v6376_v33 = vld [vmem:[#allocation70_spill] sm:$0xff]  ;;  %v822_v13 = vsel %vm821_vm10, %v3904_v12, %v818_v31 }
0x14de   : > { %v2893_v47 = vpop.f32.mrf.mxu0 }
0x14df   : > { %v2915_v11 = vsub.f32 %v5072_v48, %v2893_v47  ;;  %v2923_v48 = vmul.f32 0.25, %v5830_v52  ;;  %v831_v47 = vmul.f32 %v3906_v22, %v830_v35 }
0x14e6   : > { %v2896_v29 = vpop.f32.mrf.mxu0 }
0x14e7   : > { %v2916_v6 = vsub.f32 %v5068_v20, %v2896_v29  ;;  %v2922_v20 = vmul.f32 0.25, %v5828_v1  ;;  %v6375_v1 = vld [vmem:[#allocation69_spill] sm:$0xff]  ;;  %v843_v29 = vmul.f32 %v3908_v8, %v6379_v38 }
0x14e8   : > { %v2929_v52 = vmul.f32 0.25, %v6375_v1 }
0x14ee   : > { %v2899_v24 = vpop.f32.mrf.mxu0 }
0x14ef   : > { %v2917_v50 = vsub.f32 %v5064_v0, %v2899_v24  ;;  %v2921_v0 = vmul.f32 0.25, %v5826_v2  ;;  %v2928_v2 = vmul.f32 0.25, %v5840_v23 }
0x14f6   : > { %v2902_v61 = vpop.f32.mrf.mxu0 }
0x14f7   : > { %v2918_v32 = vsub.f32 %v5060_v43, %v2902_v61  ;;  %v2911_v43 = vsub.f32 %v5090_v58, %v2881_v3  ;;  %v2927_v58 = vmul.f32 0.25, %v5838_v34  ;;  %v825_v3 = vand.u32 2147483648, %v6377_v9 }
0x14f9   : > { %v826_v24 = vor.u32 1.1754944e-38, %v825_v3 }
0x14fe   : > { %v2905_v27 = vpop.f32.mrf.mxu0 }
0x14ff   : > { %v2919_v19 = vsub.f32 %v5056_v59, %v2905_v27  ;;  %v2912_v59 = vsub.f32 %v5085_v25, %v2884_v39  ;;  %v2926_v25 = vmul.f32 0.25, %v5836_v14  ;;  %v823_v39 = vand.u32 2147483647, %v6377_v9 }
0x1500   : > { %v844_v27 = vsub.f32 1.0, %v843_v29 }
0x1501   : > { %vm824_vm12 = vcmp.eq.f32.partialorder %v823_v39, 8.507059e+37 }
0x1502   : > { %v827_v61 = vsel %vm824_vm12, %v826_v24, %v822_v13 }
0x1506   : > { %v2908_v5 = vpop.f32.mrf.mxu0 }
0x1507   : > { %v2920_v30 = vsub.f32 %v5053_v36, %v2908_v5  ;;  %v2913_v36 = vsub.f32 %v5080_v46, %v2887_v45  ;;  %v2925_v46 = vmul.f32 0.25, %v5834_v10  ;;  %v2930_v10 = vmul.f32 0.25, %v6376_v33  ;;  %v6380_v45 = vld [vmem:[#allocation53_spill] sm:$0xff] }
0x1508   : > { %3909 = vrcp.f32 %v6380_v45  ;;  %v832_v5 = vadd.f32 %v3906_v22, %v831_v47  ;;  %vm861_vm7 = vweird.f32 %v6380_v45 }
0x1509   : > { %2967 = vmatpush.msra.mxu2 %v2920_v30 }
0x150b   : > { %2968 = vmatpush.msra.mxu2 %v2919_v19  ;;  %v839_v19 = vand.u32 2147483648, %v6378_v4 }
0x150d   : > { %2969 = vmatpush.msra.mxu2 %v2918_v32  ;;  %v6381_v32 = vld [vmem:[#allocation45_spill] sm:$0xff] }
0x150e   : > { %v3910_v30 = vpop.eup %3909 }
0x150f   : > { %2970 = vmatpush.msra.mxu2 %v2917_v50  ;;  %v884_v50 = vmul.f32 %v6381_v32, %v827_v61  ;;  %vm862_vm6 = vweird.f32 %v3910_v30 }
0x1510   : > { %vm863_vm8 = vmor %vm861_vm7, %vm862_vm6 }
0x1511   : > { %2971 = vmatpush.msra.mxu2 %v2916_v6  ;;  %v837_v6 = vand.u32 2147483647, %v6378_v4 }
0x1513   : > { %2972 = vmatpush.msra.mxu2 %v2915_v11  ;;  %v6382_v11 = vld [vmem:[#allocation54_spill] sm:$0xff]  ;;  %vm838_vm1 = vcmp.eq.f32.partialorder %v837_v6, 8.507059e+37 }
0x1514   : > { %3911 = vrcp.f32 %v6382_v11  ;;  %vm875_vm10 = vweird.f32 %v6382_v11 }
0x1515   : > { %2973 = vmatpush.msra.mxu2 %v2914_v7  ;;  %v845_v7 = vmul.f32 %v3908_v8, %v844_v27 }
0x1517   : > { %2974 = vmatpush.msra.mxu2 %v2913_v36  ;;  %v857_v36 = vmul.f32 %v3910_v30, %v6380_v45 }
0x1519   : > { %2975 = vmatpush.msra.mxu2 %v2912_v59  ;;  %v836_v59 = vsel %vm835_vm15, %v3906_v22, %v832_v5 }
0x151b   : > { %2976 = vmatpush.msra.mxu2 %v2911_v43  ;;  %v840_v43 = vor.u32 1.1754944e-38, %v839_v19 }
0x151c   : > { %3691 = vmatmul.msk.f32.vlgmr.msra.gmra.mxu2 %vm736_vm0, %v2921_v0 }
0x151d   : > { %v841_v0 = vsel %vm838_vm1, %v840_v43, %v836_v59 }
0x1524   : > { %3692 = vmatmul.msk.f32.gmra.mxu2 %vm736_vm0, %v2922_v20  ;;  %v858_v20 = vsub.f32 1.0, %v857_v36 }
0x152c   : > { %3693 = vmatmul.msk.f32.gmra.mxu2 %vm736_vm0, %v2923_v48  ;;  %v846_v48 = vadd.f32 %v3908_v8, %v845_v7 }
0x152e   : > { %v850_v1 = vsel %vm849_vm4, %v3908_v8, %v846_v48 }
0x1534   : > { %3694 = vmatmul.msk.f32.gmra.mxu2 %vm736_vm0, %v2924_v17  ;;  %v3912_v17 = vpop.eup %3911 }
0x1535   : > { %vm876_vm9 = vweird.f32 %v3912_v17 }
0x1536   : > { %vm877_vm12 = vmor %vm875_vm10, %vm876_vm9 }
0x153c   : > { %3695 = vmatmul.msk.f32.gmra.mxu2 %vm736_vm0, %v2925_v46  ;;  %v853_v46 = vand.u32 2147483648, %v6379_v38 }
0x1544   : > { %3696 = vmatmul.msk.f32.gmra.mxu2 %vm736_vm0, %v2926_v25  ;;  %v6383_v25 = vld [vmem:[#allocation46_spill] sm:$0xff] }
0x154c   : > { %3697 = vmatmul.msk.f32.gmra.mxu2 %vm736_vm0, %v2927_v58  ;;  %v885_v58 = vmul.f32 %v6383_v25, %v841_v0 }
0x1554   : > { %3698 = vmatmul.msk.f32.gmra.mxu2 %vm736_vm0, %v2928_v2  ;;  %v851_v2 = vand.u32 2147483647, %v6379_v38 }
0x1556   : > { %vm852_vm5 = vcmp.eq.f32.partialorder %v851_v2, 8.507059e+37 }
0x155c   : > { %3699 = vmatmul.msk.f32.gmra.mxu2 %vm736_vm0, %v2929_v52  ;;  %v854_v52 = vor.u32 1.1754944e-38, %v853_v46 }
0x1564   : > { %3700 = vmatmul.msk.f32.gmra.mxu2 %vm736_vm0, %v2930_v10 }
0x159f   : > { %v2978_v18 = vpop.f32.mrf.mxu2 }
0x15a7   : > { %v2981_v14 = vpop.f32.mrf.mxu2 }
0x15af   : > { %v2984_v40 = vpop.f32.mrf.mxu2 }
0x15b7   : > { %v2987_v57 = vpop.f32.mrf.mxu2 }
0x15bf   : > { %v2990_v21 = vpop.f32.mrf.mxu2 }
0x15c7   : > { %v2993_v34 = vpop.f32.mrf.mxu2 }
0x15cf   : > { %v2996_v28 = vpop.f32.mrf.mxu2 }
0x15d7   : > { %v2999_v54 = vpop.f32.mrf.mxu2 }
0x15df   : > { %v3002_v23 = vpop.f32.mrf.mxu2 }
0x15e7   : > { %v3005_v55 = vpop.f32.mrf.mxu2 }
0x15e8   : > { %3116 = vmatpush.msrb.mxu1 %v3005_v55 }
0x15ea   : > { %3117 = vmatpush.msrb.mxu1 %v3002_v23 }
0x15ec   : > { %3118 = vmatpush.msrb.mxu1 %v2999_v54 }
0x15ee   : > { %3119 = vmatpush.msrb.mxu1 %v2996_v28  ;;  %v6385_v28 = vld [vmem:[#allocation48_spill] sm:$0xff] }
0x15f0   : > { %3120 = vmatpush.msrb.mxu1 %v2993_v34  ;;  %v881_v34 = vand.u32 2147483648, %v6382_v11 }
0x15f2   : > { %3121 = vmatpush.msrb.mxu1 %v2990_v21  ;;  %v882_v23 = vor.u32 1.1754944e-38, %v881_v34 }
0x15f4   : > { %3122 = vmatpush.msrb.mxu1 %v2987_v57 }
0x15f6   : > { %3123 = vmatpush.msrb.mxu1 %v2984_v40  ;;  %v865_v40 = vand.u32 2147483647, %v6380_v45 }
0x15f8   : > { %3124 = vmatpush.msrb.mxu1 %v2981_v14  ;;  %vm866_vm11 = vcmp.eq.f32.partialorder %v865_v40, 8.507059e+37 }
0x15fa   : > { %3125 = vmatpush.msrb.mxu1 %v2978_v18  ;;  %v867_v18 = vand.u32 2147483648, %v6380_v45 }
0x15fb   : > { %3711 = vmatmul.msk.f32.vlgmr.msrb.gmra.mxu1 %vm736_vm0, %v884_v50 }
0x15fc   : > { %3724 = vmatpush.msra.mxu1 %v5985_v56  ;;  %v859_v56 = vmul.f32 %v3910_v30, %v858_v20  ;;  %v868_v57 = vor.u32 1.1754944e-38, %v867_v18 }
0x15fe   : > { %3725 = vmatpush.msra.mxu1 %v5989_v60  ;;  %v871_v60 = vmul.f32 %v3912_v17, %v6382_v11  ;;  %v860_v10 = vadd.f32 %v3910_v30, %v859_v56 }
0x1600   : > { %3726 = vmatpush.msra.mxu1 %v5992_v44  ;;  %v855_v44 = vsel %vm852_vm5, %v854_v52, %v850_v1  ;;  %v872_v33 = vsub.f32 1.0, %v871_v60 }
0x1602   : > { %3727 = vmatpush.msra.mxu1 %v5995_v41  ;;  %v6384_v41 = vld [vmem:[#allocation47_spill] sm:$0xff] }
0x1603   : > { %3712 = vmatmul.msk.f32.gmra.mxu1 %vm736_vm0, %v885_v58  ;;  %v886_v14 = vmul.f32 %v6384_v41, %v855_v44 }
0x1604   : > { %3728 = vmatpush.msra.mxu1 %v5998_v62  ;;  %v873_v62 = vmul.f32 %v3912_v17, %v872_v33 }
0x1606   : > { %3729 = vmatpush.msra.mxu1 %v6003_v26  ;;  %v864_v26 = vsel %vm863_vm8, %v3910_v30, %v860_v10  ;;  %v874_v21 = vadd.f32 %v3912_v17, %v873_v62 }
0x1608   : > { %3730 = vmatpush.msra.mxu1 %v6006_v49  ;;  %v869_v49 = vsel %vm866_vm11, %v868_v57, %v864_v26  ;;  %v878_v9 = vsel %vm877_vm12, %v3912_v17, %v874_v21 }
0x1609   : > { %v887_v54 = vmul.f32 %v6385_v28, %v869_v49 }
0x160a   : > { %3731 = vmatpush.msra.mxu1 %v6009_v16  ;;  %v879_v16 = vand.u32 2147483647, %v6382_v11 }
0x160b   : > { %3713 = vmatmul.msk.f32.gmra.mxu1 %vm736_vm0, %v886_v14 }
0x160c   : > { %3732 = vmatpush.msra.mxu1 %v6013_v63  ;;  %vm880_vm13 = vcmp.eq.f32.partialorder %v879_v16, 8.507059e+37 }
0x160d   : > { %v883_v63 = vsel %vm880_vm13, %v882_v23, %v878_v9 }
0x160e   : > { %3733 = vmatpush.msra.mxu1 %v6019_v53  ;;  %v6386_v53 = vld [vmem:[#allocation49_spill] sm:$0xff] }
0x160f   : > { %v888_v12 = vmul.f32 %v6386_v53, %v883_v63 }
0x1613   : > { %3714 = vmatmul.msk.f32.gmra.mxu1 %vm736_vm0, %v887_v54 }
0x161b   : > { %3715 = vmatmul.msk.f32.gmra.mxu1 %vm736_vm0, %v888_v12 }
0x1678   : > { %v3127_v4 = vpop.f32.mrf.mxu1 }
0x1679   : > { %3716 = vmatmul.msk.f32.vlgmr.msrb.gmra.mxu0 %vm736_vm0, %v3127_v4 }
0x1680   : > { %v3130_v37 = vpop.f32.mrf.mxu1 }
0x1681   : > { %3717 = vmatmul.msk.f32.gmra.mxu0 %vm736_vm0, %v3130_v37 }
0x1688   : > { %v3133_v51 = vpop.f32.mrf.mxu1 }
0x1689   : > { %3718 = vmatmul.msk.f32.gmra.mxu0 %vm736_vm0, %v3133_v51 }
0x1690   : > { %v3136_v55 = vpop.f32.mrf.mxu1 }
0x1691   : > { %3719 = vmatmul.msk.f32.gmra.mxu0 %vm736_vm0, %v3136_v55 }
0x1698   : > { %v3139_v22 = vpop.f32.mrf.mxu1 }
0x1699   : > { %3720 = vmatmul.msk.f32.vlgmr.msra.gmra.mxu1 %vm736_vm0, %v3139_v22 }
0x16f6   : > { %v3174_v38 = vpop.f32.mrf.mxu0 }
0x16f7   : > { %3189 = vst [vmem:[%s628_s28] sm:$0xff] %v3174_v38 }
0x16fe   : > { %v3177_v15 = vpop.f32.mrf.mxu0 }
0x16ff   : > { %3190 = vst [vmem:[%s628_s28 + $0x8] sm:$0xff] %v3177_v15 }
0x1706   : > { %v3180_v42 = vpop.f32.mrf.mxu0 }
0x1707   : > { %3191 = vst [vmem:[%s628_s28 + $0x10] sm:$0xff] %v3180_v42 }
0x170e   : > { %v3183_v31 = vpop.f32.mrf.mxu0 }
0x170f   : > { %3192 = vst [vmem:[%s628_s28 + $0x18] sm:$0xff] %v3183_v31 }
0x1716   : > { %v3186_v35 = vpop.f32.mrf.mxu1 }
0x1717   : > { %3193 = vst [vmem:[%s628_s28 + $0x20] sm:$0xff] %v3186_v35 }
0x1718   : > { %4221 = shalt.err (!%p4218_p1)
}
0x1719   : > { %s4283_s20 = smov 128   ;;  %s4284_s13 = smov 8  }
0x171a   : > { %3773 = dma.vmem_to_hbm [thread:$0]  (%p4411_p7), %s3208_s27, 640, %s3210_s9, %s3195_s7, %s4283_s20, %s4283_s20, %s4284_s13  }
0x171b PF: > { %s6389_s24 = sld [smem:[#allocation24_spill]] }
0x171c   : > { %s6391_s19 = sld [smem:[#allocation27_spill]] }
0x1721   : > { %s3224_s25 = sand.u32 1, %s6389_s24  }
0x1722   : > { %p6392_p11 = scmp.ge.s32.totalorder %s6391_s19, 2  ;;  %s3225_s29 = scalar_lea.sflag [#allocation4], %s3224_s25 }
0x1724   : > { %p3805_p2 = pnand %p6392_p11, %p4370_p6 }
0x1726   : > { %p3806_p10 = pneg %p3805_p2 }
0x1728   : > { %4259 = dma.done.wait (%p3806_p10), %s3225_s29, 640  }
0x1729   : > { %4261 = vsyncadd (%p3806_p10), %s3225_s29, 4294966656  ;;  %s6393_s12 = sld [smem:[#allocation32_spill]] }
0x172a   : > { %s6394_s30 = sld [smem:[#allocation25_spill]] }
0x172b   : > { %s6395_s10 = sld [smem:[#allocation26_spill]] }
0x172c   : > { %s6396_s11 = sld [smem:[#allocation33_spill]] }
0x172f   : > { %p32_p8 = scmp.ge.s32.totalorder %s6393_s12, 4  }
0x1731   :  { %34 = sbr.rel (!%p32_p8) target bundleno = 18 (0x12), region = 181 }
0x1736   :  { %3231 = vsyncpa [#allocation3], 1 }
0x1737   :  { %3233 = vsyncpa [#allocation3 + $0x1], 1 }
0x1738   :  { %3234 = vsyncpa [#allocation6], 1 }
0x1739   :  { %3236 = vsyncpa [#allocation6 + $0x1], 1 }
0x173a   :  { %3237 = vsyncpa [#allocation9], 1 }
0x173b   :  { %3239 = vsyncpa [#allocation9 + $0x1], 1 }
0x173c   :  { %3240 = vsyncpa [#allocation12], 1 }
0x173d   :  { %3242 = vsyncpa [#allocation12 + $0x1], 1 }
0x173e   :  { %3243 = vsyncpa [#allocation15], 1 }
0x173f   :  { %3244 = vsyncpa [#allocation4], 1 }
0x1740   :  { %3246 = vsyncpa [#allocation4 + $0x1], 1 }

</bundles_post_ra>
